<compile_context>
chip_gen: v7x
topology: tpu7x:2x2x1
jax: 0.10.0
libtpu: 0.0.40
codegen_flags: <defaults>
</compile_context>

<pallas_src>
import functools

import jax
import jax.numpy as jnp
from jax.experimental import pallas as pl
from jax.experimental.pallas import tpu as pltpu

EPS = 1e-5
LANE = 128


def _tpu_defaults():
    """Generation-gate the scoped-VMEM limit and the row-tile cap."""
    try:
        vmem = int(getattr(pltpu.get_tpu_info(), "vmem_capacity_bytes", 0))
    except Exception:  # off-TPU tracing / older runtimes
        vmem = 0
    if vmem >= 96 * 1024 * 1024:        # v5e / v6e class: 128 MiB physical VMEM
        return 64 * 1024 * 1024, 1024
    return 32 * 1024 * 1024, 512        # v7x class (64 MiB) or unknown


_VMEM_LIMIT_BYTES, _ROW_TILE_CAP = _tpu_defaults()


# ---------------------------------------------------------------------------
# small helpers
# ---------------------------------------------------------------------------
def _rup(x, m):
    return (x + m - 1) // m * m


def _choose_tile(m, cap):
    """Row tile: multiple of 8, <= cap; prefer an exact divisor of m."""
    cap8 = max(8, (cap // 8) * 8)
    m8 = _rup(m, 8)
    if m8 <= cap8:
        return m8
    t = cap8
    while t >= max(128, cap8 // 4):
        if m % t == 0:
            return t
        t -= 8
    return cap8                          # caller pads m up to a multiple of it


def _choose_rchunk(ho, wconv):
    """Output-row chunk for the 3x3 conv: divisor of ho, <=~256 acc rows."""
    cap = max(1, 256 // max(1, wconv))
    r = max(1, min(ho, cap))
    while r > 1 and ho % r:
        r -= 1
    return r


def _pad_rows(x2d, m_pad):
    if x2d.shape[0] == m_pad:
        return x2d
    return jnp.pad(x2d, ((0, m_pad - x2d.shape[0]), (0, 0)))


def _pad2d(w, rows, cols):
    out = jnp.zeros((rows, cols), jnp.float32)
    return out.at[: w.shape[0], : w.shape[1]].set(w)


def _padc(v, cols):
    out = jnp.zeros((1, cols), jnp.float32)
    return out.at[:, : v.shape[1]].set(v)


def _row_spec(tm, c):
    return pl.BlockSpec((tm, c), lambda i: (i, 0))


def _bcast_spec(r, c):
    return pl.BlockSpec((r, c), lambda i: (0, 0))


def _stats_spec(c):
    return pl.BlockSpec((8, c), lambda i: (i, 0))


def _compiler_params():
    return pltpu.CompilerParams(dimension_semantics=("parallel",),
                                vmem_limit_bytes=_VMEM_LIMIT_BYTES)


def _reduce_stats(part):
    """(num_tiles*8, C) per-tile partials -> global (1, C) sum and sumsq."""
    p = part.reshape(-1, 8, part.shape[-1])
    return (jnp.sum(p[:, 0, :], axis=0, keepdims=True),
            jnp.sum(p[:, 1, :], axis=0, keepdims=True))


# ---------------------------------------------------------------------------
# in-kernel building blocks
# ---------------------------------------------------------------------------
def _bn_scale_shift(ssum, ssq, gamma, beta, m_rows):
    """Training-mode BN as y*scale + shift, from global per-channel sums."""
    mean = ssum * (1.0 / m_rows)
    var = ssq * (1.0 / m_rows) - mean * mean
    inv = jax.lax.rsqrt(jnp.maximum(var, 0.0) + EPS)
    scale = gamma * inv
    return scale, beta - mean * scale


def _store_stats(st_ref, y):
    """Per-tile partial stats block: row 0 = sum, row 1 = sumsq, rest zero."""
    st_ref[...] = jnp.zeros_like(st_ref)
    st_ref[0:1, :] = jnp.sum(y, axis=0, keepdims=True)
    st_ref[1:2, :] = jnp.sum(y * y, axis=0, keepdims=True)


# ---------------------------------------------------------------------------
# Pallas kernels
# ---------------------------------------------------------------------------
def _conv1x1_stats_kernel(x_ref, w_ref, y_ref, st_ref):
    """y = x @ w (bf16 -> f32 acc); emit this tile's BN partial statistics."""
    y = jnp.dot(x_ref[...], w_ref[...], preferred_element_type=jnp.float32)
    y_ref[...] = y.astype(y_ref.dtype)
    _store_stats(st_ref, y)


def _conv3x3_kernel(y1_ref, s1_ref, q1_ref, g1_ref, b1_ref, w2_ref,
                    y2_ref, st_ref, t1p_ref,
                    *, h, w, ho, stride, rchunk, m_rows):
    """BN1+ReLU streamed into a padded VMEM scratch, then the 3x3 conv.

    The conv runs in chunks of `rchunk` output rows; for each of the 3 kh taps
    the 3 kw-shifted windows are concatenated along channels so the MXU
    contraction has K = 3*C.  Rows are decimated by `stride` in-kernel (cheap
    major-dim reshape); columns are computed at full width and the wrapper
    decimates them for stride > 1 (stats are masked to the kept columns).
    """
    _, wp, cp = t1p_ref.shape

    # ---- BN1 + ReLU into the zero-padded scratch, in bounded row chunks ----
    t1p_ref[...] = jnp.zeros_like(t1p_ref)
    sc1, sh1 = _bn_scale_shift(s1_ref[...], q1_ref[...],
                               g1_ref[...], b1_ref[...], m_rows)
    hc = max(1, min(h, 256 // max(1, w)))
    nh = pl.cdiv(h, hc)

    def bn_body(c, carry):
        r0 = jnp.minimum(c * hc, h - hc)
        rows = y1_ref[0, pl.ds(r0, hc), :, :].astype(jnp.float32)
        t = jnp.maximum(rows.reshape(hc * w, cp) * sc1 + sh1, 0.0)
        t1p_ref[pl.ds(r0 + 1, hc), 1:w + 1, :] = (
            t.astype(jnp.bfloat16).reshape(hc, w, cp))
        return carry

    jax.lax.fori_loop(0, nh, bn_body, 0, unroll=nh <= 4)

    # ---- 3x3 conv, K = 3*cp per tap, chunked over output rows --------------
    st_ref[...] = jnp.zeros_like(st_ref)
    nchunks = ho // rchunk

    def conv_body(j, carry):
        r0 = j * rchunk
        acc = jnp.zeros((rchunk * w, cp), jnp.float32)
        for kh in range(3):                          # 3 static taps
            if stride == 1:
                rows = t1p_ref[pl.ds(r0 + kh, rchunk), :, :]
            else:                                    # row decimation (major dim)
                rows = t1p_ref[pl.ds(stride * r0 + kh, stride * rchunk), :, :]
                rows = rows.reshape(rchunk, stride, wp, cp)[:, 0, :, :]
            lhs = jnp.concatenate(
                [rows[:, kw:kw + w, :] for kw in range(3)], axis=-1)
            acc = acc + jnp.dot(lhs.reshape(rchunk * w, 3 * cp),
                                w2_ref[kh, :, :],
                                preferred_element_type=jnp.float32)
        y2_ref[0, pl.ds(r0, rchunk), :, :] = (
            acc.reshape(rchunk, w, cp).astype(y2_ref.dtype))
        if stride == 1:
            a1, a2 = acc, acc * acc
        else:                                        # stats only over kept cols
            col = jax.lax.broadcasted_iota(jnp.int32, (rchunk * w, 1), 0) % w
            keep = (col % stride == 0).astype(jnp.float32)
            a1 = acc * keep
            a2 = acc * a1
        st_ref[0:1, :] += jnp.sum(a1, axis=0, keepdims=True)
        st_ref[1:2, :] += jnp.sum(a2, axis=0, keepdims=True)
        return carry

    jax.lax.fori_loop(0, nchunks, conv_body, 0, unroll=nchunks <= 4)


def _stats3_proj_kernel(y2_ref, s2_ref, q2_ref, g2_ref, b2_ref, w3_ref,
                        xs_ref, ws_ref, st3_ref, stsc_ref,
                        *, m_rows, m_valid, needs_mask):
    """BN2+ReLU fused with conv3 and shortcut conv; emit partial stats only."""
    sc2, sh2 = _bn_scale_shift(s2_ref[...], q2_ref[...],
                               g2_ref[...], b2_ref[...], m_rows)
    t2 = jnp.maximum(y2_ref[...].astype(jnp.float32) * sc2 + sh2, 0.0)
    y3 = jnp.dot(t2.astype(jnp.bfloat16), w3_ref[...],
                 preferred_element_type=jnp.float32)
    ysc = jnp.dot(xs_ref[...], ws_ref[...], preferred_element_type=jnp.float32)
    if needs_mask:                                   # zero padded rows' stats
        row = (jax.lax.broadcasted_iota(jnp.int32, (y3.shape[0], 1), 0)
               + pl.program_id(0) * y3.shape[0])
        valid = (row < m_valid).astype(jnp.float32)
        y3 = y3 * valid
        ysc = ysc * valid
    _store_stats(st3_ref, y3)
    _store_stats(stsc_ref, ysc)


def _stats3_id_kernel(y2_ref, s2_ref, q2_ref, g2_ref, b2_ref, w3_ref,
                      st3_ref, *, m_rows, m_valid, needs_mask):
    sc2, sh2 = _bn_scale_shift(s2_ref[...], q2_ref[...],
                               g2_ref[...], b2_ref[...], m_rows)
    t2 = jnp.maximum(y2_ref[...].astype(jnp.float32) * sc2 + sh2, 0.0)
    y3 = jnp.dot(t2.astype(jnp.bfloat16), w3_ref[...],
                 preferred_element_type=jnp.float32)
    if needs_mask:
        row = (jax.lax.broadcasted_iota(jnp.int32, (y3.shape[0], 1), 0)
               + pl.program_id(0) * y3.shape[0])
        y3 = y3 * (row < m_valid).astype(jnp.float32)
    _store_stats(st3_ref, y3)


def _final_proj_kernel(y2_ref, s2_ref, q2_ref, g2_ref, b2_ref, w3_ref,
                       s3_ref, q3_ref, g3_ref, b3_ref,
                       xs_ref, ws_ref, ssc_ref, qsc_ref, gs_ref, bs_ref,
                       o_ref, *, m_rows):
    """Recompute conv3 / shortcut conv fused with BN3 + BNsc + add + ReLU."""
    sc2, sh2 = _bn_scale_shift(s2_ref[...], q2_ref[...],
                               g2_ref[...], b2_ref[...], m_rows)
    t2 = jnp.maximum(y2_ref[...].astype(jnp.float32) * sc2 + sh2, 0.0)
    y3 = jnp.dot(t2.astype(jnp.bfloat16), w3_ref[...],
                 preferred_element_type=jnp.float32)
    ysc = jnp.dot(xs_ref[...], ws_ref[...], preferred_element_type=jnp.float32)
    sc3, sh3 = _bn_scale_shift(s3_ref[...], q3_ref[...],
                               g3_ref[...], b3_ref[...], m_rows)
    scs, shs = _bn_scale_shift(ssc_ref[...], qsc_ref[...],
                               gs_ref[...], bs_ref[...], m_rows)
    o_ref[...] = jnp.maximum(y3 * sc3 + sh3 + ysc * scs + shs, 0.0
                             ).astype(o_ref.dtype)


def _final_id_kernel(y2_ref, s2_ref, q2_ref, g2_ref, b2_ref, w3_ref,
                     s3_ref, q3_ref, g3_ref, b3_ref, xs_ref,
                     o_ref, *, m_rows):
    sc2, sh2 = _bn_scale_shift(s2_ref[...], q2_ref[...],
                               g2_ref[...], b2_ref[...], m_rows)
    t2 = jnp.maximum(y2_ref[...].astype(jnp.float32) * sc2 + sh2, 0.0)
    y3 = jnp.dot(t2.astype(jnp.bfloat16), w3_ref[...],
                 preferred_element_type=jnp.float32)
    sc3, sh3 = _bn_scale_shift(s3_ref[...], q3_ref[...],
                               g3_ref[...], b3_ref[...], m_rows)
    o_ref[...] = jnp.maximum(
        y3 * sc3 + sh3 + xs_ref[...].astype(jnp.float32), 0.0
    ).astype(o_ref.dtype)


# ---------------------------------------------------------------------------
# pallas_call wrappers
# ---------------------------------------------------------------------------
def _conv1x1_stats(x2d, w, *, tm):
    m, kp = x2d.shape
    cp = w.shape[1]
    nt = m // tm
    return pl.pallas_call(
        _conv1x1_stats_kernel,
        out_shape=(jax.ShapeDtypeStruct((m, cp), jnp.bfloat16),
                   jax.ShapeDtypeStruct((nt * 8, cp), jnp.float32)),
        grid=(nt,),
        in_specs=[_row_spec(tm, kp), _bcast_spec(kp, cp)],
        out_specs=(_row_spec(tm, cp), _stats_spec(cp)),
        compiler_params=_compiler_params(),
    )(x2d, w)


def _conv3x3(y1_img, s1, q1, g1, b1, w2, *, stride, ho, m_rows):
    n, h, w, cp = y1_img.shape
    hp = max(h + 2, stride * ho + 2)
    wp = w + 2
    rchunk = _choose_rchunk(ho, w)
    kern = functools.partial(_conv3x3_kernel, h=h, w=w, ho=ho, stride=stride,
                             rchunk=rchunk, m_rows=float(m_rows))
    y2c, st2 = pl.pallas_call(
        kern,
        out_shape=(jax.ShapeDtypeStruct((n, ho, w, cp), jnp.bfloat16),
                   jax.ShapeDtypeStruct((n * 8, cp), jnp.float32)),
        grid=(n,),
        in_specs=[pl.BlockSpec((1, h, w, cp), lambda i: (i, 0, 0, 0)),
                  _bcast_spec(1, cp), _bcast_spec(1, cp),
                  _bcast_spec(1, cp), _bcast_spec(1, cp),
                  pl.BlockSpec((3, 3 * cp, cp), lambda i: (0, 0, 0))],
        out_specs=(pl.BlockSpec((1, ho, w, cp), lambda i: (i, 0, 0, 0)),
                   _stats_spec(cp)),
        scratch_shapes=[pltpu.VMEM((hp, wp, cp), jnp.bfloat16)],
        compiler_params=_compiler_params(),
    )(y1_img, s1, q1, g1, b1, w2)
    if stride != 1:
        # TODO(synk): fold the column decimation into the kernel (strided
        # pl.ds / reshape decimation) to skip computing the dropped columns.
        y2c = y2c[:, :, ::stride, :]
    return y2c, st2


def _stats3_proj(y2_2d, s2, q2, g2, b2, w3, xs2d, ws, *, tm, m_rows):
    m, cmid = y2_2d.shape
    cin = xs2d.shape[1]
    cout = w3.shape[1]
    nt = m // tm
    kern = functools.partial(_stats3_proj_kernel, m_rows=float(m_rows),
                             m_valid=m_rows, needs_mask=(m != m_rows))
    return pl.pallas_call(
        kern,
        out_shape=(jax.ShapeDtypeStruct((nt * 8, cout), jnp.float32),
                   jax.ShapeDtypeStruct((nt * 8, cout), jnp.float32)),
        grid=(nt,),
        in_specs=[_row_spec(tm, cmid),
                  _bcast_spec(1, cmid), _bcast_spec(1, cmid),
                  _bcast_spec(1, cmid), _bcast_spec(1, cmid),
                  _bcast_spec(cmid, cout),
                  _row_spec(tm, cin), _bcast_spec(cin, cout)],
        out_specs=(_stats_spec(cout), _stats_spec(cout)),
        compiler_params=_compiler_params(),
    )(y2_2d, s2, q2, g2, b2, w3, xs2d, ws)


def _stats3_id(y2_2d, s2, q2, g2, b2, w3, *, tm, m_rows):
    m, cmid = y2_2d.shape
    cout = w3.shape[1]
    nt = m // tm
    kern = functools.partial(_stats3_id_kernel, m_rows=float(m_rows),
                             m_valid=m_rows, needs_mask=(m != m_rows))
    return pl.pallas_call(
        kern,
        out_shape=jax.ShapeDtypeStruct((nt * 8, cout), jnp.float32),
        grid=(nt,),
        in_specs=[_row_spec(tm, cmid),
                  _bcast_spec(1, cmid), _bcast_spec(1, cmid),
                  _bcast_spec(1, cmid), _bcast_spec(1, cmid),
                  _bcast_spec(cmid, cout)],
        out_specs=_stats_spec(cout),
        compiler_params=_compiler_params(),
    )(y2_2d, s2, q2, g2, b2, w3)


def _final_proj(y2_2d, s2, q2, g2, b2, w3, s3, q3, g3, b3,
                xs2d, ws, ssc, qsc, gs, bs, *, tm, m_rows):
    m, cmid = y2_2d.shape
    cin = xs2d.shape[1]
    cout = w3.shape[1]
    kern = functools.partial(_final_proj_kernel, m_rows=float(m_rows))
    return pl.pallas_call(
        kern,
        out_shape=jax.ShapeDtypeStruct((m, cout), jnp.bfloat16),
        grid=(m // tm,),
        in_specs=[_row_spec(tm, cmid),
                  _bcast_spec(1, cmid), _bcast_spec(1, cmid),
                  _bcast_spec(1, cmid), _bcast_spec(1, cmid),
                  _bcast_spec(cmid, cout),
                  _bcast_spec(1, cout), _bcast_spec(1, cout),
                  _bcast_spec(1, cout), _bcast_spec(1, cout),
                  _row_spec(tm, cin), _bcast_spec(cin, cout),
                  _bcast_spec(1, cout), _bcast_spec(1, cout),
                  _bcast_spec(1, cout), _bcast_spec(1, cout)],
        out_specs=_row_spec(tm, cout),
        compiler_params=_compiler_params(),
    )(y2_2d, s2, q2, g2, b2, w3, s3, q3, g3, b3, xs2d, ws, ssc, qsc, gs, bs)


def _final_id(y2_2d, s2, q2, g2, b2, w3, s3, q3, g3, b3, xs2d, *, tm, m_rows):
    m, cmid = y2_2d.shape
    cout = w3.shape[1]
    kern = functools.partial(_final_id_kernel, m_rows=float(m_rows))
    return pl.pallas_call(
        kern,
        out_shape=jax.ShapeDtypeStruct((m, cout), jnp.bfloat16),
        grid=(m // tm,),
        in_specs=[_row_spec(tm, cmid),
                  _bcast_spec(1, cmid), _bcast_spec(1, cmid),
                  _bcast_spec(1, cmid), _bcast_spec(1, cmid),
                  _bcast_spec(cmid, cout),
                  _bcast_spec(1, cout), _bcast_spec(1, cout),
                  _bcast_spec(1, cout), _bcast_spec(1, cout),
                  _row_spec(tm, xs2d.shape[1])],
        out_specs=_row_spec(tm, cout),
        compiler_params=_compiler_params(),
    )(y2_2d, s2, q2, g2, b2, w3, s3, q3, g3, b3, xs2d)


# ---------------------------------------------------------------------------
# Bottleneck module (deterministic in-script parameters)
# ---------------------------------------------------------------------------
class BottleneckPallas:
    EXPANSION = 4

    def __init__(self, key, in_planes, planes, stride=1):
        self.in_planes, self.planes, self.stride = in_planes, planes, stride
        self.out_planes = self.EXPANSION * planes
        self.has_proj = stride != 1 or in_planes != self.out_planes
        self.cin_p = _rup(in_planes, LANE)
        self.cmid_p = _rup(planes, LANE)
        self.cout_p = _rup(self.out_planes, LANE)

        keys = jax.random.split(key, 8)

        def w_init(k, shape, fan_in):
            return jax.random.normal(k, shape, jnp.float32) / jnp.sqrt(float(fan_in))

        def bn_init(k, c):
            kg, kb = jax.random.split(k)
            return (1.0 + 0.1 * jax.random.normal(kg, (1, c), jnp.float32),
                    0.1 * jax.random.normal(kb, (1, c), jnp.float32))

        # unpadded f32 parameters (source of truth; used by the reference)
        self.w1 = w_init(keys[0], (in_planes, planes), in_planes)
        self.w2 = w_init(keys[1], (3, 3, planes, planes), 9 * planes)  # (kh,kw,ci,co)
        self.w3 = w_init(keys[2], (planes, self.out_planes), planes)
        self.g1, self.b1 = bn_init(keys[3], planes)
        self.g2, self.b2 = bn_init(keys[4], planes)
        self.g3, self.b3 = bn_init(keys[5], self.out_planes)
        if self.has_proj:
            self.ws = w_init(keys[6], (in_planes, self.out_planes), in_planes)
            self.gs, self.bs = bn_init(keys[7], self.out_planes)

        # lane-padded, bf16 copies for the kernels
        self.w1_p = _pad2d(self.w1, self.cin_p, self.cmid_p).astype(jnp.bfloat16)
        w2p = jnp.zeros((3, 3, self.cmid_p, self.cmid_p), jnp.float32)
        w2p = w2p.at[:, :, :planes, :planes].set(self.w2)
        # (kh, kw*cp + ci, co): matches the kw-concatenated (K = 3*cp) operand.
        self.w2_p = w2p.reshape(3, 3 * self.cmid_p, self.cmid_p).astype(jnp.bfloat16)
        self.w3_p = _pad2d(self.w3, self.cmid_p, self.cout_p).astype(jnp.bfloat16)
        self.g1_p, self.b1_p = _padc(self.g1, self.cmid_p), _padc(self.b1, self.cmid_p)
        self.g2_p, self.b2_p = _padc(self.g2, self.cmid_p), _padc(self.b2, self.cmid_p)
        self.g3_p, self.b3_p = _padc(self.g3, self.cout_p), _padc(self.b3, self.cout_p)
        if self.has_proj:
            self.ws_p = _pad2d(self.ws, self.cin_p, self.cout_p).astype(jnp.bfloat16)
            self.gs_p, self.bs_p = _padc(self.gs, self.cout_p), _padc(self.bs, self.cout_p)

    def __call__(self, x_nchw):
        n, cin, h, w = x_nchw.shape
        s = self.stride
        ho, wo = (h - 1) // s + 1, (w - 1) // s + 1
        m0, m1 = n * h * w, n * ho * wo
        tm0 = _choose_tile(m0, _ROW_TILE_CAP)
        tm1 = _choose_tile(m1, _ROW_TILE_CAP)
        m0p, m1p = _rup(m0, tm0), _rup(m1, tm1)

        # NHWC, lane-padded channels, bf16 (single fused glue pass).
        # TODO(synk): keep NHWC end-to-end across blocks to drop the boundary
        # NCHW<->NHWC transposes.
        xt = jnp.transpose(x_nchw, (0, 2, 3, 1)).astype(jnp.bfloat16)
        x_p = jnp.zeros((n, h, w, self.cin_p), jnp.bfloat16).at[..., :cin].set(xt)

        # ---- conv1 (1x1) + BN1 partial stats --------------------------------
        y1, st1 = _conv1x1_stats(_pad_rows(x_p.reshape(m0, self.cin_p), m0p),
                                 self.w1_p, tm=tm0)
        s1, q1 = _reduce_stats(st1)
        if m0p != m0:
            y1 = y1[:m0]

        # ---- BN1+ReLU fused into conv2 (3x3, stride, pad=1) + BN2 stats -----
        y2, st2 = _conv3x3(y1.reshape(n, h, w, self.cmid_p), s1, q1,
                           self.g1_p, self.b1_p, self.w2_p,
                           stride=s, ho=ho, m_rows=m0)
        s2, q2 = _reduce_stats(st2)
        y2_2d = _pad_rows(y2.reshape(m1, self.cmid_p), m1p)

        # shortcut input (strided spatial subsample, bf16, lane padded)
        xs = _pad_rows(x_p[:, ::s, ::s, :].reshape(m1, self.cin_p), m1p)

        if self.has_proj:
            st3, stsc = _stats3_proj(y2_2d, s2, q2, self.g2_p, self.b2_p,
                                     self.w3_p, xs, self.ws_p,
                                     tm=tm1, m_rows=m1)
            s3, q3 = _reduce_stats(st3)
            ssc, qsc = _reduce_stats(stsc)
            out2d = _final_proj(y2_2d, s2, q2, self.g2_p, self.b2_p, self.w3_p,
                                s3, q3, self.g3_p, self.b3_p,
                                xs, self.ws_p, ssc, qsc, self.gs_p, self.bs_p,
                                tm=tm1, m_rows=m1)
        else:
            st3 = _stats3_id(y2_2d, s2, q2, self.g2_p, self.b2_p, self.w3_p,
                             tm=tm1, m_rows=m1)
            s3, q3 = _reduce_stats(st3)
            out2d = _final_id(y2_2d, s2, q2, self.g2_p, self.b2_p, self.w3_p,
                              s3, q3, self.g3_p, self.b3_p, xs,
                              tm=tm1, m_rows=m1)

        if m1p != m1:
            out2d = out2d[:m1]
        out = out2d[:, :self.out_planes].astype(jnp.float32)
        out = out.reshape(n, ho, wo, self.out_planes)
        return jnp.transpose(out, (0, 3, 1, 2))


# ---------------------------------------------------------------------------
# Pure-JAX reference (NCHW, lax.conv) for the correctness check
# ---------------------------------------------------------------------------
def reference_forward(block, x_nchw):
    def conv(x, w_oihw, stride=1, pad=0):
        return jax.lax.conv_general_dilated(
            x, w_oihw, (stride, stride), [(pad, pad), (pad, pad)],
            dimension_numbers=("NCHW", "OIHW", "NCHW"))

    def bn(x, gamma, beta):
        mean = jnp.mean(x, axis=(0, 2, 3), keepdims=True)
        var = jnp.mean(jnp.square(x - mean), axis=(0, 2, 3), keepdims=True)
        g = gamma.reshape(1, -1, 1, 1)
        b = beta.reshape(1, -1, 1, 1)
        return g * (x - mean) * jax.lax.rsqrt(var + EPS) + b

    w1 = jnp.transpose(block.w1)[:, :, None, None]
    w2 = jnp.transpose(block.w2, (3, 2, 0, 1))
    w3 = jnp.transpose(block.w3)[:, :, None, None]

    out = jax.nn.relu(bn(conv(x_nchw, w1), block.g1, block.b1))
    out = jax.nn.relu(bn(conv(out, w2, stride=block.stride, pad=1),
                         block.g2, block.b2))
    out = bn(conv(out, w3), block.g3, block.b3)
    if block.has_proj:
        ws = jnp.transpose(block.ws)[:, :, None, None]
        sc = bn(conv(x_nchw, ws, stride=block.stride), block.gs, block.bs)
    else:
        sc = x_nchw
    return jax.nn.relu(out + sc)


if __name__ == "__main__":
    key = jax.random.PRNGKey(0)
    configs = [
        # (in_planes, planes, stride, batch, spatial)
        (16, 4, 1, 2, 8),    # identity-shortcut path
        (4, 4, 2, 2, 16),    # projection shortcut + strided 3x3 path
    ]
    for cfg in configs:
        in_planes, planes, stride, n, hw = cfg
        key, kparam, kx = jax.random.split(key, 3)
        x = jax.random.normal(kx, (n, in_planes, hw, hw), jnp.float32)  # NCHW
        block = BottleneckPallas(kparam, in_planes, planes, stride=stride)
        out = jax.block_until_ready(jax.jit(block.__call__)(x))
        ref = jax.block_until_ready(reference_forward(block, x))
        ho = (hw - 1) // stride + 1
        assert out.shape == (n, block.out_planes, ho, ho), (cfg, out.shape)
        if not bool(jnp.allclose(out, ref, atol=5e-2, rtol=5e-2)):
            raise AssertionError(
                f"config {cfg}: mismatch vs reference, max abs diff "
                f"{float(jnp.max(jnp.abs(out - ref)))}")
    print("KERNEL_OK")
</pallas_src>

<mosaic_0001>
module attributes {stable_mosaic.version = 11 : i64} {
  func.func @_conv1x1_stats_kernel(%arg0: i32, %arg1: memref<128x128xbf16, #tpu.memory_space<vmem>>, %arg2: memref<128x128xbf16, #tpu.memory_space<vmem>>, %arg3: memref<128x128xbf16, #tpu.memory_space<vmem>>, %arg4: memref<8x128xf32, #tpu.memory_space<vmem>>) attributes {dimension_semantics = [#tpu.dimension_semantics<parallel>], iteration_bounds = array<i64: 1>, scalar_prefetch = 0 : i64, scratch_operands = 0 : i64, tpu.core_type = #tpu.core_type<tc>, window_params = [{transform_indices = @transform_0, window_bounds = array<i64: 128, 128>}, {pipeline_mode = #tpu.pipeline_mode<synchronous>, transform_indices = @transform_1, window_bounds = array<i64: 128, 128>}, {transform_indices = @transform_2, window_bounds = array<i64: 128, 128>}, {transform_indices = @transform_3, window_bounds = array<i64: 8, 128>}]} {
    %c0 = arith.constant 0 : index
    %c0_0 = arith.constant 0 : index
    %0 = vector.load %arg1[%c0, %c0_0] : memref<128x128xbf16, #tpu.memory_space<vmem>>, vector<128x128xbf16>
    %c0_1 = arith.constant 0 : index
    %c0_2 = arith.constant 0 : index
    %1 = vector.load %arg2[%c0_1, %c0_2] : memref<128x128xbf16, #tpu.memory_space<vmem>>, vector<128x128xbf16>
    %cst = arith.constant dense<0.000000e+00> : vector<128x128xf32>
    %2 = tpu.matmul %0, %1, %cst {dimension_numbers = #tpu.dot_dimension_numbers<[1], [0], [0], [1], [0, 0, 1, 1], [], []>} : vector<128x128xbf16>, vector<128x128xbf16>, vector<128x128xf32> -> vector<128x128xf32>
    %3 = arith.truncf %2 : vector<128x128xf32> to vector<128x128xbf16>
    %c0_3 = arith.constant 0 : index
    %c0_4 = arith.constant 0 : index
    %4 = vector.load %arg3[%c0_3, %c0_4] : memref<128x128xbf16, #tpu.memory_space<vmem>>, vector<128x128xbf16>
    tpu.vector_store %arg3[%c0_3, %c0_4], %3 {strides = array<i32>} : memref<128x128xbf16, #tpu.memory_space<vmem>>, vector<128x128xbf16>,
    %cst_5 = arith.constant 0.000000e+00 : f32
    %5 = vector.broadcast %cst_5 : f32 to vector<8x128xf32>
    %c0_6 = arith.constant 0 : index
    %c0_7 = arith.constant 0 : index
    %6 = vector.load %arg4[%c0_6, %c0_7] : memref<8x128xf32, #tpu.memory_space<vmem>>, vector<8x128xf32>
    tpu.vector_store %arg4[%c0_6, %c0_7], %5 {strides = array<i32>} : memref<8x128xf32, #tpu.memory_space<vmem>>, vector<8x128xf32>,
    %cst_8 = arith.constant dense<0.000000e+00> : vector<128xf32>
    %7 = vector.multi_reduction <add>, %2, %cst_8 [0] : vector<128x128xf32> to vector<128xf32>
    %8 = vector.shape_cast %7 : vector<128xf32> to vector<1x128xf32>
    %c0_9 = arith.constant 0 : index
    %c0_10 = arith.constant 0 : index
    %9 = vector.load %arg4[%c0_9, %c0_10] : memref<8x128xf32, #tpu.memory_space<vmem>>, vector<1x128xf32>
    tpu.vector_store %arg4[%c0_9, %c0_10], %8 {strides = array<i32>} : memref<8x128xf32, #tpu.memory_space<vmem>>, vector<1x128xf32>,
    %10 = arith.mulf %2, %2 : vector<128x128xf32>
    %cst_11 = arith.constant dense<0.000000e+00> : vector<128xf32>
    %11 = vector.multi_reduction <add>, %10, %cst_11 [0] : vector<128x128xf32> to vector<128xf32>
    %12 = vector.shape_cast %11 : vector<128xf32> to vector<1x128xf32>
    %c1 = arith.constant 1 : index
    %c0_12 = arith.constant 0 : index
    %13 = vector.load %arg4[%c1, %c0_12] : memref<8x128xf32, #tpu.memory_space<vmem>>, vector<1x128xf32>
    tpu.vector_store %arg4[%c1, %c0_12], %12 {strides = array<i32>} : memref<8x128xf32, #tpu.memory_space<vmem>>, vector<1x128xf32>,
    return
  }
  func.func @transform_0(%arg0: i32) -> (i32, i32) {
    %c0_i32 = arith.constant 0 : i32
    %c0_i32_0 = arith.constant 0 : i32
    return %arg0, %c0_i32 : i32, i32
  }
  func.func @transform_1(%arg0: i32) -> (i32, i32) {
    %c0_i32 = arith.constant 0 : i32
    %c0_i32_0 = arith.constant 0 : i32
    %c0_i32_1 = arith.constant 0 : i32
    return %c0_i32, %c0_i32_0 : i32, i32
  }
  func.func @transform_2(%arg0: i32) -> (i32, i32) {
    %c0_i32 = arith.constant 0 : i32
    %c0_i32_0 = arith.constant 0 : i32
    return %arg0, %c0_i32 : i32, i32
  }
  func.func @transform_3(%arg0: i32) -> (i32, i32) {
    %c0_i32 = arith.constant 0 : i32
    %c0_i32_0 = arith.constant 0 : i32
    return %arg0, %c0_i32 : i32, i32
  }
}

module attributes {stable_mosaic.version = 11 : i64} {
  func.func @_conv3x3_kernel(%arg0: i32, %arg1: memref<1x8x8x128xbf16, #tpu.memory_space<vmem>>, %arg2: memref<1x128xf32, #tpu.memory_space<vmem>>, %arg3: memref<1x128xf32, #tpu.memory_space<vmem>>, %arg4: memref<1x128xf32, #tpu.memory_space<vmem>>, %arg5: memref<1x128xf32, #tpu.memory_space<vmem>>, %arg6: memref<3x384x128xbf16, #tpu.memory_space<vmem>>, %arg7: memref<1x8x8x128xbf16, #tpu.memory_space<vmem>>, %arg8: memref<8x128xf32, #tpu.memory_space<vmem>>, %arg9: memref<10x10x128xbf16, #tpu.memory_space<vmem>>) attributes {dimension_semantics = [#tpu.dimension_semantics<parallel>], iteration_bounds = array<i64: 2>, scalar_prefetch = 0 : i64, scratch_operands = 1 : i64, tpu.core_type = #tpu.core_type<tc>, window_params = [{transform_indices = @transform_0, window_bounds = array<i64: 1, 8, 8, 128>}, {pipeline_mode = #tpu.pipeline_mode<synchronous>, transform_indices = @transform_1, window_bounds = array<i64: 1, 128>}, {pipeline_mode = #tpu.pipeline_mode<synchronous>, transform_indices = @transform_2, window_bounds = array<i64: 1, 128>}, {pipeline_mode = #tpu.pipeline_mode<synchronous>, transform_indices = @transform_3, window_bounds = array<i64: 1, 128>}, {pipeline_mode = #tpu.pipeline_mode<synchronous>, transform_indices = @transform_4, window_bounds = array<i64: 1, 128>}, {pipeline_mode = #tpu.pipeline_mode<synchronous>, transform_indices = @transform_5, window_bounds = array<i64: 3, 384, 128>}, {transform_indices = @transform_6, window_bounds = array<i64: 1, 8, 8, 128>}, {transform_indices = @transform_7, window_bounds = array<i64: 8, 128>}]} {
    %cst = arith.constant 0.000000e+00 : bf16
    %0 = vector.broadcast %cst : bf16 to vector<10x10x128xbf16>
    %c0 = arith.constant 0 : index
    %c0_0 = arith.constant 0 : index
    %c0_1 = arith.constant 0 : index
    %1 = vector.load %arg9[%c0, %c0_0, %c0_1] : memref<10x10x128xbf16, #tpu.memory_space<vmem>>, vector<10x10x128xbf16>
    tpu.vector_store %arg9[%c0, %c0_0, %c0_1], %0 {strides = array<i32>} : memref<10x10x128xbf16, #tpu.memory_space<vmem>>, vector<10x10x128xbf16>,
    %c0_2 = arith.constant 0 : index
    %c0_3 = arith.constant 0 : index
    %2 = vector.load %arg2[%c0_2, %c0_3] : memref<1x128xf32, #tpu.memory_space<vmem>>, vector<1x128xf32>
    %c0_4 = arith.constant 0 : index
    %c0_5 = arith.constant 0 : index
    %3 = vector.load %arg3[%c0_4, %c0_5] : memref<1x128xf32, #tpu.memory_space<vmem>>, vector<1x128xf32>
    %c0_6 = arith.constant 0 : index
    %c0_7 = arith.constant 0 : index
    %4 = vector.load %arg4[%c0_6, %c0_7] : memref<1x128xf32, #tpu.memory_space<vmem>>, vector<1x128xf32>
    %c0_8 = arith.constant 0 : index
    %c0_9 = arith.constant 0 : index
    %5 = vector.load %arg5[%c0_8, %c0_9] : memref<1x128xf32, #tpu.memory_space<vmem>>, vector<1x128xf32>
    %cst_10 = arith.constant 7.812500e-03 : f32
    %6 = vector.broadcast %cst_10 : f32 to vector<1x128xf32>
    %7 = arith.mulf %2, %6 : vector<1x128xf32>
    %cst_11 = arith.constant 7.812500e-03 : f32
    %8 = vector.broadcast %cst_11 : f32 to vector<1x128xf32>
    %9 = arith.mulf %3, %8 : vector<1x128xf32>
    %10 = arith.mulf %7, %7 : vector<1x128xf32>
    %11 = arith.subf %9, %10 : vector<1x128xf32>
    %cst_12 = arith.constant 0.000000e+00 : f32
    %12 = vector.broadcast %cst_12 : f32 to vector<1x128xf32>
    %13 = arith.maximumf %11, %12 : vector<1x128xf32>
    %cst_13 = arith.constant 9.99999974E-6 : f32
    %14 = vector.broadcast %cst_13 : f32 to vector<1x128xf32>
    %15 = arith.addf %13, %14 : vector<1x128xf32>
    %16 = math.rsqrt %15 : vector<1x128xf32>
    %17 = arith.mulf %4, %16 : vector<1x128xf32>
    %18 = arith.mulf %7, %17 : vector<1x128xf32>
    %19 = arith.subf %5, %18 : vector<1x128xf32>
    %c0_i32 = arith.constant 0 : i32
    %c8_i32 = arith.constant 8 : i32
    %20 = arith.muli %c0_i32, %c8_i32 : i32
    %c0_i32_14 = arith.constant 0 : i32
    %21 = arith.minsi %20, %c0_i32_14 : i32
    %c0_15 = arith.constant 0 : index
    %22 = arith.index_cast %21 : i32 to index
    %c0_16 = arith.constant 0 : index
    %c0_17 = arith.constant 0 : index
    %23 = vector.load %arg1[%c0_15, %22, %c0_16, %c0_17] : memref<1x8x8x128xbf16, #tpu.memory_space<vmem>>, vector<1x8x8x128xbf16>
    %24 = vector.shape_cast %23 : vector<1x8x8x128xbf16> to vector<8x8x128xbf16>
    %25 = arith.extf %24 : vector<8x8x128xbf16> to vector<8x8x128xf32>
    %26 = vector.shape_cast %25 : vector<8x8x128xf32> to vector<64x128xf32>
    %27 = vector.broadcast %17 : vector<1x128xf32> to vector<64x128xf32>
    %28 = arith.mulf %26, %27 : vector<64x128xf32>
    %29 = vector.broadcast %19 : vector<1x128xf32> to vector<64x128xf32>
    %30 = arith.addf %28, %29 : vector<64x128xf32>
    %cst_18 = arith.constant 0.000000e+00 : f32
    %31 = vector.broadcast %cst_18 : f32 to vector<64x128xf32>
    %32 = arith.maximumf %30, %31 : vector<64x128xf32>
    %33 = arith.truncf %32 : vector<64x128xf32> to vector<64x128xbf16>
    %34 = vector.shape_cast %33 : vector<64x128xbf16> to vector<8x8x128xbf16>
    %c1_i32 = arith.constant 1 : i32
    %35 = arith.addi %21, %c1_i32 : i32
    %36 = arith.index_cast %35 : i32 to index
    %c1 = arith.constant 1 : index
    %c0_19 = arith.constant 0 : index
    %37 = vector.load %arg9[%36, %c1, %c0_19] : memref<10x10x128xbf16, #tpu.memory_space<vmem>>, vector<8x8x128xbf16>
    tpu.vector_store %arg9[%36, %c1, %c0_19], %34 {strides = array<i32>} : memref<10x10x128xbf16, #tpu.memory_space<vmem>>, vector<8x8x128xbf16>,
    %c1_i32_20 = arith.constant 1 : i32
    %cst_21 = arith.constant 0.000000e+00 : f32
    %38 = vector.broadcast %cst_21 : f32 to vector<8x128xf32>
    %c0_22 = arith.constant 0 : index
    %c0_23 = arith.constant 0 : index
    %39 = vector.load %arg8[%c0_22, %c0_23] : memref<8x128xf32, #tpu.memory_space<vmem>>, vector<8x128xf32>
    tpu.vector_store %arg8[%c0_22, %c0_23], %38 {strides = array<i32>} : memref<8x128xf32, #tpu.memory_space<vmem>>, vector<8x128xf32>,
    %c0_i32_24 = arith.constant 0 : i32
    %c8_i32_25 = arith.constant 8 : i32
    %40 = arith.muli %c0_i32_24, %c8_i32_25 : i32
    %cst_26 = arith.constant 0.000000e+00 : f32
    %41 = vector.broadcast %cst_26 : f32 to vector<64x128xf32>
    %c0_i32_27 = arith.constant 0 : i32
    %42 = arith.addi %40, %c0_i32_27 : i32
    %43 = arith.index_cast %42 : i32 to index
    %c0_28 = arith.constant 0 : index
    %c0_29 = arith.constant 0 : index
    %44 = vector.load %arg9[%43, %c0_28, %c0_29] : memref<10x10x128xbf16, #tpu.memory_space<vmem>>, vector<8x10x128xbf16>
    %45 = vector.extract_strided_slice %44 {offsets = [0, 0, 0], sizes = [8, 8, 128], strides = [1, 1, 1]} : vector<8x10x128xbf16> to vector<8x8x128xbf16>
    %46 = vector.extract_strided_slice %44 {offsets = [0, 1, 0], sizes = [8, 8, 128], strides = [1, 1, 1]} : vector<8x10x128xbf16> to vector<8x8x128xbf16>
    %47 = vector.extract_strided_slice %44 {offsets = [0, 2, 0], sizes = [8, 8, 128], strides = [1, 1, 1]} : vector<8x10x128xbf16> to vector<8x8x128xbf16>
    %48 = tpu.concatenate %45, %46, %47 in 2 : vector<8x8x128xbf16>, vector<8x8x128xbf16>, vector<8x8x128xbf16> -> vector<8x8x384xbf16>
    %49 = vector.shape_cast %48 : vector<8x8x384xbf16> to vector<64x384xbf16>
    %c0_30 = arith.constant 0 : index
    %c0_31 = arith.constant 0 : index
    %c0_32 = arith.constant 0 : index
    %50 = vector.load %arg6[%c0_30, %c0_31, %c0_32] : memref<3x384x128xbf16, #tpu.memory_space<vmem>>, vector<1x384x128xbf16>
    %51 = vector.shape_cast %50 : vector<1x384x128xbf16> to vector<384x128xbf16>
    %cst_33 = arith.constant dense<0.000000e+00> : vector<64x128xf32>
    %52 = tpu.matmul %49, %51, %cst_33 {dimension_numbers = #tpu.dot_dimension_numbers<[1], [0], [0], [1], [0, 0, 1, 1], [], []>} : vector<64x384xbf16>, vector<384x128xbf16>, vector<64x128xf32> -> vector<64x128xf32>
    %53 = arith.addf %41, %52 : vector<64x128xf32>
    %c1_i32_34 = arith.constant 1 : i32
    %54 = arith.addi %40, %c1_i32_34 : i32
    %55 = arith.index_cast %54 : i32 to index
    %c0_35 = arith.constant 0 : index
    %c0_36 = arith.constant 0 : index
    %56 = vector.load %arg9[%55, %c0_35, %c0_36] : memref<10x10x128xbf16, #tpu.memory_space<vmem>>, vector<8x10x128xbf16>
    %57 = vector.extract_strided_slice %56 {offsets = [0, 0, 0], sizes = [8, 8, 128], strides = [1, 1, 1]} : vector<8x10x128xbf16> to vector<8x8x128xbf16>
    %58 = vector.extract_strided_slice %56 {offsets = [0, 1, 0], sizes = [8, 8, 128], strides = [1, 1, 1]} : vector<8x10x128xbf16> to vector<8x8x128xbf16>
    %59 = vector.extract_strided_slice %56 {offsets = [0, 2, 0], sizes = [8, 8, 128], strides = [1, 1, 1]} : vector<8x10x128xbf16> to vector<8x8x128xbf16>
    %60 = tpu.concatenate %57, %58, %59 in 2 : vector<8x8x128xbf16>, vector<8x8x128xbf16>, vector<8x8x128xbf16> -> vector<8x8x384xbf16>
    %61 = vector.shape_cast %60 : vector<8x8x384xbf16> to vector<64x384xbf16>
    %c1_37 = arith.constant 1 : index
    %c0_38 = arith.constant 0 : index
    %c0_39 = arith.constant 0 : index
    %62 = vector.load %arg6[%c1_37, %c0_38, %c0_39] : memref<3x384x128xbf16, #tpu.memory_space<vmem>>, vector<1x384x128xbf16>
    %63 = vector.shape_cast %62 : vector<1x384x128xbf16> to vector<384x128xbf16>
    %cst_40 = arith.constant dense<0.000000e+00> : vector<64x128xf32>
    %64 = tpu.matmul %61, %63, %cst_40 {dimension_numbers = #tpu.dot_dimension_numbers<[1], [0], [0], [1], [0, 0, 1, 1], [], []>} : vector<64x384xbf16>, vector<384x128xbf16>, vector<64x128xf32> -> vector<64x128xf32>
    %65 = arith.addf %53, %64 : vector<64x128xf32>
    %c2_i32 = arith.constant 2 : i32
    %66 = arith.addi %40, %c2_i32 : i32
    %67 = arith.index_cast %66 : i32 to index
    %c0_41 = arith.constant 0 : index
    %c0_42 = arith.constant 0 : index
    %68 = vector.load %arg9[%67, %c0_41, %c0_42] : memref<10x10x128xbf16, #tpu.memory_space<vmem>>, vector<8x10x128xbf16>
    %69 = vector.extract_strided_slice %68 {offsets = [0, 0, 0], sizes = [8, 8, 128], strides = [1, 1, 1]} : vector<8x10x128xbf16> to vector<8x8x128xbf16>
    %70 = vector.extract_strided_slice %68 {offsets = [0, 1, 0], sizes = [8, 8, 128], strides = [1, 1, 1]} : vector<8x10x128xbf16> to vector<8x8x128xbf16>
    %71 = vector.extract_strided_slice %68 {offsets = [0, 2, 0], sizes = [8, 8, 128], strides = [1, 1, 1]} : vector<8x10x128xbf16> to vector<8x8x128xbf16>
    %72 = tpu.concatenate %69, %70, %71 in 2 : vector<8x8x128xbf16>, vector<8x8x128xbf16>, vector<8x8x128xbf16> -> vector<8x8x384xbf16>
    %73 = vector.shape_cast %72 : vector<8x8x384xbf16> to vector<64x384xbf16>
    %c2 = arith.constant 2 : index
    %c0_43 = arith.constant 0 : index
    %c0_44 = arith.constant 0 : index
    %74 = vector.load %arg6[%c2, %c0_43, %c0_44] : memref<3x384x128xbf16, #tpu.memory_space<vmem>>, vector<1x384x128xbf16>
    %75 = vector.shape_cast %74 : vector<1x384x128xbf16> to vector<384x128xbf16>
    %cst_45 = arith.constant dense<0.000000e+00> : vector<64x128xf32>
    %76 = tpu.matmul %73, %75, %cst_45 {dimension_numbers = #tpu.dot_dimension_numbers<[1], [0], [0], [1], [0, 0, 1, 1], [], []>} : vector<64x384xbf16>, vector<384x128xbf16>, vector<64x128xf32> -> vector<64x128xf32>
    %77 = arith.addf %65, %76 : vector<64x128xf32>
    %78 = vector.shape_cast %77 : vector<64x128xf32> to vector<8x8x128xf32>
    %79 = arith.truncf %78 : vector<8x8x128xf32> to vector<8x8x128xbf16>
    %c0_46 = arith.constant 0 : index
    %80 = arith.index_cast %40 : i32 to index
    %c0_47 = arith.constant 0 : index
    %c0_48 = arith.constant 0 : index
    %81 = vector.load %arg7[%c0_46, %80, %c0_47, %c0_48] : memref<1x8x8x128xbf16, #tpu.memory_space<vmem>>, vector<1x8x8x128xbf16>
    %82 = vector.shape_cast %81 : vector<1x8x8x128xbf16> to vector<8x8x128xbf16>
    %83 = vector.shape_cast %79 : vector<8x8x128xbf16> to vector<1x8x8x128xbf16>
    tpu.vector_store %arg7[%c0_46, %80, %c0_47, %c0_48], %83 {strides = array<i32>} : memref<1x8x8x128xbf16, #tpu.memory_space<vmem>>, vector<1x8x8x128xbf16>,
    %84 = arith.mulf %77, %77 : vector<64x128xf32>
    %c0_49 = arith.constant 0 : index
    %c0_50 = arith.constant 0 : index
    %85 = vector.load %arg8[%c0_49, %c0_50] : memref<8x128xf32, #tpu.memory_space<vmem>>, vector<1x128xf32>
    %cst_51 = arith.constant dense<0.000000e+00> : vector<128xf32>
    %86 = vector.multi_reduction <add>, %77, %cst_51 [0] : vector<64x128xf32> to vector<128xf32>
    %87 = vector.shape_cast %86 : vector<128xf32> to vector<1x128xf32>
    %88 = arith.addf %85, %87 : vector<1x128xf32>
    %c0_52 = arith.constant 0 : index
    %c0_53 = arith.constant 0 : index
    %89 = vector.load %arg8[%c0_52, %c0_53] : memref<8x128xf32, #tpu.memory_space<vmem>>, vector<1x128xf32>
    tpu.vector_store %arg8[%c0_52, %c0_53], %88 {strides = array<i32>} : memref<8x128xf32, #tpu.memory_space<vmem>>, vector<1x128xf32>,
    %c1_54 = arith.constant 1 : index
    %c0_55 = arith.constant 0 : index
    %90 = vector.load %arg8[%c1_54, %c0_55] : memref<8x128xf32, #tpu.memory_space<vmem>>, vector<1x128xf32>
    %cst_56 = arith.constant dense<0.000000e+00> : vector<128xf32>
    %91 = vector.multi_reduction <add>, %84, %cst_56 [0] : vector<64x128xf32> to vector<128xf32>
    %92 = vector.shape_cast %91 : vector<128xf32> to vector<1x128xf32>
    %93 = arith.addf %90, %92 : vector<1x128xf32>
    %c1_57 = arith.constant 1 : index
    %c0_58 = arith.constant 0 : index
    %94 = vector.load %arg8[%c1_57, %c0_58] : memref<8x128xf32, #tpu.memory_space<vmem>>, vector<1x128xf32>
    tpu.vector_store %arg8[%c1_57, %c0_58], %93 {strides = array<i32>} : memref<8x128xf32, #tpu.memory_space<vmem>>, vector<1x128xf32>,
    %c1_i32_59 = arith.constant 1 : i32
    return
  }
  func.func @transform_0(%arg0: i32) -> (i32, i32, i32, i32) {
    %c0_i32 = arith.constant 0 : i32
    %c0_i32_0 = arith.constant 0 : i32
    %c0_i32_1 = arith.constant 0 : i32
    %c0_i32_2 = arith.constant 0 : i32
    return %arg0, %c0_i32, %c0_i32_0, %c0_i32_1 : i32, i32, i32, i32
  }
  func.func @transform_1(%arg0: i32) -> (i32, i32) {
    %c0_i32 = arith.constant 0 : i32
    %c0_i32_0 = arith.constant 0 : i32
    %c0_i32_1 = arith.constant 0 : i32
    return %c0_i32, %c0_i32_0 : i32, i32
  }
  func.func @transform_2(%arg0: i32) -> (i32, i32) {
    %c0_i32 = arith.constant 0 : i32
    %c0_i32_0 = arith.constant 0 : i32
    %c0_i32_1 = arith.constant 0 : i32
    return %c0_i32, %c0_i32_0 : i32, i32
  }
  func.func @transform_3(%arg0: i32) -> (i32, i32) {
    %c0_i32 = arith.constant 0 : i32
    %c0_i32_0 = arith.constant 0 : i32
    %c0_i32_1 = arith.constant 0 : i32
    return %c0_i32, %c0_i32_0 : i32, i32
  }
  func.func @transform_4(%arg0: i32) -> (i32, i32) {
    %c0_i32 = arith.constant 0 : i32
    %c0_i32_0 = arith.constant 0 : i32
    %c0_i32_1 = arith.constant 0 : i32
    return %c0_i32, %c0_i32_0 : i32, i32
  }
  func.func @transform_5(%arg0: i32) -> (i32, i32, i32) {
    %c0_i32 = arith.constant 0 : i32
    %c0_i32_0 = arith.constant 0 : i32
    %c0_i32_1 = arith.constant 0 : i32
    %c0_i32_2 = arith.constant 0 : i32
    return %c0_i32, %c0_i32_0, %c0_i32_1 : i32, i32, i32
  }
  func.func @transform_6(%arg0: i32) -> (i32, i32, i32, i32) {
    %c0_i32 = arith.constant 0 : i32
    %c0_i32_0 = arith.constant 0 : i32
    %c0_i32_1 = arith.constant 0 : i32
    %c0_i32_2 = arith.constant 0 : i32
    return %arg0, %c0_i32, %c0_i32_0, %c0_i32_1 : i32, i32, i32, i32
  }
  func.func @transform_7(%arg0: i32) -> (i32, i32) {
    %c0_i32 = arith.constant 0 : i32
    %c0_i32_0 = arith.constant 0 : i32
    return %arg0, %c0_i32 : i32, i32
  }
}

module attributes {stable_mosaic.version = 11 : i64} {
  func.func @_stats3_id_kernel(%arg0: i32, %arg1: memref<128x128xbf16, #tpu.memory_space<vmem>>, %arg2: memref<1x128xf32, #tpu.memory_space<vmem>>, %arg3: memref<1x128xf32, #tpu.memory_space<vmem>>, %arg4: memref<1x128xf32, #tpu.memory_space<vmem>>, %arg5: memref<1x128xf32, #tpu.memory_space<vmem>>, %arg6: memref<128x128xbf16, #tpu.memory_space<vmem>>, %arg7: memref<8x128xf32, #tpu.memory_space<vmem>>) attributes {dimension_semantics = [#tpu.dimension_semantics<parallel>], iteration_bounds = array<i64: 1>, scalar_prefetch = 0 : i64, scratch_operands = 0 : i64, tpu.core_type = #tpu.core_type<tc>, window_params = [{transform_indices = @transform_0, window_bounds = array<i64: 128, 128>}, {pipeline_mode = #tpu.pipeline_mode<synchronous>, transform_indices = @transform_1, window_bounds = array<i64: 1, 128>}, {pipeline_mode = #tpu.pipeline_mode<synchronous>, transform_indices = @transform_2, window_bounds = array<i64: 1, 128>}, {pipeline_mode = #tpu.pipeline_mode<synchronous>, transform_indices = @transform_3, window_bounds = array<i64: 1, 128>}, {pipeline_mode = #tpu.pipeline_mode<synchronous>, transform_indices = @transform_4, window_bounds = array<i64: 1, 128>}, {pipeline_mode = #tpu.pipeline_mode<synchronous>, transform_indices = @transform_5, window_bounds = array<i64: 128, 128>}, {transform_indices = @transform_6, window_bounds = array<i64: 8, 128>}]} {
    %c0 = arith.constant 0 : index
    %c0_0 = arith.constant 0 : index
    %0 = vector.load %arg2[%c0, %c0_0] : memref<1x128xf32, #tpu.memory_space<vmem>>, vector<1x128xf32>
    %c0_1 = arith.constant 0 : index
    %c0_2 = arith.constant 0 : index
    %1 = vector.load %arg3[%c0_1, %c0_2] : memref<1x128xf32, #tpu.memory_space<vmem>>, vector<1x128xf32>
    %c0_3 = arith.constant 0 : index
    %c0_4 = arith.constant 0 : index
    %2 = vector.load %arg4[%c0_3, %c0_4] : memref<1x128xf32, #tpu.memory_space<vmem>>, vector<1x128xf32>
    %c0_5 = arith.constant 0 : index
    %c0_6 = arith.constant 0 : index
    %3 = vector.load %arg5[%c0_5, %c0_6] : memref<1x128xf32, #tpu.memory_space<vmem>>, vector<1x128xf32>
    %cst = arith.constant 7.812500e-03 : f32
    %4 = vector.broadcast %cst : f32 to vector<1x128xf32>
    %5 = arith.mulf %0, %4 : vector<1x128xf32>
    %cst_7 = arith.constant 7.812500e-03 : f32
    %6 = vector.broadcast %cst_7 : f32 to vector<1x128xf32>
    %7 = arith.mulf %1, %6 : vector<1x128xf32>
    %8 = arith.mulf %5, %5 : vector<1x128xf32>
    %9 = arith.subf %7, %8 : vector<1x128xf32>
    %cst_8 = arith.constant 0.000000e+00 : f32
    %10 = vector.broadcast %cst_8 : f32 to vector<1x128xf32>
    %11 = arith.maximumf %9, %10 : vector<1x128xf32>
    %cst_9 = arith.constant 9.99999974E-6 : f32
    %12 = vector.broadcast %cst_9 : f32 to vector<1x128xf32>
    %13 = arith.addf %11, %12 : vector<1x128xf32>
    %14 = math.rsqrt %13 : vector<1x128xf32>
    %15 = arith.mulf %2, %14 : vector<1x128xf32>
    %16 = arith.mulf %5, %15 : vector<1x128xf32>
    %17 = arith.subf %3, %16 : vector<1x128xf32>
    %c0_10 = arith.constant 0 : index
    %c0_11 = arith.constant 0 : index
    %18 = vector.load %arg1[%c0_10, %c0_11] : memref<128x128xbf16, #tpu.memory_space<vmem>>, vector<128x128xbf16>
    %19 = arith.extf %18 : vector<128x128xbf16> to vector<128x128xf32>
    %20 = vector.broadcast %15 : vector<1x128xf32> to vector<128x128xf32>
    %21 = arith.mulf %19, %20 : vector<128x128xf32>
    %22 = vector.broadcast %17 : vector<1x128xf32> to vector<128x128xf32>
    %23 = arith.addf %21, %22 : vector<128x128xf32>
    %cst_12 = arith.constant 0.000000e+00 : f32
    %24 = vector.broadcast %cst_12 : f32 to vector<128x128xf32>
    %25 = arith.maximumf %23, %24 : vector<128x128xf32>
    %26 = arith.truncf %25 : vector<128x128xf32> to vector<128x128xbf16>
    %c0_13 = arith.constant 0 : index
    %c0_14 = arith.constant 0 : index
    %27 = vector.load %arg6[%c0_13, %c0_14] : memref<128x128xbf16, #tpu.memory_space<vmem>>, vector<128x128xbf16>
    %cst_15 = arith.constant dense<0.000000e+00> : vector<128x128xf32>
    %28 = tpu.matmul %26, %27, %cst_15 {dimension_numbers = #tpu.dot_dimension_numbers<[1], [0], [0], [1], [0, 0, 1, 1], [], []>} : vector<128x128xbf16>, vector<128x128xbf16>, vector<128x128xf32> -> vector<128x128xf32>
    %cst_16 = arith.constant 0.000000e+00 : f32
    %29 = vector.broadcast %cst_16 : f32 to vector<8x128xf32>
    %c0_17 = arith.constant 0 : index
    %c0_18 = arith.constant 0 : index
    %30 = vector.load %arg7[%c0_17, %c0_18] : memref<8x128xf32, #tpu.memory_space<vmem>>, vector<8x128xf32>
    tpu.vector_store %arg7[%c0_17, %c0_18], %29 {strides = array<i32>} : memref<8x128xf32, #tpu.memory_space<vmem>>, vector<8x128xf32>,
    %cst_19 = arith.constant dense<0.000000e+00> : vector<128xf32>
    %31 = vector.multi_reduction <add>, %28, %cst_19 [0] : vector<128x128xf32> to vector<128xf32>
    %32 = vector.shape_cast %31 : vector<128xf32> to vector<1x128xf32>
    %c0_20 = arith.constant 0 : index
    %c0_21 = arith.constant 0 : index
    %33 = vector.load %arg7[%c0_20, %c0_21] : memref<8x128xf32, #tpu.memory_space<vmem>>, vector<1x128xf32>
    tpu.vector_store %arg7[%c0_20, %c0_21], %32 {strides = array<i32>} : memref<8x128xf32, #tpu.memory_space<vmem>>, vector<1x128xf32>,
    %34 = arith.mulf %28, %28 : vector<128x128xf32>
    %cst_22 = arith.constant dense<0.000000e+00> : vector<128xf32>
    %35 = vector.multi_reduction <add>, %34, %cst_22 [0] : vector<128x128xf32> to vector<128xf32>
    %36 = vector.shape_cast %35 : vector<128xf32> to vector<1x128xf32>
    %c1 = arith.constant 1 : index
    %c0_23 = arith.constant 0 : index
    %37 = vector.load %arg7[%c1, %c0_23] : memref<8x128xf32, #tpu.memory_space<vmem>>, vector<1x128xf32>
    tpu.vector_store %arg7[%c1, %c0_23], %36 {strides = array<i32>} : memref<8x128xf32, #tpu.memory_space<vmem>>, vector<1x128xf32>,
    return
  }
  func.func @transform_0(%arg0: i32) -> (i32, i32) {
    %c0_i32 = arith.constant 0 : i32
    %c0_i32_0 = arith.constant 0 : i32
    return %arg0, %c0_i32 : i32, i32
  }
  func.func @transform_1(%arg0: i32) -> (i32, i32) {
    %c0_i32 = arith.constant 0 : i32
    %c0_i32_0 = arith.constant 0 : i32
    %c0_i32_1 = arith.constant 0 : i32
    return %c0_i32, %c0_i32_0 : i32, i32
  }
  func.func @transform_2(%arg0: i32) -> (i32, i32) {
    %c0_i32 = arith.constant 0 : i32
    %c0_i32_0 = arith.constant 0 : i32
    %c0_i32_1 = arith.constant 0 : i32
    return %c0_i32, %c0_i32_0 : i32, i32
  }
  func.func @transform_3(%arg0: i32) -> (i32, i32) {
    %c0_i32 = arith.constant 0 : i32
    %c0_i32_0 = arith.constant 0 : i32
    %c0_i32_1 = arith.constant 0 : i32
    return %c0_i32, %c0_i32_0 : i32, i32
  }
  func.func @transform_4(%arg0: i32) -> (i32, i32) {
    %c0_i32 = arith.constant 0 : i32
    %c0_i32_0 = arith.constant 0 : i32
    %c0_i32_1 = arith.constant 0 : i32
    return %c0_i32, %c0_i32_0 : i32, i32
  }
  func.func @transform_5(%arg0: i32) -> (i32, i32) {
    %c0_i32 = arith.constant 0 : i32
    %c0_i32_0 = arith.constant 0 : i32
    %c0_i32_1 = arith.constant 0 : i32
    return %c0_i32, %c0_i32_0 : i32, i32
  }
  func.func @transform_6(%arg0: i32) -> (i32, i32) {
    %c0_i32 = arith.constant 0 : i32
    %c0_i32_0 = arith.constant 0 : i32
    return %arg0, %c0_i32 : i32, i32
  }
}

module attributes {stable_mosaic.version = 11 : i64} {
  func.func @_final_id_kernel(%arg0: i32, %arg1: memref<128x128xbf16, #tpu.memory_space<vmem>>, %arg2: memref<1x128xf32, #tpu.memory_space<vmem>>, %arg3: memref<1x128xf32, #tpu.memory_space<vmem>>, %arg4: memref<1x128xf32, #tpu.memory_space<vmem>>, %arg5: memref<1x128xf32, #tpu.memory_space<vmem>>, %arg6: memref<128x128xbf16, #tpu.memory_space<vmem>>, %arg7: memref<1x128xf32, #tpu.memory_space<vmem>>, %arg8: memref<1x128xf32, #tpu.memory_space<vmem>>, %arg9: memref<1x128xf32, #tpu.memory_space<vmem>>, %arg10: memref<1x128xf32, #tpu.memory_space<vmem>>, %arg11: memref<128x128xbf16, #tpu.memory_space<vmem>>, %arg12: memref<128x128xbf16, #tpu.memory_space<vmem>>) attributes {dimension_semantics = [#tpu.dimension_semantics<parallel>], iteration_bounds = array<i64: 1>, scalar_prefetch = 0 : i64, scratch_operands = 0 : i64, tpu.core_type = #tpu.core_type<tc>, window_params = [{transform_indices = @transform_0, window_bounds = array<i64: 128, 128>}, {pipeline_mode = #tpu.pipeline_mode<synchronous>, transform_indices = @transform_1, window_bounds = array<i64: 1, 128>}, {pipeline_mode = #tpu.pipeline_mode<synchronous>, transform_indices = @transform_2, window_bounds = array<i64: 1, 128>}, {pipeline_mode = #tpu.pipeline_mode<synchronous>, transform_indices = @transform_3, window_bounds = array<i64: 1, 128>}, {pipeline_mode = #tpu.pipeline_mode<synchronous>, transform_indices = @transform_4, window_bounds = array<i64: 1, 128>}, {pipeline_mode = #tpu.pipeline_mode<synchronous>, transform_indices = @transform_5, window_bounds = array<i64: 128, 128>}, {pipeline_mode = #tpu.pipeline_mode<synchronous>, transform_indices = @transform_6, window_bounds = array<i64: 1, 128>}, {pipeline_mode = #tpu.pipeline_mode<synchronous>, transform_indices = @transform_7, window_bounds = array<i64: 1, 128>}, {pipeline_mode = #tpu.pipeline_mode<synchronous>, transform_indices = @transform_8, window_bounds = array<i64: 1, 128>}, {pipeline_mode = #tpu.pipeline_mode<synchronous>, transform_indices = @transform_9, window_bounds = array<i64: 1, 128>}, {transform_indices = @transform_10, window_bounds = array<i64: 128, 128>}, {transform_indices = @transform_11, window_bounds = array<i64: 128, 128>}]} {
    %c0 = arith.constant 0 : index
    %c0_0 = arith.constant 0 : index
    %0 = vector.load %arg2[%c0, %c0_0] : memref<1x128xf32, #tpu.memory_space<vmem>>, vector<1x128xf32>
    %c0_1 = arith.constant 0 : index
    %c0_2 = arith.constant 0 : index
    %1 = vector.load %arg3[%c0_1, %c0_2] : memref<1x128xf32, #tpu.memory_space<vmem>>, vector<1x128xf32>
    %c0_3 = arith.constant 0 : index
    %c0_4 = arith.constant 0 : index
    %2 = vector.load %arg4[%c0_3, %c0_4] : memref<1x128xf32, #tpu.memory_space<vmem>>, vector<1x128xf32>
    %c0_5 = arith.constant 0 : index
    %c0_6 = arith.constant 0 : index
    %3 = vector.load %arg5[%c0_5, %c0_6] : memref<1x128xf32, #tpu.memory_space<vmem>>, vector<1x128xf32>
    %cst = arith.constant 7.812500e-03 : f32
    %4 = vector.broadcast %cst : f32 to vector<1x128xf32>
    %5 = arith.mulf %0, %4 : vector<1x128xf32>
    %cst_7 = arith.constant 7.812500e-03 : f32
    %6 = vector.broadcast %cst_7 : f32 to vector<1x128xf32>
    %7 = arith.mulf %1, %6 : vector<1x128xf32>
    %8 = arith.mulf %5, %5 : vector<1x128xf32>
    %9 = arith.subf %7, %8 : vector<1x128xf32>
    %cst_8 = arith.constant 0.000000e+00 : f32
    %10 = vector.broadcast %cst_8 : f32 to vector<1x128xf32>
    %11 = arith.maximumf %9, %10 : vector<1x128xf32>
    %cst_9 = arith.constant 9.99999974E-6 : f32
    %12 = vector.broadcast %cst_9 : f32 to vector<1x128xf32>
    %13 = arith.addf %11, %12 : vector<1x128xf32>
    %14 = math.rsqrt %13 : vector<1x128xf32>
    %15 = arith.mulf %2, %14 : vector<1x128xf32>
    %16 = arith.mulf %5, %15 : vector<1x128xf32>
    %17 = arith.subf %3, %16 : vector<1x128xf32>
    %c0_10 = arith.constant 0 : index
    %c0_11 = arith.constant 0 : index
    %18 = vector.load %arg1[%c0_10, %c0_11] : memref<128x128xbf16, #tpu.memory_space<vmem>>, vector<128x128xbf16>
    %19 = arith.extf %18 : vector<128x128xbf16> to vector<128x128xf32>
    %20 = vector.broadcast %15 : vector<1x128xf32> to vector<128x128xf32>
    %21 = arith.mulf %19, %20 : vector<128x128xf32>
    %22 = vector.broadcast %17 : vector<1x128xf32> to vector<128x128xf32>
    %23 = arith.addf %21, %22 : vector<128x128xf32>
    %cst_12 = arith.constant 0.000000e+00 : f32
    %24 = vector.broadcast %cst_12 : f32 to vector<128x128xf32>
    %25 = arith.maximumf %23, %24 : vector<128x128xf32>
    %26 = arith.truncf %25 : vector<128x128xf32> to vector<128x128xbf16>
    %c0_13 = arith.constant 0 : index
    %c0_14 = arith.constant 0 : index
    %27 = vector.load %arg6[%c0_13, %c0_14] : memref<128x128xbf16, #tpu.memory_space<vmem>>, vector<128x128xbf16>
    %cst_15 = arith.constant dense<0.000000e+00> : vector<128x128xf32>
    %28 = tpu.matmul %26, %27, %cst_15 {dimension_numbers = #tpu.dot_dimension_numbers<[1], [0], [0], [1], [0, 0, 1, 1], [], []>} : vector<128x128xbf16>, vector<128x128xbf16>, vector<128x128xf32> -> vector<128x128xf32>
    %c0_16 = arith.constant 0 : index
    %c0_17 = arith.constant 0 : index
    %29 = vector.load %arg7[%c0_16, %c0_17] : memref<1x128xf32, #tpu.memory_space<vmem>>, vector<1x128xf32>
    %c0_18 = arith.constant 0 : index
    %c0_19 = arith.constant 0 : index
    %30 = vector.load %arg8[%c0_18, %c0_19] : memref<1x128xf32, #tpu.memory_space<vmem>>, vector<1x128xf32>
    %c0_20 = arith.constant 0 : index
    %c0_21 = arith.constant 0 : index
    %31 = vector.load %arg9[%c0_20, %c0_21] : memref<1x128xf32, #tpu.memory_space<vmem>>, vector<1x128xf32>
    %c0_22 = arith.constant 0 : index
    %c0_23 = arith.constant 0 : index
    %32 = vector.load %arg10[%c0_22, %c0_23] : memref<1x128xf32, #tpu.memory_space<vmem>>, vector<1x128xf32>
    %cst_24 = arith.constant 7.812500e-03 : f32
    %33 = vector.broadcast %cst_24 : f32 to vector<1x128xf32>
    %34 = arith.mulf %29, %33 : vector<1x128xf32>
    %cst_25 = arith.constant 7.812500e-03 : f32
    %35 = vector.broadcast %cst_25 : f32 to vector<1x128xf32>
    %36 = arith.mulf %30, %35 : vector<1x128xf32>
    %37 = arith.mulf %34, %34 : vector<1x128xf32>
    %38 = arith.subf %36, %37 : vector<1x128xf32>
    %cst_26 = arith.constant 0.000000e+00 : f32
    %39 = vector.broadcast %cst_26 : f32 to vector<1x128xf32>
    %40 = arith.maximumf %38, %39 : vector<1x128xf32>
    %cst_27 = arith.constant 9.99999974E-6 : f32
    %41 = vector.broadcast %cst_27 : f32 to vector<1x128xf32>
    %42 = arith.addf %40, %41 : vector<1x128xf32>
    %43 = math.rsqrt %42 : vector<1x128xf32>
    %44 = arith.mulf %31, %43 : vector<1x128xf32>
    %45 = arith.mulf %34, %44 : vector<1x128xf32>
    %46 = arith.subf %32, %45 : vector<1x128xf32>
    %47 = vector.broadcast %44 : vector<1x128xf32> to vector<128x128xf32>
    %48 = arith.mulf %28, %47 : vector<128x128xf32>
    %49 = vector.broadcast %46 : vector<1x128xf32> to vector<128x128xf32>
    %50 = arith.addf %48, %49 : vector<128x128xf32>
    %c0_28 = arith.constant 0 : index
    %c0_29 = arith.constant 0 : index
    %51 = vector.load %arg11[%c0_28, %c0_29] : memref<128x128xbf16, #tpu.memory_space<vmem>>, vector<128x128xbf16>
    %52 = arith.extf %51 : vector<128x128xbf16> to vector<128x128xf32>
    %53 = arith.addf %50, %52 : vector<128x128xf32>
    %cst_30 = arith.constant 0.000000e+00 : f32
    %54 = vector.broadcast %cst_30 : f32 to vector<128x128xf32>
    %55 = arith.maximumf %53, %54 : vector<128x128xf32>
    %56 = arith.truncf %55 : vector<128x128xf32> to vector<128x128xbf16>
    %c0_31 = arith.constant 0 : index
    %c0_32 = arith.constant 0 : index
    %57 = vector.load %arg12[%c0_31, %c0_32] : memref<128x128xbf16, #tpu.memory_space<vmem>>, vector<128x128xbf16>
    tpu.vector_store %arg12[%c0_31, %c0_32], %56 {strides = array<i32>} : memref<128x128xbf16, #tpu.memory_space<vmem>>, vector<128x128xbf16>,
    return
  }
  func.func @transform_0(%arg0: i32) -> (i32, i32) {
    %c0_i32 = arith.constant 0 : i32
    %c0_i32_0 = arith.constant 0 : i32
    return %arg0, %c0_i32 : i32, i32
  }
  func.func @transform_1(%arg0: i32) -> (i32, i32) {
    %c0_i32 = arith.constant 0 : i32
    %c0_i32_0 = arith.constant 0 : i32
    %c0_i32_1 = arith.constant 0 : i32
    return %c0_i32, %c0_i32_0 : i32, i32
  }
  func.func @transform_2(%arg0: i32) -> (i32, i32) {
    %c0_i32 = arith.constant 0 : i32
    %c0_i32_0 = arith.constant 0 : i32
    %c0_i32_1 = arith.constant 0 : i32
    return %c0_i32, %c0_i32_0 : i32, i32
  }
  func.func @transform_3(%arg0: i32) -> (i32, i32) {
    %c0_i32 = arith.constant 0 : i32
    %c0_i32_0 = arith.constant 0 : i32
    %c0_i32_1 = arith.constant 0 : i32
    return %c0_i32, %c0_i32_0 : i32, i32
  }
  func.func @transform_4(%arg0: i32) -> (i32, i32) {
    %c0_i32 = arith.constant 0 : i32
    %c0_i32_0 = arith.constant 0 : i32
    %c0_i32_1 = arith.constant 0 : i32
    return %c0_i32, %c0_i32_0 : i32, i32
  }
  func.func @transform_5(%arg0: i32) -> (i32, i32) {
    %c0_i32 = arith.constant 0 : i32
    %c0_i32_0 = arith.constant 0 : i32
    %c0_i32_1 = arith.constant 0 : i32
    return %c0_i32, %c0_i32_0 : i32, i32
  }
  func.func @transform_6(%arg0: i32) -> (i32, i32) {
    %c0_i32 = arith.constant 0 : i32
    %c0_i32_0 = arith.constant 0 : i32
    %c0_i32_1 = arith.constant 0 : i32
    return %c0_i32, %c0_i32_0 : i32, i32
  }
  func.func @transform_7(%arg0: i32) -> (i32, i32) {
    %c0_i32 = arith.constant 0 : i32
    %c0_i32_0 = arith.constant 0 : i32
    %c0_i32_1 = arith.constant 0 : i32
    return %c0_i32, %c0_i32_0 : i32, i32
  }
  func.func @transform_8(%arg0: i32) -> (i32, i32) {
    %c0_i32 = arith.constant 0 : i32
    %c0_i32_0 = arith.constant 0 : i32
    %c0_i32_1 = arith.constant 0 : i32
    return %c0_i32, %c0_i32_0 : i32, i32
  }
  func.func @transform_9(%arg0: i32) -> (i32, i32) {
    %c0_i32 = arith.constant 0 : i32
    %c0_i32_0 = arith.constant 0 : i32
    %c0_i32_1 = arith.constant 0 : i32
    return %c0_i32, %c0_i32_0 : i32, i32
  }
  func.func @transform_10(%arg0: i32) -> (i32, i32) {
    %c0_i32 = arith.constant 0 : i32
    %c0_i32_0 = arith.constant 0 : i32
    return %arg0, %c0_i32 : i32, i32
  }
  func.func @transform_11(%arg0: i32) -> (i32, i32) {
    %c0_i32 = arith.constant 0 : i32
    %c0_i32_0 = arith.constant 0 : i32
    return %arg0, %c0_i32 : i32, i32
  }
}

</mosaic_0001>

<bundles_post_ra>
// kernel: a_call__.4
= control target key start
LH: loop header
LB: loop body
LE: loop exit
PB: predicated region body
PF: predicated region fallthrough
CT: control target
= control target key end

     0   :  { %v564_v16 = vmov 0.0   ;;  %s666_s1 = inlined_call_operand.vmem [shape: bf16[128,128], index: 1, kind: input, shape index: {}]   ;;  %s667_s0 = inlined_call_operand.vmem [shape: bf16[128,128], index: 0, kind: input, shape index: {}]   ;;  %s668_s3 = inlined_call_operand.vmem [shape: f32[8,128], index: 3, kind: output, shape index: {1}]   ;;  %s669_s2 = inlined_call_operand.vmem [shape: bf16[128,128], index: 2, kind: output, shape index: {0}]  }
   0x1   :  { %v548_v0 = vld [vmem:[%s666_s1] sm:$0xff]   ;;  %v549_v1 = vld [vmem:[%s666_s1 + $0x8] sm:$0xff]   ;;  %v550_v2 = vld [vmem:[%s666_s1 + $0x10] sm:$0xff]   ;;  %319 = vst [vmem:[%s668_s3] sm:$0xff] %v564_v16 }
   0x2   :  { %499 = vmatprep.subr.bf16.mxu0 %v548_v0  ;;  %531 = vmatprep.subr.bf16.mxu1 %v548_v0  ;;  %v551_v3 = vld [vmem:[%s666_s1 + $0x18] sm:$0xff]   ;;  %v556_v4 = vld [vmem:[%s667_s0] sm:$0xff]   ;;  %v553_v7 = vld [vmem:[%s666_s1 + $0x28] sm:$0xff]  }
   0x3   :  { %500 = vmatpush3.bf16.msra.mxu0 %v548_v0  ;;  %539 = vmatpush3.bf16.msra.mxu1 %v548_v0  ;;  %v552_v5 = vld [vmem:[%s666_s1 + $0x20] sm:$0xff]   ;;  %v554_v8 = vld [vmem:[%s666_s1 + $0x30] sm:$0xff]   ;;  %v555_v9 = vld [vmem:[%s666_s1 + $0x38] sm:$0xff]  }
   0x4   :  { %501 = vmatprep.subr.bf16.mxu0 %v549_v1  ;;  %532 = vmatprep.subr.bf16.mxu1 %v549_v1  ;;  %v560_v6 = vld [vmem:[%s667_s0 + $0x20] sm:$0xff]   ;;  %v557_v10 = vld [vmem:[%s667_s0 + $0x8] sm:$0xff]   ;;  %v558_v12 = vld [vmem:[%s667_s0 + $0x10] sm:$0xff]  }
   0x5   :  { %515 = vmatprep.mubr.bf16.mxu0 %v556_v4  ;;  %523 = vmatprep.mubr.bf16.mxu1 %v560_v6  ;;  %v561_v11 = vld [vmem:[%s667_s0 + $0x28] sm:$0xff]   ;;  %v562_v13 = vld [vmem:[%s667_s0 + $0x30] sm:$0xff]   ;;  %v559_v14 = vld [vmem:[%s667_s0 + $0x18] sm:$0xff]  }
   0x6   :  { %v563_v15 = vld [vmem:[%s667_s0 + $0x38] sm:$0xff]  }
   0x7   :  { %502 = vmatpush3.bf16.msra.mxu0 %v549_v1  ;;  %540 = vmatpush3.bf16.msra.mxu1 %v549_v1 }
   0x8   :  { %503 = vmatprep.subr.bf16.mxu0 %v550_v2  ;;  %533 = vmatprep.subr.bf16.mxu1 %v550_v2 }
   0xb   :  { %504 = vmatpush3.bf16.msra.mxu0 %v550_v2  ;;  %541 = vmatpush3.bf16.msra.mxu1 %v550_v2 }
   0xc   :  { %505 = vmatprep.subr.bf16.mxu0 %v551_v3  ;;  %534 = vmatprep.subr.bf16.mxu1 %v551_v3 }
   0xf   :  { %506 = vmatpush3.bf16.msra.mxu0 %v551_v3  ;;  %542 = vmatpush3.bf16.msra.mxu1 %v551_v3 }
  0x10   :  { %507 = vmatprep.subr.bf16.mxu0 %v552_v5  ;;  %535 = vmatprep.subr.bf16.mxu1 %v552_v5 }
  0x13   :  { %508 = vmatpush3.bf16.msra.mxu0 %v552_v5  ;;  %543 = vmatpush3.bf16.msra.mxu1 %v552_v5 }
  0x14   :  { %509 = vmatprep.subr.bf16.mxu0 %v553_v7  ;;  %536 = vmatprep.subr.bf16.mxu1 %v553_v7 }
  0x17   :  { %510 = vmatpush3.bf16.msra.mxu0 %v553_v7  ;;  %544 = vmatpush3.bf16.msra.mxu1 %v553_v7 }
  0x18   :  { %511 = vmatprep.subr.bf16.mxu0 %v554_v8  ;;  %537 = vmatprep.subr.bf16.mxu1 %v554_v8 }
  0x1b   :  { %512 = vmatpush3.bf16.msra.mxu0 %v554_v8  ;;  %545 = vmatpush3.bf16.msra.mxu1 %v554_v8 }
  0x1c   :  { %513 = vmatprep.subr.bf16.mxu0 %v555_v9  ;;  %538 = vmatprep.subr.bf16.mxu1 %v555_v9 }
  0x1f   :  { %514 = vmatpush3.bf16.msra.mxu0 %v555_v9  ;;  %546 = vmatpush3.bf16.msra.mxu1 %v555_v9 }
  0x22   :  { %516 = vmatmul.mubr.bf16.vlgmr.msra.gmra.mrb[0].mxu0 %v557_v10  ;;  %524 = vmatmul.mubr.bf16.vlgmr.msra.gmra.mrb[0].mxu1 %v561_v11 }
  0x23   :  { %519 = vmatprep.mubr.bf16.mxu0 %v558_v12  ;;  %527 = vmatprep.mubr.bf16.mxu1 %v562_v13 }
  0x2a   :  { %520 = vmatmul.mubr.bf16.gmra.mrb[4].mxu0 %v559_v14  ;;  %528 = vmatmul.mubr.bf16.gmra.mrb[4].mxu1 %v563_v15 }
  0xf5   :  { %v517_v17 = vpop.f32.mrb[0].mxu0  ;;  %v525_v18 = vpop.f32.mrb[0].mxu1 }
  0xf6   :  { %v176_v19 = vpop.f32.mrb[1].mxu0  ;;  %v208_v20 = vpop.f32.mrb[1].mxu1  ;;  %v344_v32 = vmul.f32 %v517_v17, %v517_v17  ;;  %v352_v4 = vmul.f32 %v525_v18, %v525_v18 }
  0xf7   :  { %v518_v21 = vpop.f32.mrb[2].mxu0  ;;  %v526_v22 = vpop.f32.mrb[2].mxu1  ;;  %v342_v23 = vmul.f32 %v176_v19, %v176_v19  ;;  %v350_v62 = vmul.f32 %v208_v20, %v208_v20 }
  0xf8   :  { %v444_v24 = vpack.c.bf16 %v518_v21, %v517_v17  ;;  %v179_v25 = vpop.f32.mrb[3].mxu0  ;;  %v464_v26 = vpack.c.bf16 %v526_v22, %v525_v18  ;;  %v211_v27 = vpop.f32.mrb[3].mxu1  ;;  %v345_v35 = vmul.f32 %v518_v21, %v518_v21  ;;  %v353_v7 = vmul.f32 %v526_v22, %v526_v22 }
  0xf9   :  { %v439_v28 = vpack.c.bf16 %v179_v25, %v176_v19  ;;  %v320_v29 = vadd.f32 %v179_v25, %v176_v19  ;;  %v343_v30 = vmul.f32 %v179_v25, %v179_v25  ;;  %v459_v31 = vpack.c.bf16 %v211_v27, %v208_v20 }
  0xfa   :  { %476 = vst [vmem:[%s669_s2 + $0x8] sm:$0xff] %v444_v24   ;;  %480 = vst [vmem:[%s669_s2 + $0x28] sm:$0xff] %v464_v26   ;;  %v351_v3 = vmul.f32 %v211_v27, %v211_v27 }
  0xfb   :  { %440 = vst [vmem:[%s669_s2] sm:$0xff] %v439_v28   ;;  %v321_v33 = vadd.f32 %v517_v17, %v320_v29  ;;  %v358_v34 = vadd.f32 %v343_v30, %v342_v23  ;;  %479 = vst [vmem:[%s669_s2 + $0x20] sm:$0xff] %v459_v31  }
  0xfd   :  { %v359_v36 = vadd.f32 %v358_v34, %v344_v32  ;;  %v521_v37 = vpop.f32.mrb[4].mxu0  ;;  %v322_v38 = vadd.f32 %v518_v21, %v321_v33  ;;  %v529_v39 = vpop.f32.mrb[4].mxu1 }
  0xfe   :  { %v192_v40 = vpop.f32.mrb[5].mxu0  ;;  %v224_v41 = vpop.f32.mrb[5].mxu1  ;;  %v348_v56 = vmul.f32 %v521_v37, %v521_v37  ;;  %v356_v16 = vmul.f32 %v529_v39, %v529_v39 }
  0xff   :  { %v323_v42 = vadd.f32 %v322_v38, %v192_v40  ;;  %v346_v43 = vmul.f32 %v192_v40, %v192_v40  ;;  %v360_v44 = vadd.f32 %v359_v36, %v345_v35  ;;  %v522_v45 = vpop.f32.mrb[6].mxu0  ;;  %v530_v46 = vpop.f32.mrb[6].mxu1  ;;  %v354_v10 = vmul.f32 %v224_v41, %v224_v41 }
 0x100   :  { %v454_v47 = vpack.c.bf16 %v522_v45, %v521_v37  ;;  %v195_v48 = vpop.f32.mrb[7].mxu0  ;;  %v474_v49 = vpack.c.bf16 %v530_v46, %v529_v39  ;;  %v227_v50 = vpop.f32.mrb[7].mxu1  ;;  %v349_v59 = vmul.f32 %v522_v45, %v522_v45 }
 0x101   :  { %v361_v51 = vadd.f32 %v360_v44, %v346_v43  ;;  %v449_v52 = vpack.c.bf16 %v195_v48, %v192_v40  ;;  %v324_v53 = vadd.f32 %v323_v42, %v195_v48  ;;  %v347_v54 = vmul.f32 %v195_v48, %v195_v48 }
 0x102   :  { %478 = vst [vmem:[%s669_s2 + $0x18] sm:$0xff] %v454_v47   ;;  %482 = vst [vmem:[%s669_s2 + $0x38] sm:$0xff] %v474_v49   ;;  %v469_v55 = vpack.c.bf16 %v227_v50, %v224_v41  ;;  %v355_v15 = vmul.f32 %v227_v50, %v227_v50 }
 0x103   :  { %477 = vst [vmem:[%s669_s2 + $0x10] sm:$0xff] %v449_v52   ;;  %v325_v57 = vadd.f32 %v521_v37, %v324_v53  ;;  %v362_v58 = vadd.f32 %v361_v51, %v347_v54 }
 0x104   :  { %481 = vst [vmem:[%s669_s2 + $0x30] sm:$0xff] %v469_v55  }
 0x105   :  { %v363_v60 = vadd.f32 %v362_v58, %v348_v56  ;;  %v326_v61 = vadd.f32 %v522_v45, %v325_v57 }
 0x107   :  { %v327_v63 = vadd.f32 %v326_v61, %v208_v20  ;;  %v364_v0 = vadd.f32 %v363_v60, %v349_v59  ;;  %v357_v20 = vmul.f32 %v530_v46, %v530_v46 }
 0x109   :  { %v365_v1 = vadd.f32 %v364_v0, %v350_v62  ;;  %v328_v2 = vadd.f32 %v327_v63, %v211_v27 }
 0x10b   :  { %v329_v5 = vadd.f32 %v525_v18, %v328_v2  ;;  %v366_v6 = vadd.f32 %v365_v1, %v351_v3 }
 0x10d   :  { %v367_v8 = vadd.f32 %v366_v6, %v352_v4  ;;  %v330_v9 = vadd.f32 %v526_v22, %v329_v5 }
 0x10f   :  { %v331_v11 = vadd.f32 %v330_v9, %v224_v41  ;;  %v368_v12 = vadd.f32 %v367_v8, %v353_v7 }
 0x111   :  { %v369_v13 = vadd.f32 %v368_v12, %v354_v10  ;;  %v332_v14 = vadd.f32 %v331_v11, %v227_v50 }
 0x113   :  { %v333_v17 = vadd.f32 %v529_v39, %v332_v14  ;;  %v370_v19 = vadd.f32 %v369_v13, %v355_v15 }
 0x115   :  { %v334_v21 = vadd.f32 %v530_v46, %v333_v17  ;;  %v371_v23 = vadd.f32 %v370_v19, %v356_v16 }
 0x117   :  { %v335_v24 = vrot.slane %v334_v21, 4  ;;  %v372_v25 = vadd.f32 %v371_v23, %v357_v20 }
 0x119   :  { %v336_v26 = vadd.f32 %v335_v24, %v334_v21  ;;  %v373_v18 = vrot.slane %v372_v25, 4 }
 0x11b   :  { %v337_v27 = vrot.slane %v336_v26, 2  ;;  %v374_v28 = vadd.f32 %v373_v18, %v372_v25 }
 0x11d   :  { %v338_v29 = vadd.f32 %v337_v27, %v336_v26  ;;  %v375_v22 = vrot.slane %v374_v28, 2 }
 0x11f   :  { %v339_v30 = vrot.slane %v338_v29, 1  ;;  %v376_v31 = vadd.f32 %v375_v22, %v374_v28 }
 0x121   :  { %v340_v32 = vadd.f32 %v339_v30, %v338_v29  ;;  %v377_v33 = vrot.slane %v376_v31, 1 }
 0x123   :  { %341 = vst [vmem:[%s668_s3] sm:$0x1] %v340_v32  ;;  %v378_v34 = vadd.f32 %v377_v33, %v376_v31 }
 0x125   :  { %379 = vst [vmem:[%s668_s3 + $0x1] sm:$0x1] %v378_v34 }

// kernel: a_call__.6
= control target key start
LH: loop header
LB: loop body
LE: loop exit
PB: predicated region body
PF: predicated region fallthrough
CT: control target
= control target key end

     0   :  { %v71_v15 = vlaneseq  ;;  %s595_s5 = inlined_call_operand.vmem [shape: bf16[128,128], index: 5, kind: input, shape index: {}]   ;;  %s596_s1 = inlined_call_operand.vmem [shape: f32[1,128], index: 1, kind: input, shape index: {}]   ;;  %s597_s2 = inlined_call_operand.vmem [shape: f32[1,128], index: 2, kind: input, shape index: {}]   ;;  %s598_s0 = inlined_call_operand.vmem [shape: bf16[128,128], index: 0, kind: input, shape index: {}]   ;;  %s599_s3 = inlined_call_operand.vmem [shape: f32[1,128], index: 3, kind: input, shape index: {}]   ;;  %s600_s4 = inlined_call_operand.vmem [shape: f32[1,128], index: 4, kind: input, shape index: {}]   ;;  %s601_s6 = inlined_call_operand.vmem [shape: f32[8,128], index: 6, kind: output, shape index: {}]  }
   0x1   :  { %v476_v0 = vld [vmem:[%s595_s5] sm:$0xff]   ;;  %v477_v1 = vld [vmem:[%s595_s5 + $0x8] sm:$0xff]   ;;  %v478_v2 = vld [vmem:[%s595_s5 + $0x10] sm:$0xff]  }
   0x2   :  { %427 = vmatprep.subr.bf16.mxu0 %v476_v0  ;;  %459 = vmatprep.subr.bf16.mxu1 %v476_v0  ;;  %v479_v3 = vld [vmem:[%s595_s5 + $0x18] sm:$0xff]   ;;  %v24_v4 = vld [vmem:[%s596_s1] sm:$0x1]  ;;  %v481_v12 = vld [vmem:[%s595_s5 + $0x28] sm:$0xff]   ;;  %v72_v17 = vshrl.u32 %v71_v15, 7 }
   0x3   :  { %428 = vmatpush3.bf16.msra.mxu0 %v476_v0  ;;  %467 = vmatpush3.bf16.msra.mxu1 %v476_v0  ;;  %v25_v5 = vld [vmem:[%s597_s2] sm:$0x1]  ;;  %v28_v6 = vmul.f32 0.0078125, %v24_v4  ;;  %v482_v14 = vld [vmem:[%s595_s5 + $0x30] sm:$0xff]   ;;  %v483_v16 = vld [vmem:[%s595_s5 + $0x38] sm:$0xff]  }
   0x4   :  { %429 = vmatprep.subr.bf16.mxu0 %v477_v1  ;;  %460 = vmatprep.subr.bf16.mxu1 %v477_v1  ;;  %v29_v7 = vmul.f32 0.0078125, %v25_v5  ;;  %v480_v9 = vld [vmem:[%s595_s5 + $0x20] sm:$0xff]   ;;  %v404_v20 = vld [vmem:[%s598_s0 + $0x8] sm:$0xff]   ;;  %v405_v21 = vld [vmem:[%s598_s0 + $0x10] sm:$0xff]   ;;  %v73_v22 = vsub.s32 0, %v72_v17 }
   0x5   :  { %v30_v8 = vmul.f32 %v28_v6, %v28_v6  ;;  %v373_v18 = vld [vmem:[%s598_s0] sm:$0xff]   ;;  %v406_v23 = vld [vmem:[%s598_s0 + $0x18] sm:$0xff]   ;;  %v408_v28 = vld [vmem:[%s598_s0 + $0x28] sm:$0xff]   ;;  %v378_v30 = vunpack.c.l.bf16 %v404_v20  ;;  %v379_v31 = vunpack.c.h.bf16 %v404_v20  ;;  %v382_v32 = vunpack.c.l.bf16 %v405_v21 }
   0x6   :  { %v26_v19 = vld [vmem:[%s599_s3] sm:$0x1]  ;;  %v374_v26 = vunpack.c.l.bf16 %v373_v18  ;;  %v375_v27 = vunpack.c.h.bf16 %v373_v18  ;;  %v409_v33 = vld [vmem:[%s598_s0 + $0x30] sm:$0xff]   ;;  %v579_v34 = vld [vmem:[%s598_s0 + $0x38] sm:$0xff]   ;;  %v383_v36 = vunpack.c.h.bf16 %v405_v21  ;;  %v386_v37 = vunpack.c.l.bf16 %v406_v23 }
   0x7   :  { %430 = vmatpush3.bf16.msra.mxu0 %v477_v1  ;;  %468 = vmatpush3.bf16.msra.mxu1 %v477_v1  ;;  %v31_v10 = vsub.f32 %v29_v7, %v30_v8  ;;  %v407_v24 = vld [vmem:[%s598_s0 + $0x20] sm:$0xff]   ;;  %v387_v38 = vunpack.c.h.bf16 %v406_v23  ;;  %v394_v43 = vunpack.c.l.bf16 %v408_v28  ;;  %v395_v44 = vunpack.c.h.bf16 %v408_v28 }
   0x8   :  { %431 = vmatprep.subr.bf16.mxu0 %v478_v2  ;;  %461 = vmatprep.subr.bf16.mxu1 %v478_v2  ;;  %v27_v35 = vld [vmem:[%s600_s4] sm:$0x1]  ;;  %v390_v39 = vunpack.c.l.bf16 %v407_v24  ;;  %v391_v42 = vunpack.c.h.bf16 %v407_v24  ;;  %v398_v45 = vunpack.c.l.bf16 %v409_v33  ;;  %v399_v46 = vunpack.c.h.bf16 %v409_v33 }
   0x9   :  { %v32_v11 = vmax.f32 %v31_v10, 0.0  ;;  %v402_v47 = vunpack.c.l.bf16 %v579_v34  ;;  %v403_v15 = vunpack.c.h.bf16 %v579_v34 }
   0xb   :  { %432 = vmatpush3.bf16.msra.mxu0 %v478_v2  ;;  %469 = vmatpush3.bf16.msra.mxu1 %v478_v2  ;;  %v33_v13 = vadd.f32 1e-05, %v32_v11 }
   0xc   :  { %433 = vmatprep.subr.bf16.mxu0 %v479_v3  ;;  %462 = vmatprep.subr.bf16.mxu1 %v479_v3 }
   0xd   :  { %484 = vrsqrt.f32 %v33_v13 }
   0xf   :  { %434 = vmatpush3.bf16.msra.mxu0 %v479_v3  ;;  %470 = vmatpush3.bf16.msra.mxu1 %v479_v3 }
  0x10   :  { %435 = vmatprep.subr.bf16.mxu0 %v480_v9  ;;  %463 = vmatprep.subr.bf16.mxu1 %v480_v9 }
  0x13   :  { %436 = vmatpush3.bf16.msra.mxu0 %v480_v9  ;;  %471 = vmatpush3.bf16.msra.mxu1 %v480_v9 }
  0x14   :  { %437 = vmatprep.subr.bf16.mxu0 %v481_v12  ;;  %464 = vmatprep.subr.bf16.mxu1 %v481_v12 }
  0x17   :  { %438 = vmatpush3.bf16.msra.mxu0 %v481_v12  ;;  %472 = vmatpush3.bf16.msra.mxu1 %v481_v12  ;;  %v485_v25 = vpop.eup %484 }
  0x18   :  { %439 = vmatprep.subr.bf16.mxu0 %v482_v14  ;;  %465 = vmatprep.subr.bf16.mxu1 %v482_v14  ;;  %v35_v29 = vmul.f32 %v485_v25, %v26_v19 }
  0x1a   :  { %v36_v40 = vmul.f32 %v35_v29, %v28_v6  ;;  %v74_v41 = vrot.slane %v35_v29, %v73_v22 }
  0x1b   :  { %440 = vmatpush3.bf16.msra.mxu0 %v482_v14  ;;  %473 = vmatpush3.bf16.msra.mxu1 %v482_v14 }
  0x1c   :  { %441 = vmatprep.subr.bf16.mxu0 %v483_v16  ;;  %466 = vmatprep.subr.bf16.mxu1 %v483_v16  ;;  %v37_v48 = vsub.f32 %v27_v35, %v36_v40  ;;  %v76_v49 = vmul.f32 %v374_v26, %v74_v41  ;;  %v77_v50 = vmul.f32 %v375_v27, %v74_v41 }
  0x1d   :  { %v78_v51 = vmul.f32 %v378_v30, %v74_v41  ;;  %v79_v52 = vmul.f32 %v379_v31, %v74_v41  ;;  %v80_v53 = vmul.f32 %v382_v32, %v74_v41  ;;  %v81_v54 = vmul.f32 %v383_v36, %v74_v41 }
  0x1e   :  { %v82_v55 = vmul.f32 %v386_v37, %v74_v41  ;;  %v96_v56 = vrot.slane %v37_v48, %v73_v22  ;;  %v83_v57 = vmul.f32 %v387_v38, %v74_v41  ;;  %v84_v58 = vmul.f32 %v390_v39, %v74_v41 }
  0x1f   :  { %442 = vmatpush3.bf16.msra.mxu0 %v483_v16  ;;  %474 = vmatpush3.bf16.msra.mxu1 %v483_v16  ;;  %v85_v59 = vmul.f32 %v391_v42, %v74_v41  ;;  %v86_v60 = vmul.f32 %v394_v43, %v74_v41  ;;  %v87_v61 = vmul.f32 %v395_v44, %v74_v41  ;;  %v486_v44 = vmov 0.0  }
  0x20   :  { %v88_v62 = vmul.f32 %v398_v45, %v74_v41  ;;  %v89_v63 = vmul.f32 %v399_v46, %v74_v41  ;;  %v98_v0 = vadd.f32 %v96_v56, %v76_v49  ;;  %v99_v1 = vadd.f32 %v96_v56, %v77_v50  ;;  %299 = vst [vmem:[%s601_s6] sm:$0xff] %v486_v44 }
  0x21   :  { %v100_v2 = vadd.f32 %v96_v56, %v78_v51  ;;  %v101_v3 = vadd.f32 %v96_v56, %v79_v52  ;;  %v102_v4 = vadd.f32 %v96_v56, %v80_v53  ;;  %v103_v5 = vadd.f32 %v96_v56, %v81_v54 }
  0x22   :  { %v104_v6 = vadd.f32 %v96_v56, %v82_v55  ;;  %v105_v7 = vadd.f32 %v96_v56, %v83_v57  ;;  %v114_v8 = vmax.f32 %v98_v0, 0.0  ;;  %v115_v9 = vmax.f32 %v99_v1, 0.0 }
  0x23   :  { %v116_v10 = vmax.f32 %v100_v2, 0.0  ;;  %v117_v11 = vmax.f32 %v101_v3, 0.0  ;;  %v118_v12 = vmax.f32 %v102_v4, 0.0  ;;  %v119_v13 = vmax.f32 %v103_v5, 0.0 }
  0x24   :  { %v120_v14 = vmax.f32 %v104_v6, 0.0  ;;  %v130_v16 = vpack.c.bf16 %v115_v9, %v114_v8  ;;  %v106_v18 = vadd.f32 %v96_v56, %v84_v58  ;;  %v107_v19 = vadd.f32 %v96_v56, %v85_v59 }
  0x25   :  { %v131_v17 = vpack.c.bf16 %v117_v11, %v116_v10  ;;  %v132_v20 = vpack.c.bf16 %v119_v13, %v118_v12  ;;  %v121_v21 = vmax.f32 %v105_v7, 0.0  ;;  %v108_v22 = vadd.f32 %v96_v56, %v86_v60 }
  0x26   :  { %v109_v23 = vadd.f32 %v96_v56, %v87_v61  ;;  %443 = vmatprep.mubr.bf16.mxu0 %v130_v16  ;;  %v122_v24 = vmax.f32 %v106_v18, 0.0  ;;  %v123_v25 = vmax.f32 %v107_v19, 0.0  ;;  %v110_v26 = vadd.f32 %v96_v56, %v88_v62 }
  0x27   :  { %v111_v27 = vadd.f32 %v96_v56, %v89_v63  ;;  %444 = vmatmul.mubr.bf16.vlgmr.msra.gmra.mrb[0].mxu0 %v131_v17  ;;  %v124_v28 = vmax.f32 %v108_v22, 0.0  ;;  %v90_v30 = vmul.f32 %v402_v47, %v74_v41  ;;  %v91_v31 = vmul.f32 %v403_v15, %v74_v41 }
  0x28   :  { %v125_v29 = vmax.f32 %v109_v23, 0.0  ;;  %447 = vmatprep.mubr.bf16.mxu0 %v132_v20  ;;  %v134_v32 = vpack.c.bf16 %v123_v25, %v122_v24  ;;  %v126_v33 = vmax.f32 %v110_v26, 0.0  ;;  %v133_v39 = vpack.c.bf16 %v121_v21, %v120_v14 }
  0x29   :  { %v127_v34 = vmax.f32 %v111_v27, 0.0  ;;  %v112_v36 = vadd.f32 %v96_v56, %v90_v30  ;;  %v113_v37 = vadd.f32 %v96_v56, %v91_v31 }
  0x2a   :  { %v135_v35 = vpack.c.bf16 %v125_v29, %v124_v28  ;;  %451 = vmatprep.mubr.bf16.mxu1 %v134_v32 }
  0x2b   :  { %v136_v38 = vpack.c.bf16 %v127_v34, %v126_v33  ;;  %v128_v40 = vmax.f32 %v112_v36, 0.0  ;;  %v129_v42 = vmax.f32 %v113_v37, 0.0 }
  0x2c   :  { %452 = vmatmul.mubr.bf16.vlgmr.msra.gmra.mrb[0].mxu1 %v135_v35 }
  0x2d   :  { %455 = vmatprep.mubr.bf16.mxu1 %v136_v38  ;;  %v137_v43 = vpack.c.bf16 %v129_v42, %v128_v40 }
  0x2f   :  { %448 = vmatmul.mubr.bf16.gmra.mrb[4].mxu0 %v133_v39 }
  0x34   :  { %456 = vmatmul.mubr.bf16.gmra.mrb[4].mxu1 %v137_v43 }
  0xfa   :  { %v445_v41 = vpop.f32.mrb[0].mxu0 }
  0xfb   :  { %v236_v45 = vpop.f32.mrb[1].mxu0  ;;  %v324_v53 = vmul.f32 %v445_v41, %v445_v41 }
  0xfc   :  { %v446_v46 = vpop.f32.mrb[2].mxu0  ;;  %v322_v48 = vmul.f32 %v236_v45, %v236_v45 }
  0xfd   :  { %v239_v47 = vpop.f32.mrb[3].mxu0  ;;  %v325_v58 = vmul.f32 %v446_v46, %v446_v46 }
  0xfe   :  { %v300_v49 = vadd.f32 %v239_v47, %v236_v45  ;;  %v323_v50 = vmul.f32 %v239_v47, %v239_v47 }
  0xff   :  { %v453_v51 = vpop.f32.mrb[0].mxu1 }
 0x100   :  { %v268_v52 = vpop.f32.mrb[1].mxu1  ;;  %v301_v54 = vadd.f32 %v445_v41, %v300_v49  ;;  %v338_v55 = vadd.f32 %v323_v50, %v322_v48  ;;  %v332_v23 = vmul.f32 %v453_v51, %v453_v51 }
 0x101   :  { %v454_v56 = vpop.f32.mrb[2].mxu1  ;;  %v330_v17 = vmul.f32 %v268_v52, %v268_v52 }
 0x102   :  { %v271_v57 = vpop.f32.mrb[3].mxu1  ;;  %v339_v59 = vadd.f32 %v338_v55, %v324_v53  ;;  %v449_v60 = vpop.f32.mrb[4].mxu0  ;;  %v302_v61 = vadd.f32 %v446_v46, %v301_v54  ;;  %v333_v26 = vmul.f32 %v454_v56, %v454_v56 }
 0x103   :  { %v252_v62 = vpop.f32.mrb[5].mxu0  ;;  %v328_v9 = vmul.f32 %v449_v60, %v449_v60  ;;  %v331_v22 = vmul.f32 %v271_v57, %v271_v57 }
 0x104   :  { %v303_v63 = vadd.f32 %v302_v61, %v252_v62  ;;  %v326_v0 = vmul.f32 %v252_v62, %v252_v62  ;;  %v340_v1 = vadd.f32 %v339_v59, %v325_v58  ;;  %v450_v2 = vpop.f32.mrb[6].mxu0 }
 0x105   :  { %v255_v3 = vpop.f32.mrb[7].mxu0  ;;  %v329_v14 = vmul.f32 %v450_v2, %v450_v2 }
 0x106   :  { %v341_v4 = vadd.f32 %v340_v1, %v326_v0  ;;  %v304_v5 = vadd.f32 %v303_v63, %v255_v3  ;;  %v327_v6 = vmul.f32 %v255_v3, %v255_v3 }
 0x107   :  { %v457_v7 = vpop.f32.mrb[4].mxu1 }
 0x108   :  { %v284_v8 = vpop.f32.mrb[5].mxu1  ;;  %v305_v10 = vadd.f32 %v449_v60, %v304_v5  ;;  %v342_v11 = vadd.f32 %v341_v4, %v327_v6  ;;  %v336_v35 = vmul.f32 %v457_v7, %v457_v7 }
 0x109   :  { %v458_v12 = vpop.f32.mrb[6].mxu1  ;;  %v334_v29 = vmul.f32 %v284_v8, %v284_v8 }
 0x10a   :  { %v287_v13 = vpop.f32.mrb[7].mxu1  ;;  %v343_v15 = vadd.f32 %v342_v11, %v328_v9  ;;  %v306_v16 = vadd.f32 %v450_v2, %v305_v10  ;;  %v337_v38 = vmul.f32 %v458_v12, %v458_v12 }
 0x10b   :  { %v335_v34 = vmul.f32 %v287_v13, %v287_v13 }
 0x10c   :  { %v307_v18 = vadd.f32 %v306_v16, %v268_v52  ;;  %v344_v19 = vadd.f32 %v343_v15, %v329_v14 }
 0x10e   :  { %v345_v20 = vadd.f32 %v344_v19, %v330_v17  ;;  %v308_v21 = vadd.f32 %v307_v18, %v271_v57 }
 0x110   :  { %v309_v24 = vadd.f32 %v453_v51, %v308_v21  ;;  %v346_v25 = vadd.f32 %v345_v20, %v331_v22 }
 0x112   :  { %v347_v27 = vadd.f32 %v346_v25, %v332_v23  ;;  %v310_v28 = vadd.f32 %v454_v56, %v309_v24 }
 0x114   :  { %v311_v30 = vadd.f32 %v310_v28, %v284_v8  ;;  %v348_v31 = vadd.f32 %v347_v27, %v333_v26 }
 0x116   :  { %v349_v32 = vadd.f32 %v348_v31, %v334_v29  ;;  %v312_v33 = vadd.f32 %v311_v30, %v287_v13 }
 0x118   :  { %v313_v36 = vadd.f32 %v457_v7, %v312_v33  ;;  %v350_v37 = vadd.f32 %v349_v32, %v335_v34 }
 0x11a   :  { %v314_v39 = vadd.f32 %v458_v12, %v313_v36  ;;  %v351_v40 = vadd.f32 %v350_v37, %v336_v35 }
 0x11c   :  { %v315_v42 = vrot.slane %v314_v39, 4  ;;  %v352_v43 = vadd.f32 %v351_v40, %v337_v38 }
 0x11e   :  { %v316_v44 = vadd.f32 %v315_v42, %v314_v39  ;;  %v353_v41 = vrot.slane %v352_v43, 4 }
 0x120   :  { %v317_v45 = vrot.slane %v316_v44, 2  ;;  %v354_v46 = vadd.f32 %v353_v41, %v352_v43 }
 0x122   :  { %v318_v47 = vadd.f32 %v317_v45, %v316_v44  ;;  %v355_v48 = vrot.slane %v354_v46, 2 }
 0x124   :  { %v319_v49 = vrot.slane %v318_v47, 1  ;;  %v356_v50 = vadd.f32 %v355_v48, %v354_v46 }
 0x126   :  { %v320_v51 = vadd.f32 %v319_v49, %v318_v47  ;;  %v357_v52 = vrot.slane %v356_v50, 1 }
 0x128   :  { %321 = vst [vmem:[%s601_s6] sm:$0x1] %v320_v51  ;;  %v358_v53 = vadd.f32 %v357_v52, %v356_v50 }
 0x12a   :  { %359 = vst [vmem:[%s601_s6 + $0x1] sm:$0x1] %v358_v53 }

// kernel: a_call__.7
= control target key start
LH: loop header
LB: loop body
LE: loop exit
PB: predicated region body
PF: predicated region fallthrough
CT: control target
= control target key end

     0   :  { %v86_v15 = vlaneseq  ;;  %s1011_s5 = inlined_call_operand.vmem [shape: bf16[128,128], index: 5, kind: input, shape index: {}]   ;;  %s1012_s1 = inlined_call_operand.vmem [shape: f32[1,128], index: 1, kind: input, shape index: {}]   ;;  %s1013_s2 = inlined_call_operand.vmem [shape: f32[1,128], index: 2, kind: input, shape index: {}]   ;;  %s1014_s0 = inlined_call_operand.vmem [shape: bf16[128,128], index: 0, kind: input, shape index: {}]   ;;  %s1015_s3 = inlined_call_operand.vmem [shape: f32[1,128], index: 3, kind: input, shape index: {}]   ;;  %s1016_s4 = inlined_call_operand.vmem [shape: f32[1,128], index: 4, kind: input, shape index: {}]   ;;  %s1017_s6 = inlined_call_operand.vmem [shape: f32[1,128], index: 6, kind: input, shape index: {}]   ;;  %s1018_s7 = inlined_call_operand.vmem [shape: f32[1,128], index: 7, kind: input, shape index: {}]   ;;  %s1019_s8 = inlined_call_operand.vmem [shape: f32[1,128], index: 8, kind: input, shape index: {}]   ;;  %s1020_s9 = inlined_call_operand.vmem [shape: f32[1,128], index: 9, kind: input, shape index: {}]   ;;  %s1021_s10 = inlined_call_operand.vmem [shape: bf16[128,128], index: 10, kind: input, shape index: {}]   ;;  %s1022_s11 = inlined_call_operand.vmem [shape: bf16[128,128], index: 11, kind: output, shape index: {}]  }
   0x1   :  { %v749_v0 = vld [vmem:[%s1011_s5] sm:$0xff]   ;;  %v750_v1 = vld [vmem:[%s1011_s5 + $0x8] sm:$0xff]   ;;  %v751_v2 = vld [vmem:[%s1011_s5 + $0x10] sm:$0xff]  }
   0x2   :  { %701 = vmatprep.subr.bf16.mxu0 %v749_v0  ;;  %733 = vmatprep.subr.bf16.mxu1 %v749_v0  ;;  %v752_v3 = vld [vmem:[%s1011_s5 + $0x18] sm:$0xff]   ;;  %v39_v4 = vld [vmem:[%s1012_s1] sm:$0x1]  ;;  %v754_v12 = vld [vmem:[%s1011_s5 + $0x28] sm:$0xff]   ;;  %v87_v17 = vshrl.u32 %v86_v15, 7 }
   0x3   :  { %702 = vmatpush3.bf16.msra.mxu0 %v749_v0  ;;  %741 = vmatpush3.bf16.msra.mxu1 %v749_v0  ;;  %v40_v5 = vld [vmem:[%s1013_s2] sm:$0x1]  ;;  %v43_v6 = vmul.f32 0.0078125, %v39_v4  ;;  %v755_v14 = vld [vmem:[%s1011_s5 + $0x30] sm:$0xff]   ;;  %v756_v16 = vld [vmem:[%s1011_s5 + $0x38] sm:$0xff]  }
   0x4   :  { %703 = vmatprep.subr.bf16.mxu0 %v750_v1  ;;  %734 = vmatprep.subr.bf16.mxu1 %v750_v1  ;;  %v44_v7 = vmul.f32 0.0078125, %v40_v5  ;;  %v753_v9 = vld [vmem:[%s1011_s5 + $0x20] sm:$0xff]   ;;  %v664_v21 = vld [vmem:[%s1014_s0 + $0x8] sm:$0xff]   ;;  %v863_v22 = vsub.s32 0, %v87_v17  ;;  %v665_v24 = vld [vmem:[%s1014_s0 + $0x10] sm:$0xff]  }
   0x5   :  { %v45_v8 = vmul.f32 %v43_v6, %v43_v6  ;;  %v561_v18 = vld [vmem:[%s1014_s0] sm:$0xff]   ;;  %v668_v23 = vld [vmem:[%s1014_s0 + $0x28] sm:$0xff]   ;;  %v669_v29 = vld [vmem:[%s1014_s0 + $0x30] sm:$0xff]   ;;  %v566_v32 = vunpack.c.l.bf16 %v664_v21  ;;  %v567_v33 = vunpack.c.h.bf16 %v664_v21  ;;  %v570_v39 = vunpack.c.l.bf16 %v665_v24 }
   0x6   :  { %v667_v19 = vld [vmem:[%s1014_s0 + $0x20] sm:$0xff]   ;;  %v562_v26 = vunpack.c.l.bf16 %v561_v18  ;;  %v563_v27 = vunpack.c.h.bf16 %v561_v18  ;;  %v666_v34 = vld [vmem:[%s1014_s0 + $0x18] sm:$0xff]   ;;  %v582_v37 = vunpack.c.l.bf16 %v668_v23  ;;  %v583_v38 = vunpack.c.h.bf16 %v668_v23 }
   0x7   :  { %704 = vmatpush3.bf16.msra.mxu0 %v750_v1  ;;  %742 = vmatpush3.bf16.msra.mxu1 %v750_v1  ;;  %v46_v10 = vsub.f32 %v44_v7, %v45_v8  ;;  %v41_v20 = vld [vmem:[%s1015_s3] sm:$0x1]  ;;  %v578_v28 = vunpack.c.l.bf16 %v667_v19  ;;  %v579_v31 = vunpack.c.h.bf16 %v667_v19  ;;  %v880_v35 = vld [vmem:[%s1014_s0 + $0x38] sm:$0xff]   ;;  %v571_v40 = vunpack.c.h.bf16 %v665_v24 }
   0x8   :  { %705 = vmatprep.subr.bf16.mxu0 %v751_v2  ;;  %735 = vmatprep.subr.bf16.mxu1 %v751_v2  ;;  %v42_v36 = vld [vmem:[%s1016_s4] sm:$0x1]  ;;  %v586_v43 = vunpack.c.l.bf16 %v669_v29  ;;  %v587_v44 = vunpack.c.h.bf16 %v669_v29  ;;  %v574_v45 = vunpack.c.l.bf16 %v666_v34  ;;  %v575_v46 = vunpack.c.h.bf16 %v666_v34 }
   0x9   :  { %v47_v11 = vmax.f32 %v46_v10, 0.0  ;;  %v590_v47 = vunpack.c.l.bf16 %v880_v35  ;;  %v591_v48 = vunpack.c.h.bf16 %v880_v35 }
   0xb   :  { %706 = vmatpush3.bf16.msra.mxu0 %v751_v2  ;;  %743 = vmatpush3.bf16.msra.mxu1 %v751_v2  ;;  %v48_v13 = vadd.f32 1e-05, %v47_v11 }
   0xc   :  { %707 = vmatprep.subr.bf16.mxu0 %v752_v3  ;;  %736 = vmatprep.subr.bf16.mxu1 %v752_v3 }
   0xd   :  { %757 = vrsqrt.f32 %v48_v13 }
   0xf   :  { %708 = vmatpush3.bf16.msra.mxu0 %v752_v3  ;;  %744 = vmatpush3.bf16.msra.mxu1 %v752_v3 }
  0x10   :  { %709 = vmatprep.subr.bf16.mxu0 %v753_v9  ;;  %737 = vmatprep.subr.bf16.mxu1 %v753_v9 }
  0x13   :  { %710 = vmatpush3.bf16.msra.mxu0 %v753_v9  ;;  %745 = vmatpush3.bf16.msra.mxu1 %v753_v9 }
  0x14   :  { %711 = vmatprep.subr.bf16.mxu0 %v754_v12  ;;  %738 = vmatprep.subr.bf16.mxu1 %v754_v12 }
  0x17   :  { %712 = vmatpush3.bf16.msra.mxu0 %v754_v12  ;;  %746 = vmatpush3.bf16.msra.mxu1 %v754_v12  ;;  %v758_v25 = vpop.eup %757 }
  0x18   :  { %713 = vmatprep.subr.bf16.mxu0 %v755_v14  ;;  %739 = vmatprep.subr.bf16.mxu1 %v755_v14  ;;  %v50_v30 = vmul.f32 %v758_v25, %v41_v20 }
  0x1a   :  { %v51_v41 = vmul.f32 %v50_v30, %v43_v6  ;;  %v89_v42 = vrot.slane %v50_v30, %v863_v22 }
  0x1b   :  { %714 = vmatpush3.bf16.msra.mxu0 %v755_v14  ;;  %747 = vmatpush3.bf16.msra.mxu1 %v755_v14 }
  0x1c   :  { %715 = vmatprep.subr.bf16.mxu0 %v756_v16  ;;  %740 = vmatprep.subr.bf16.mxu1 %v756_v16  ;;  %v52_v49 = vsub.f32 %v42_v36, %v51_v41  ;;  %v91_v50 = vmul.f32 %v562_v26, %v89_v42  ;;  %v92_v51 = vmul.f32 %v563_v27, %v89_v42 }
  0x1d   :  { %v99_v52 = vmul.f32 %v578_v28, %v89_v42  ;;  %v100_v53 = vmul.f32 %v579_v31, %v89_v42  ;;  %v93_v54 = vmul.f32 %v566_v32, %v89_v42  ;;  %v94_v55 = vmul.f32 %v567_v33, %v89_v42 }
  0x1e   :  { %v101_v56 = vmul.f32 %v582_v37, %v89_v42  ;;  %v111_v57 = vrot.slane %v52_v49, %v863_v22  ;;  %v102_v58 = vmul.f32 %v583_v38, %v89_v42  ;;  %v95_v59 = vmul.f32 %v570_v39, %v89_v42 }
  0x1f   :  { %716 = vmatpush3.bf16.msra.mxu0 %v756_v16  ;;  %748 = vmatpush3.bf16.msra.mxu1 %v756_v16  ;;  %v96_v60 = vmul.f32 %v571_v40, %v89_v42  ;;  %v103_v61 = vmul.f32 %v586_v43, %v89_v42  ;;  %v104_v62 = vmul.f32 %v587_v44, %v89_v42 }
  0x20   :  { %v97_v63 = vmul.f32 %v574_v45, %v89_v42  ;;  %v98_v0 = vmul.f32 %v575_v46, %v89_v42  ;;  %v113_v1 = vadd.f32 %v111_v57, %v91_v50  ;;  %v114_v2 = vadd.f32 %v111_v57, %v92_v51  ;;  %v314_v45 = vld [vmem:[%s1017_s6] sm:$0x1] }
  0x21   :  { %v121_v3 = vadd.f32 %v111_v57, %v99_v52  ;;  %v122_v4 = vadd.f32 %v111_v57, %v100_v53  ;;  %v115_v5 = vadd.f32 %v111_v57, %v93_v54  ;;  %v116_v6 = vadd.f32 %v111_v57, %v94_v55  ;;  %v316_v53 = vld [vmem:[%s1019_s8] sm:$0x1] }
  0x22   :  { %v123_v7 = vadd.f32 %v111_v57, %v101_v56  ;;  %v124_v8 = vadd.f32 %v111_v57, %v102_v58  ;;  %v129_v9 = vmax.f32 %v113_v1, 0.0  ;;  %v130_v10 = vmax.f32 %v114_v2, 0.0  ;;  %v317_v56 = vld [vmem:[%s1020_s9] sm:$0x1]  ;;  %v671_v58 = vld [vmem:[%s1021_s10 + $0x8] sm:$0xff]   ;;  %v927_v1 = vld [vmem:[%s1021_s10 + $0x38] sm:$0xff]  }
  0x23   :  { %v137_v11 = vmax.f32 %v121_v3, 0.0  ;;  %v138_v12 = vmax.f32 %v122_v4, 0.0  ;;  %v131_v13 = vmax.f32 %v115_v5, 0.0  ;;  %v132_v14 = vmax.f32 %v116_v6, 0.0  ;;  %v932_v6 = vld [vmem:[%s1021_s10 + $0x10] sm:$0xff]  }
  0x24   :  { %v139_v15 = vmax.f32 %v123_v7, 0.0  ;;  %v140_v16 = vmax.f32 %v124_v8, 0.0  ;;  %v145_v17 = vpack.c.bf16 %v130_v10, %v129_v9  ;;  %v117_v19 = vadd.f32 %v111_v57, %v95_v59  ;;  %v675_v59 = vld [vmem:[%s1021_s10 + $0x28] sm:$0xff]  }
  0x25   :  { %v149_v18 = vpack.c.bf16 %v138_v12, %v137_v11  ;;  %v118_v20 = vadd.f32 %v111_v57, %v96_v60  ;;  %v146_v21 = vpack.c.bf16 %v132_v14, %v131_v13  ;;  %v125_v24 = vadd.f32 %v111_v57, %v103_v61  ;;  %v593_v60 = vld [vmem:[%s1021_s10] sm:$0xff]  }
  0x26   :  { %v150_v23 = vpack.c.bf16 %v140_v16, %v139_v15  ;;  %v126_v25 = vadd.f32 %v111_v57, %v104_v62  ;;  %717 = vmatprep.mubr.bf16.mxu0 %v145_v17  ;;  %v133_v26 = vmax.f32 %v117_v19, 0.0  ;;  %v119_v28 = vadd.f32 %v111_v57, %v97_v63  ;;  %v674_v61 = vld [vmem:[%s1021_s10 + $0x20] sm:$0xff]  }
  0x27   :  { %725 = vmatprep.mubr.bf16.mxu1 %v149_v18  ;;  %v134_v27 = vmax.f32 %v118_v20, 0.0  ;;  %v120_v29 = vadd.f32 %v111_v57, %v98_v0  ;;  %718 = vmatmul.mubr.bf16.vlgmr.msra.gmra.mrb[0].mxu0 %v146_v21  ;;  %v141_v30 = vmax.f32 %v125_v24, 0.0  ;;  %v105_v32 = vmul.f32 %v590_v47, %v89_v42  ;;  %v922_v0 = vld [vmem:[%s1021_s10 + $0x18] sm:$0xff]  }
  0x28   :  { %726 = vmatmul.mubr.bf16.vlgmr.msra.gmra.mrb[0].mxu1 %v150_v23  ;;  %v142_v31 = vmax.f32 %v126_v25, 0.0  ;;  %v106_v33 = vmul.f32 %v591_v48, %v89_v42  ;;  %v135_v35 = vmax.f32 %v119_v28, 0.0  ;;  %v318_v46 = vmul.f32 0.0078125, %v314_v45  ;;  %v315_v42 = vld [vmem:[%s1018_s7] sm:$0x1] }
  0x29   :  { %v147_v34 = vpack.c.bf16 %v134_v27, %v133_v26  ;;  %v136_v36 = vmax.f32 %v120_v29, 0.0  ;;  %v127_v38 = vadd.f32 %v111_v57, %v105_v32  ;;  %v319_v47 = vmul.f32 0.0078125, %v315_v42 }
  0x2a   :  { %v151_v37 = vpack.c.bf16 %v142_v31, %v141_v30  ;;  %v128_v39 = vadd.f32 %v111_v57, %v106_v33  ;;  %v320_v48 = vmul.f32 %v318_v46, %v318_v46  ;;  %v598_v2 = vunpack.c.l.bf16 %v671_v58 }
  0x2b   :  { %721 = vmatprep.mubr.bf16.mxu0 %v147_v34  ;;  %v148_v40 = vpack.c.bf16 %v136_v36, %v135_v35  ;;  %v143_v41 = vmax.f32 %v127_v38, 0.0  ;;  %v614_v3 = vunpack.c.l.bf16 %v675_v59  ;;  %v594_v4 = vunpack.c.l.bf16 %v593_v60 }
  0x2c   :  { %729 = vmatprep.mubr.bf16.mxu1 %v151_v37  ;;  %v144_v43 = vmax.f32 %v128_v39, 0.0  ;;  %v321_v49 = vsub.f32 %v319_v47, %v320_v48  ;;  %v610_v5 = vunpack.c.l.bf16 %v674_v61  ;;  %v599_v9 = vunpack.c.h.bf16 %v671_v58 }
  0x2d   :  { %v615_v10 = vunpack.c.h.bf16 %v675_v59  ;;  %v595_v11 = vunpack.c.h.bf16 %v593_v60  ;;  %v611_v12 = vunpack.c.h.bf16 %v674_v61  ;;  %v606_v17 = vunpack.c.l.bf16 %v922_v0 }
  0x2e   :  { %v152_v44 = vpack.c.bf16 %v144_v43, %v143_v41  ;;  %v322_v50 = vmax.f32 %v321_v49, 0.0  ;;  %v622_v18 = vunpack.c.l.bf16 %v927_v1  ;;  %v602_v24 = vunpack.c.l.bf16 %v932_v6 }
  0x2f   :  { %722 = vmatmul.mubr.bf16.gmra.mrb[4].mxu0 %v148_v40 }
  0x30   :  { %730 = vmatmul.mubr.bf16.gmra.mrb[4].mxu1 %v152_v44  ;;  %v323_v51 = vadd.f32 1e-05, %v322_v50 }
  0x32   :  { %759 = vrsqrt.f32 %v323_v51 }
  0x3c   :  { %v760_v52 = vpop.eup %759 }
  0x3d   :  { %v325_v54 = vmul.f32 %v760_v52, %v316_v53 }
  0x3f   :  { %v326_v55 = vmul.f32 %v325_v54, %v318_v46  ;;  %v914_v62 = vrot.slane %v325_v54, %v863_v22 }
  0x41   :  { %v327_v57 = vsub.f32 %v317_v56, %v326_v55 }
  0x43   :  { %v917_v63 = vrot.slane %v327_v57, %v863_v22  ;;  %v937_v22 = vld [vmem:[%s1021_s10 + $0x30] sm:$0xff]  }
  0x44   :  { %v618_v25 = vunpack.c.l.bf16 %v937_v22 }
  0xfa   :  { %v719_v7 = vpop.f32.mrb[0].mxu0 }
  0xfb   :  { %v727_v8 = vpop.f32.mrb[0].mxu1  ;;  %v336_v13 = vmul.f32 %v719_v7, %v914_v62  ;;  %v251_v15 = vpop.f32.mrb[1].mxu0 }
  0xfc   :  { %v344_v14 = vmul.f32 %v727_v8, %v914_v62  ;;  %v283_v16 = vpop.f32.mrb[1].mxu1  ;;  %v334_v19 = vmul.f32 %v914_v62, %v251_v15  ;;  %v720_v21 = vpop.f32.mrb[2].mxu0 }
  0xfd   :  { %v342_v20 = vmul.f32 %v914_v62, %v283_v16  ;;  %v728_v23 = vpop.f32.mrb[2].mxu1  ;;  %v358_v26 = vadd.f32 %v917_v63, %v336_v13  ;;  %v337_v28 = vmul.f32 %v720_v21, %v914_v62  ;;  %v254_v30 = vpop.f32.mrb[3].mxu0 }
  0xfe   :  { %v366_v27 = vadd.f32 %v917_v63, %v344_v14  ;;  %v345_v29 = vmul.f32 %v728_v23, %v914_v62  ;;  %v286_v31 = vpop.f32.mrb[3].mxu1  ;;  %v356_v32 = vadd.f32 %v917_v63, %v334_v19  ;;  %v335_v34 = vmul.f32 %v914_v62, %v254_v30 }
  0xff   :  { %v364_v33 = vadd.f32 %v917_v63, %v342_v20  ;;  %v343_v35 = vmul.f32 %v914_v62, %v286_v31  ;;  %v406_v36 = vadd.f32 %v598_v2, %v358_v26  ;;  %v359_v38 = vadd.f32 %v917_v63, %v337_v28 }
 0x100   :  { %v414_v37 = vadd.f32 %v614_v3, %v366_v27  ;;  %v367_v39 = vadd.f32 %v917_v63, %v345_v29  ;;  %v404_v40 = vadd.f32 %v594_v4, %v356_v32  ;;  %v357_v43 = vadd.f32 %v917_v63, %v335_v34 }
 0x101   :  { %v412_v41 = vadd.f32 %v610_v5, %v364_v33  ;;  %v365_v44 = vadd.f32 %v917_v63, %v343_v35  ;;  %v422_v45 = vmax.f32 %v406_v36, 0.0  ;;  %v407_v42 = vadd.f32 %v599_v9, %v359_v38 }
 0x102   :  { %v430_v46 = vmax.f32 %v414_v37, 0.0  ;;  %v415_v47 = vadd.f32 %v615_v10, %v367_v39  ;;  %v420_v48 = vmax.f32 %v404_v40, 0.0  ;;  %v405_v50 = vadd.f32 %v595_v11, %v357_v43  ;;  %v723_v52 = vpop.f32.mrb[4].mxu0 }
 0x103   :  { %v428_v49 = vmax.f32 %v412_v41, 0.0  ;;  %v413_v51 = vadd.f32 %v611_v12, %v365_v44  ;;  %v731_v53 = vpop.f32.mrb[4].mxu1  ;;  %v423_v54 = vmax.f32 %v407_v42, 0.0  ;;  %v340_v56 = vmul.f32 %v723_v52, %v914_v62  ;;  %v267_v58 = vpop.f32.mrb[5].mxu0 }
 0x104   :  { %v431_v55 = vmax.f32 %v415_v47, 0.0  ;;  %v348_v57 = vmul.f32 %v731_v53, %v914_v62  ;;  %v299_v59 = vpop.f32.mrb[5].mxu1  ;;  %v421_v60 = vmax.f32 %v405_v50, 0.0  ;;  %v338_v2 = vmul.f32 %v914_v62, %v267_v58  ;;  %v724_v4 = vpop.f32.mrb[6].mxu0 }
 0x105   :  { %v429_v61 = vmax.f32 %v413_v51, 0.0  ;;  %v346_v3 = vmul.f32 %v914_v62, %v299_v59  ;;  %v732_v5 = vpop.f32.mrb[6].mxu1  ;;  %v632_v7 = vpack.c.bf16 %v423_v54, %v422_v45  ;;  %v362_v9 = vadd.f32 %v917_v63, %v340_v56  ;;  %v270_v11 = vpop.f32.mrb[7].mxu0 }
 0x106   :  { %v652_v8 = vpack.c.bf16 %v431_v55, %v430_v46  ;;  %v370_v10 = vadd.f32 %v917_v63, %v348_v57  ;;  %v302_v12 = vpop.f32.mrb[7].mxu1  ;;  %v627_v13 = vpack.c.bf16 %v421_v60, %v420_v48  ;;  %v360_v15 = vadd.f32 %v917_v63, %v338_v2 }
 0x107   :  { %v647_v14 = vpack.c.bf16 %v429_v61, %v428_v49  ;;  %v368_v16 = vadd.f32 %v917_v63, %v346_v3  ;;  %678 = vst [vmem:[%s1022_s11 + $0x8] sm:$0xff] %v632_v7   ;;  %v341_v19 = vmul.f32 %v724_v4, %v914_v62  ;;  %v607_v20 = vunpack.c.h.bf16 %v922_v0 }
 0x108   :  { %682 = vst [vmem:[%s1022_s11 + $0x28] sm:$0xff] %v652_v8   ;;  %v349_v21 = vmul.f32 %v732_v5, %v914_v62  ;;  %v623_v23 = vunpack.c.h.bf16 %v927_v1  ;;  %628 = vst [vmem:[%s1022_s11] sm:$0xff] %v627_v13   ;;  %v339_v26 = vmul.f32 %v914_v62, %v270_v11  ;;  %v603_v27 = vunpack.c.h.bf16 %v932_v6 }
 0x109   :  { %681 = vst [vmem:[%s1022_s11 + $0x20] sm:$0xff] %v647_v14   ;;  %v347_v28 = vmul.f32 %v914_v62, %v302_v12  ;;  %v619_v29 = vunpack.c.h.bf16 %v937_v22  ;;  %v410_v30 = vadd.f32 %v606_v17, %v362_v9  ;;  %v418_v31 = vadd.f32 %v622_v18, %v370_v10 }
 0x10a   :  { %v363_v32 = vadd.f32 %v917_v63, %v341_v19  ;;  %v371_v33 = vadd.f32 %v917_v63, %v349_v21  ;;  %v408_v34 = vadd.f32 %v602_v24, %v360_v15  ;;  %v416_v35 = vadd.f32 %v618_v25, %v368_v16 }
 0x10b   :  { %v361_v62 = vadd.f32 %v917_v63, %v339_v26  ;;  %v369_v36 = vadd.f32 %v917_v63, %v347_v28  ;;  %v426_v1 = vmax.f32 %v410_v30, 0.0  ;;  %v434_v18 = vmax.f32 %v418_v31, 0.0 }
 0x10c   :  { %v411_v37 = vadd.f32 %v607_v20, %v363_v32  ;;  %v419_v0 = vadd.f32 %v623_v23, %v371_v33  ;;  %v424_v41 = vmax.f32 %v408_v34, 0.0  ;;  %v432_v43 = vmax.f32 %v416_v35, 0.0 }
 0x10d   :  { %v409_v17 = vadd.f32 %v603_v27, %v361_v62  ;;  %v417_v38 = vadd.f32 %v619_v29, %v369_v36 }
 0x10e   :  { %v427_v39 = vmax.f32 %v411_v37, 0.0  ;;  %v435_v40 = vmax.f32 %v419_v0, 0.0 }
 0x10f   :  { %v425_v44 = vmax.f32 %v409_v17, 0.0  ;;  %v433_v6 = vmax.f32 %v417_v38, 0.0 }
 0x110   :  { %v642_v24 = vpack.c.bf16 %v427_v39, %v426_v1  ;;  %v662_v45 = vpack.c.bf16 %v435_v40, %v434_v18 }
 0x111   :  { %v637_v22 = vpack.c.bf16 %v425_v44, %v424_v41  ;;  %v657_v25 = vpack.c.bf16 %v433_v6, %v432_v43 }
 0x112   :  { %680 = vst [vmem:[%s1022_s11 + $0x18] sm:$0xff] %v642_v24   ;;  %684 = vst [vmem:[%s1022_s11 + $0x38] sm:$0xff] %v662_v45  }
 0x113   :  { %679 = vst [vmem:[%s1022_s11 + $0x10] sm:$0xff] %v637_v22   ;;  %683 = vst [vmem:[%s1022_s11 + $0x30] sm:$0xff] %v657_v25  }

// kernel: a_call__.5
= control target key start
LH: loop header
LB: loop body
LE: loop exit
PB: predicated region body
PF: predicated region fallthrough
CT: control target
= control target key end

     0   :  { %13 = vsyncpa [#allocation4], 0  ;;  %s2855_s24 = smov 0   ;;  %s3158_s0 = inlined_call_operand.vmem [shape: bf16[2,8,8,128], index: 0, kind: input, shape index: {}]   ;;  %s3159_s1 = inlined_call_operand.vmem [shape: f32[1,128], index: 1, kind: input, shape index: {}]   ;;  %s3160_s2 = inlined_call_operand.vmem [shape: f32[1,128], index: 2, kind: input, shape index: {}]   ;;  %s3161_s3 = inlined_call_operand.vmem [shape: f32[1,128], index: 3, kind: input, shape index: {}]   ;;  %s3162_s4 = inlined_call_operand.vmem [shape: f32[1,128], index: 4, kind: input, shape index: {}]   ;;  %s3163_s5 = inlined_call_operand.hbm [shape: bf16[3,384,128], index: 5, kind: input, shape index: {}]   ;;  %s3164_s6 = inlined_call_operand.vmem [shape: bf16[2,8,8,128], index: 6, kind: output, shape index: {0}]   ;;  %s3165_s7 = inlined_call_operand.vmem [shape: f32[16,128], index: 7, kind: output, shape index: {1}]  }
   0x1 LB: > { %s2861_s25 = sadd.s32 4294967295, %s2808_s24   ;;  %p2165_p0 = scmp.ge.s32.totalorder %s2808_s24, 1  ;;  %s2808_s24 = sphi %s2855_s24, %s19_s24  }
   0x2   : > { %p207_p1 = scmp.lt.s32.totalorder %s2808_s24, 3  ;;  %s2810_s26 = smov [#allocation3]  }
   0x3   : > { %s231_s27 = sshll.u32 %s2810_s26, 4  ;;  %p3166_p3 = scmp.eq.s32.totalorder %s2861_s25, 0  ;;  %s232_s27 = int_to_ptr.vmem [resolvable:$true] %s231_s27 }
   0x4   : > { %p2865_p2 = pnand %p2165_p0, %p207_p1  ;;  %s2770_s9 = scalar_lea.hbm %s3163_s5, 9216 }
   0x5   : > { %p2771_p6 = scmp.ne.s32.totalorder %s3163_s5, %s2770_s9  ;;  %p2777_p10 = scmp.lt.u32.totalorder %s2770_s9, %s3163_s5 }
   0x6   : > { %s3168_s28 = scalar_select %p2865_p2, 1, 0 }
   0x7   : > { %p2641_p4 = pneg %p2865_p2 }
   0x9   : > { %p2874_p5 = pnand %p3166_p3, %p2641_p4 }
   0xb   : > { %p2772_p7 = pneg %p2874_p5 }
   0xd   : > { %p2773_p8 = pnand %p2772_p7, %p2771_p6 }
   0xf   : > { %p2774_p9 = pneg %p2773_p8 }
  0x11   : > { %p2779_p11 = pnand %p2777_p10, %p2774_p9 }
  0x13   : > { %2782 = shalt.err (!%p2779_p11)
}
  0x14   : > { %s2783_s14 = scalar_lea.vmem %s232_s27, 9216  ;;  %p2791_p1 = scmp.lt.s32.totalorder %s232_s27, %s232_s27 }
  0x15   : > { %p2784_p12 = scmp.ne.s32.totalorder %s232_s27, %s2783_s14  ;;  %p2792_p4 = scmp.lt.s32.totalorder %s2783_s14, %s2783_s14 }
  0x17   : > { %p2786_p13 = pnand %p2784_p12, %p2772_p7  ;;  %p2793_p3 = por %p2792_p4, %p2791_p1 }
  0x19   : > { %p2787_p0 = pneg %p2786_p13 }
  0x1b   : > { %p2794_p2 = pnand %p2793_p3, %p2787_p0 }
  0x1d   : > { %2797 = shalt.err (!%p2794_p2)
}
  0x1e   : > { %s2811_s15 = smov 64   ;;  %s2812_s16 = smov 4  }
  0x1f   : > { %2644 = dma.hbm_to_vmem [thread:$0]  (!%p2874_p5), %s3163_s5, 9216, %s232_s27, [#allocation4], %s2811_s15, %s2811_s15, %s2812_s16  }
  0x20   : > { %p3170_p6 = scmp.ne.s32.totalorder %s3168_s28, 0 }
  0x21   : > { %p3171_p8 = scmp.eq.s32.totalorder (!%p3170_p6), %s2861_s25, 0 }
  0x22   : > { %255 = sbr.rel (%p3170_p6) target bundleno = 444 (0x1bc), region = 44 }
  0x29   : > { %2803 = dma.done.wait (%p3171_p8), [#allocation4], 9216   ;;  %p3172_p7 = pmov %p3171_p8 }
  0x2a   : > { %v2813_v0 = vmov 0   ;;  %v2660_v1 = vld [vmem:[#allocation3 + $0x140] sm:$0xff]   ;;  %v2662_v3 = vld [vmem:[#allocation3 + $0x148] sm:$0xff]   ;;  %v2665_v6 = vld [vmem:[#allocation3 + $0x150] sm:$0xff]   ;;  %p291_p2 = scmp.lt.s32.totalorder %s2861_s25, 1  ;;  %v357_v35 = vlaneseq  ;;  %vm497_vm0 = vcmask 1043456  }
  0x2b   : > { %2805 = vsyncadd (%p3172_p7), [#allocation4], 4294958080  ;;  %308 = vst [vmem:[#allocation2 + $0x8] sm:$0xf] %v2813_v0  ;;  %v2661_v2 = vld [vmem:[#allocation3 + $0x100] sm:$0xff]   ;;  %2525 = vmatprep.subr.bf16.mxu1 %v2660_v1  ;;  %v2664_v5 = vld [vmem:[#allocation3 + $0x108] sm:$0xff]  }
  0x2c   : > { %309 = vst [vmem:[#allocation2 + $0xc] sm:$0x1] %v2813_v0  ;;  %310 = vst [vmem:[#allocation2 + $0x10] sm:$0xf] %v2813_v0  ;;  %2526 = vmatpush3.bf16.msra.mxu1 %v2660_v1  ;;  %2369 = vmatprep.subr.bf16.mxu0 %v2661_v2  ;;  %v2663_v4 = vld [vmem:[#allocation3 + $0xc0] sm:$0xff]   ;;  %v2666_v7 = vld [vmem:[#allocation3 + $0xc8] sm:$0xff]  }
  0x2d   : > { %311 = vst [vmem:[#allocation2 + $0x14] sm:$0x1] %v2813_v0  ;;  %306 = vst [vmem:[#allocation2] sm:$0xf] %v2813_v0  ;;  %2527 = vmatprep.subr.bf16.mxu1 %v2662_v3  ;;  %2370 = vmatpush3.bf16.msra.mxu0 %v2663_v4  ;;  %v2667_v8 = vld [vmem:[#allocation3 + $0x110] sm:$0xff]   ;;  %v2668_v9 = vld [vmem:[#allocation3 + $0x158] sm:$0xff]  }
  0x2e   : > { %307 = vst [vmem:[#allocation2 + $0x4] sm:$0x1] %v2813_v0  ;;  %312 = vst [vmem:[#allocation2 + $0x18] sm:$0xf] %v2813_v0  ;;  %2371 = vmatprep.subr.bf16.mxu0 %v2664_v5  ;;  %v2669_v10 = vld [vmem:[#allocation3 + $0xd0] sm:$0xff]   ;;  %v2670_v11 = vld [vmem:[#allocation3 + $0x118] sm:$0xff]  }
  0x2f   : > { %313 = vst [vmem:[#allocation2 + $0x1c] sm:$0x1] %v2813_v0  ;;  %314 = vst [vmem:[#allocation2 + $0x20] sm:$0xf] %v2813_v0  ;;  %v2671_v12 = vld [vmem:[#allocation3 + $0x160] sm:$0xff]   ;;  %v2672_v13 = vld [vmem:[#allocation3 + $0xd8] sm:$0xff]  }
  0x30   : > { %315 = vst [vmem:[#allocation2 + $0x24] sm:$0x1] %v2813_v0  ;;  %316 = vst [vmem:[#allocation2 + $0x28] sm:$0xf] %v2813_v0  ;;  %2528 = vmatpush3.bf16.msra.mxu1 %v2662_v3  ;;  %v2673_v14 = vld [vmem:[#allocation3 + $0x120] sm:$0xff]   ;;  %v2674_v15 = vld [vmem:[#allocation3 + $0x168] sm:$0xff]  }
  0x31   : > { %317 = vst [vmem:[#allocation2 + $0x2c] sm:$0x1] %v2813_v0  ;;  %318 = vst [vmem:[#allocation2 + $0x30] sm:$0xf] %v2813_v0  ;;  %2529 = vmatprep.subr.bf16.mxu1 %v2665_v6  ;;  %2372 = vmatpush3.bf16.msra.mxu0 %v2666_v7  ;;  %v2675_v16 = vld [vmem:[#allocation3 + $0xe0] sm:$0xff]   ;;  %v2676_v17 = vld [vmem:[#allocation3 + $0x128] sm:$0xff]  }
  0x32   : > { %319 = vst [vmem:[#allocation2 + $0x34] sm:$0x1] %v2813_v0  ;;  %320 = vst [vmem:[#allocation2 + $0x38] sm:$0xf] %v2813_v0  ;;  %2373 = vmatprep.subr.bf16.mxu0 %v2667_v8  ;;  %v2677_v18 = vld [vmem:[#allocation3 + $0x170] sm:$0xff]   ;;  %v2678_v19 = vld [vmem:[#allocation3 + $0xe8] sm:$0xff]  }
  0x33   : > { %321 = vst [vmem:[#allocation2 + $0x3c] sm:$0x1] %v2813_v0  ;;  %322 = vst [vmem:[#allocation2 + $0x40] sm:$0xf] %v2813_v0  ;;  %v2679_v20 = vld [vmem:[#allocation3 + $0x130] sm:$0xff]   ;;  %v2680_v23 = vld [vmem:[#allocation3 + $0x178] sm:$0xff]  }
  0x34   : > { %323 = vst [vmem:[#allocation2 + $0x44] sm:$0x1] %v2813_v0  ;;  %324 = vst [vmem:[#allocation2 + $0x48] sm:$0xf] %v2813_v0  ;;  %2530 = vmatpush3.bf16.msra.mxu1 %v2665_v6  ;;  %v326_v21 = vld [vmem:[%s3159_s1] sm:$0x1] }
  0x35   : > { %325 = vst [vmem:[#allocation2 + $0x4c] sm:$0x1] %v2813_v0  ;;  %2531 = vmatprep.subr.bf16.mxu1 %v2668_v9  ;;  %2374 = vmatpush3.bf16.msra.mxu0 %v2669_v10  ;;  %v327_v22 = vld [vmem:[%s3160_s2] sm:$0x1]  ;;  %v330_v24 = vmul.f32 0.0078125, %v326_v21  ;;  %v2682_v27 = vld [vmem:[#allocation3 + $0x138] sm:$0xff]  }
  0x36   : > { %2375 = vmatprep.subr.bf16.mxu0 %v2670_v11  ;;  %v331_v25 = vmul.f32 0.0078125, %v327_v22  ;;  %v2681_v26 = vld [vmem:[#allocation3 + $0xf0] sm:$0xff]   ;;  %v2907_v30 = vld [vmem:[#allocation3 + $0x80] sm:$0xff]   ;;  %v2686_v31 = vld [vmem:[#allocation3 + $0xf8] sm:$0xff]   ;;  %s3178_s25 = smov (!%p291_p2, %s2861_s25), 1  ;;  %v358_v36 = vshrl.u32 %v357_v35, 7 }
  0x37   : > { %v332_v28 = vmul.f32 %v330_v24, %v330_v24  ;;  %v2689_v33 = vld [vmem:[#allocation3 + $0x40] sm:$0xff]   ;;  %s2317_s23 = sshll.u32 %s3178_s25, 5  ;;  %v328_v37 = vld [vmem:[%s3161_s3] sm:$0x1]  ;;  %vm498_vm1 = vsmask.f32 7938 }
  0x38   : > { %2532 = vmatpush3.bf16.msra.mxu1 %v2668_v9  ;;  %s295_s28 = scalar_lea.vmem %s3158_s0, %s2317_s23  ;;  %v359_v40 = vsub.s32 0, %v358_v36  ;;  %v329_v47 = vld [vmem:[%s3162_s4] sm:$0x1]  ;;  %vm503_vm2 = vcmask 1040384   ;;  %vm504_vm3 = vsmask.f32 256  ;;  %vm2936_vm4 = vmand %vm497_vm0, %vm498_vm1  ;;  %s3143_s16 = scalar_lea.vmem %s3164_s6, %s2317_s23 }
  0x39   : > { %2533 = vmatprep.subr.bf16.mxu1 %v2671_v12  ;;  %2376 = vmatpush3.bf16.msra.mxu0 %v2672_v13  ;;  %v333_v29 = vsub.f32 %v331_v25, %v332_v28  ;;  %v2328_v38 = vld [vmem:[%s295_s28] sm:$0xff]   ;;  %v2363_v39 = vld [vmem:[%s295_s28 + $0x8] sm:$0xff]   ;;  %v2364_v41 = vld [vmem:[%s295_s28 + $0x10] sm:$0xff]   ;;  %s2174_s10 = sshll.u32 %s3178_s25, 3 }
  0x3a   : > { %2377 = vmatprep.subr.bf16.mxu0 %v2673_v14  ;;  %v2329_v44 = vunpack.c.l.bf16 %v2328_v38  ;;  %v2330_v45 = vunpack.c.h.bf16 %v2328_v38  ;;  %v2333_v46 = vunpack.c.l.bf16 %v2363_v39  ;;  %v2334_v48 = vunpack.c.h.bf16 %v2363_v39  ;;  %v2365_v53 = vld [vmem:[%s295_s28 + $0x18] sm:$0xff]   ;;  %vm2944_vm5 = vmand %vm503_vm2, %vm504_vm3  ;;  %s3131_s13 = scalar_lea.vmem %s3165_s7, %s2174_s10 }
  0x3b   : > { %v334_v32 = vmax.f32 %v333_v29, 0.0  ;;  %v2337_v49 = vunpack.c.l.bf16 %v2364_v41  ;;  %v2338_v50 = vunpack.c.h.bf16 %v2364_v41  ;;  %v2341_v61 = vunpack.c.l.bf16 %v2365_v53  ;;  %v500_v29 = vld [vmem:[#allocation2 + $0x8] sm:$0xf]  ;;  %v515_v41 = vld [vmem:[#allocation2 + $0x18] sm:$0xf] }
  0x3c   : > { %2534 = vmatpush3.bf16.msra.mxu1 %v2671_v12  ;;  %v2342_v63 = vunpack.c.h.bf16 %v2365_v53 }
  0x3d   : > { %2535 = vmatprep.subr.bf16.mxu1 %v2674_v15  ;;  %2378 = vmatpush3.bf16.msra.mxu0 %v2675_v16  ;;  %v335_v34 = vadd.f32 1e-05, %v334_v32  ;;  %v509_v32 = vld [vmem:[#allocation2 + $0x10] sm:$0xf] }
  0x3e   : > { %2379 = vmatprep.subr.bf16.mxu0 %v2676_v17 }
  0x3f   : > { %2768 = vrsqrt.f32 %v335_v34 }
  0x40   : > { %2536 = vmatpush3.bf16.msra.mxu1 %v2674_v15 }
  0x41   : > { %2537 = vmatprep.subr.bf16.mxu1 %v2677_v18  ;;  %2380 = vmatpush3.bf16.msra.mxu0 %v2678_v19 }
  0x42   : > { %2381 = vmatprep.subr.bf16.mxu0 %v2679_v20 }
  0x44   : > { %2538 = vmatpush3.bf16.msra.mxu1 %v2677_v18 }
  0x45   : > { %2539 = vmatprep.subr.bf16.mxu1 %v2680_v23  ;;  %2382 = vmatpush3.bf16.msra.mxu0 %v2681_v26 }
  0x46   : > { %2383 = vmatprep.subr.bf16.mxu0 %v2682_v27 }
  0x48   : > { %2540 = vmatpush3.bf16.msra.mxu1 %v2680_v23 }
  0x49   : > { %2549 = vmatprep.subr.bf16.mxu1 %v2907_v30  ;;  %2384 = vmatpush3.bf16.msra.mxu0 %v2686_v31  ;;  %v2769_v42 = vpop.eup %2768  ;;  %v506_v31 = vld [vmem:[#allocation2 + $0xc] sm:$0x1] }
  0x4a   : > { %2421 = vmatprep.subr.bf16.mxu0 %v2689_v33  ;;  %v337_v43 = vmul.f32 %v2769_v42, %v328_v37  ;;  %v512_v33 = vld [vmem:[#allocation2 + $0x14] sm:$0x1]  ;;  %v518_v42 = vld [vmem:[#allocation2 + $0x1c] sm:$0x1] }
  0x4c   : > { %v338_v51 = vmul.f32 %v337_v43, %v330_v24  ;;  %v360_v52 = vrot.slane %v337_v43, %v359_v40  ;;  %v521_v43 = vld [vmem:[#allocation2 + $0x20] sm:$0xf] }
  0x4e   : > { %v339_v54 = vsub.f32 %v329_v47, %v338_v51  ;;  %v362_v55 = vmul.f32 %v2329_v44, %v360_v52  ;;  %v363_v56 = vmul.f32 %v2330_v45, %v360_v52  ;;  %v364_v57 = vmul.f32 %v2333_v46, %v360_v52  ;;  %v524_v44 = vld [vmem:[#allocation2 + $0x24] sm:$0x1] }
  0x4f   : > { %v365_v58 = vmul.f32 %v2334_v48, %v360_v52  ;;  %v366_v59 = vmul.f32 %v2337_v49, %v360_v52  ;;  %v367_v60 = vmul.f32 %v2338_v50, %v360_v52  ;;  %v368_v0 = vmul.f32 %v2341_v61, %v360_v52 }
  0x50   : > { %v374_v62 = vrot.slane %v339_v54, %v359_v40  ;;  %v369_v7 = vmul.f32 %v2342_v63, %v360_v52 }
  0x52   : > { %v376_v1 = vadd.f32 %v374_v62, %v362_v55  ;;  %v377_v2 = vadd.f32 %v374_v62, %v363_v56  ;;  %v378_v3 = vadd.f32 %v374_v62, %v364_v57  ;;  %v379_v4 = vadd.f32 %v374_v62, %v365_v58 }
  0x53   : > { %v380_v5 = vadd.f32 %v374_v62, %v366_v59  ;;  %v381_v6 = vadd.f32 %v374_v62, %v367_v60  ;;  %v382_v8 = vadd.f32 %v374_v62, %v368_v0  ;;  %v2925_v15 = vadd.f32 %v374_v62, %v369_v7  ;;  %v536_v7 = vld [vmem:[#allocation2 + $0x34] sm:$0x1] }
  0x54   : > { %v384_v9 = vmax.f32 %v376_v1, 0.0  ;;  %v385_v10 = vmax.f32 %v377_v2, 0.0  ;;  %v386_v11 = vmax.f32 %v378_v3, 0.0  ;;  %v387_v12 = vmax.f32 %v379_v4, 0.0  ;;  %v527_v4 = vld [vmem:[#allocation2 + $0x28] sm:$0xf] }
  0x55   : > { %v388_v13 = vmax.f32 %v380_v5, 0.0  ;;  %v389_v14 = vmax.f32 %v381_v6, 0.0  ;;  %v390_v16 = vmax.f32 %v382_v8, 0.0  ;;  %v391_v23 = vmax.f32 %v2925_v15, 0.0  ;;  %v530_v5 = vld [vmem:[#allocation2 + $0x2c] sm:$0x1] }
  0x56   : > { %v2319_v17 = vpack.c.bf16 %v384_v9, %v384_v9  ;;  %v2320_v18 = vpack.c.bf16 %v385_v10, %v385_v10  ;;  %v2321_v19 = vpack.c.bf16 %v386_v11, %v386_v11  ;;  %v2322_v20 = vpack.c.bf16 %v387_v12, %v387_v12  ;;  %v533_v6 = vld [vmem:[#allocation2 + $0x30] sm:$0xf] }
  0x57   : > { %v2927_v21 = vpack.c.bf16 %v388_v13, %v388_v13  ;;  %v2929_v22 = vpack.c.bf16 %v389_v14, %v389_v14  ;;  %v2932_v24 = vpack.c.bf16 %v390_v16, %v390_v16  ;;  %v2326_v10 = vpack.c.bf16 %v391_v23, %v391_v23 }
  0x58   : > { %v417_v25 = vshrl.u32 %v2319_v17, 16  ;;  %v420_v26 = vshll.u32 %v2319_v17, 16  ;;  %v425_v27 = vshrl.u32 %v2320_v18, 16  ;;  %v428_v28 = vshll.u32 %v2320_v18, 16  ;;  %v539_v17 = vld [vmem:[#allocation2 + $0x38] sm:$0xf] }
  0x59   : > { %v433_v34 = vshrl.u32 %v2321_v19, 16  ;;  %v436_v35 = vshll.u32 %v2321_v19, 16  ;;  %v441_v36 = vshrl.u32 %v2322_v20, 16  ;;  %v444_v37 = vshll.u32 %v2322_v20, 16 }
  0x5a   : > { %v419_v38 = vrot.slane %v417_v25, 7  ;;  %v427_v39 = vrot.slane %v425_v27, 7  ;;  %v449_v45 = vshrl.u32 %v2927_v21, 16  ;;  %v452_v46 = vshll.u32 %v2927_v21, 16 }
  0x5b   : > { %v435_v48 = vrot.slane %v433_v34, 7  ;;  %v443_v49 = vrot.slane %v441_v36, 7  ;;  %v457_v50 = vshrl.u32 %v2929_v22, 16  ;;  %v460_v51 = vshll.u32 %v2929_v22, 16 }
  0x5c   : > { %v422_v52 = vor.u32 %v420_v26, %v419_v38  ;;  %v423_v53 = vrot.slane %v419_v38, 4  ;;  %v430_v54 = vor.u32 %v428_v28, %v427_v39  ;;  %v431_v55 = vrot.slane %v427_v39, 4  ;;  %v542_v28 = vld [vmem:[#allocation2 + $0x3c] sm:$0x1] }
  0x5d   : > { %v438_v56 = vor.u32 %v436_v35, %v435_v48  ;;  %v439_v57 = vrot.slane %v435_v48, 4  ;;  %v446_v58 = vor.u32 %v444_v37, %v443_v49  ;;  %v447_v59 = vrot.slane %v443_v49, 4 }
  0x5e   : > { %v501_v60 = vsel %vm2936_vm4, %v422_v52, %v500_v29  ;;  %v507_v61 = vsel %vm2944_vm5, %v423_v53, %v506_v31  ;;  %v510_v62 = vsel %vm2936_vm4, %v430_v54, %v509_v32  ;;  %v513_v63 = vsel %vm2944_vm5, %v431_v55, %v512_v33 }
  0x5f   : > { %502 = vst [vmem:[#allocation2 + $0x8] sm:$0xf] %v501_v60  ;;  %508 = vst [vmem:[#allocation2 + $0xc] sm:$0x1] %v507_v61  ;;  %v516_v0 = vsel %vm2936_vm4, %v438_v56, %v515_v41  ;;  %v519_v1 = vsel %vm2944_vm5, %v439_v57, %v518_v42  ;;  %v522_v2 = vsel %vm2936_vm4, %v446_v58, %v521_v43  ;;  %v451_v8 = vrot.slane %v449_v45, 7 }
  0x60   : > { %511 = vst [vmem:[#allocation2 + $0x10] sm:$0xf] %v510_v62  ;;  %514 = vst [vmem:[#allocation2 + $0x14] sm:$0x1] %v513_v63  ;;  %v525_v3 = vsel %vm2944_vm5, %v447_v59, %v524_v44  ;;  %v459_v9 = vrot.slane %v457_v50, 7  ;;  %v465_v11 = vshrl.u32 %v2932_v24, 16 }
  0x61   : > { %517 = vst [vmem:[#allocation2 + $0x18] sm:$0xf] %v516_v0  ;;  %520 = vst [vmem:[#allocation2 + $0x1c] sm:$0x1] %v519_v1  ;;  %v468_v12 = vshll.u32 %v2932_v24, 16  ;;  %v454_v13 = vor.u32 %v452_v46, %v451_v8  ;;  %v455_v14 = vrot.slane %v451_v8, 4 }
  0x62   : > { %523 = vst [vmem:[#allocation2 + $0x20] sm:$0xf] %v522_v2  ;;  %526 = vst [vmem:[#allocation2 + $0x24] sm:$0x1] %v525_v3  ;;  %v462_v15 = vor.u32 %v460_v51, %v459_v9  ;;  %v463_v16 = vrot.slane %v459_v9, 4  ;;  %v467_v18 = vrot.slane %v465_v11, 7 }
  0x63   : > { %v473_v19 = vshrl.u32 %v2326_v10, 16  ;;  %v476_v20 = vshll.u32 %v2326_v10, 16  ;;  %v528_v21 = vsel %vm2936_vm4, %v454_v13, %v527_v4  ;;  %v531_v22 = vsel %vm2944_vm5, %v455_v14, %v530_v5  ;;  %v2992_v51 = vld [vmem:[#allocation2] sm:$0xf]  ;;  %v553_v57 = vld [vmem:[#allocation2 + $0x4] sm:$0x1] }
  0x64   : > { %v534_v23 = vsel %vm2936_vm4, %v462_v15, %v533_v6  ;;  %v537_v24 = vsel %vm2944_vm5, %v463_v16, %v536_v7  ;;  %529 = vst [vmem:[#allocation2 + $0x28] sm:$0xf] %v528_v21  ;;  %532 = vst [vmem:[#allocation2 + $0x2c] sm:$0x1] %v531_v22  ;;  %v470_v25 = vor.u32 %v468_v12, %v467_v18  ;;  %v471_v26 = vrot.slane %v467_v18, 4  ;;  %v2690_v6 = vld [vmem:[#allocation3 + $0x88] sm:$0xff]  }
  0x65   : > { %535 = vst [vmem:[#allocation2 + $0x30] sm:$0xf] %v534_v23  ;;  %538 = vst [vmem:[#allocation2 + $0x34] sm:$0x1] %v537_v24  ;;  %v475_v27 = vrot.slane %v473_v19, 7  ;;  %v2999_v10 = vcombine.low %v2992_v51, %v553_v57  ;;  %v2692_v13 = vld [vmem:[#allocation3] sm:$0xff]  }
  0x66   : > { %v2976_v29 = vld [vmem:[#allocation2 + $0x8] sm:$0xf]  ;;  %v737_v31 = vld [vmem:[#allocation2 + $0xc] sm:$0x1]  ;;  %v540_v38 = vsel %vm2936_vm4, %v470_v25, %v539_v17  ;;  %v543_v45 = vsel %vm2944_vm5, %v471_v26, %v542_v28  ;;  %v545_v56 = vld [vmem:[#allocation2 + $0x40] sm:$0xf] }
  0x67   : > { %v2978_v32 = vld [vmem:[#allocation2 + $0x10] sm:$0xf]  ;;  %v739_v33 = vld [vmem:[#allocation2 + $0x14] sm:$0x1]  ;;  %v2191_v34 = vcombine.low %v2976_v29, %v737_v31  ;;  %v478_v37 = vor.u32 %v476_v20, %v475_v27  ;;  %v479_v44 = vrot.slane %v475_v27, 4  ;;  %v2693_v17 = vld [vmem:[#allocation3 + $0x48] sm:$0xff]  }
  0x68   : > { %v2981_v35 = vld [vmem:[#allocation2 + $0x18] sm:$0xf]  ;;  %v741_v36 = vld [vmem:[#allocation2 + $0x1c] sm:$0x1]  ;;  %v2192_v39 = vcombine.low %v2978_v32, %v739_v33  ;;  %541 = vst [vmem:[#allocation2 + $0x38] sm:$0xf] %v540_v38  ;;  %v2199_v12 = vcombine.low %v2976_v29, %v2978_v32 }
  0x69   : > { %v2986_v41 = vld [vmem:[#allocation2 + $0x20] sm:$0xf]  ;;  %v743_v42 = vld [vmem:[#allocation2 + $0x24] sm:$0x1]  ;;  %v2193_v43 = vcombine.low %v2981_v35, %v741_v36  ;;  %v848_v46 = vrot.slane %v2191_v34, 1  ;;  %v793_v49 = vshrl.u32 %v2191_v34, 16  ;;  %v546_v21 = vsel %vm2936_vm4, %v478_v37, %v545_v56 }
  0x6a   : > { %v2194_v48 = vcombine.low %v2986_v41, %v743_v42  ;;  %v795_v50 = vshll.u32 %v2191_v34, 16  ;;  %544 = vst [vmem:[#allocation2 + $0x3c] sm:$0x1] %v543_v45  ;;  %v849_v52 = vrot.slane %v2192_v39, 1  ;;  %v800_v54 = vshrl.u32 %v2192_v39, 16  ;;  %v2694_v18 = vld [vmem:[#allocation3 + $0x90] sm:$0xff]  }
  0x6b   : > { %v850_v53 = vrot.slane %v2193_v43, 1  ;;  %v802_v55 = vshll.u32 %v2192_v39, 16  ;;  %v807_v60 = vshrl.u32 %v2193_v43, 16  ;;  %v809_v61 = vshll.u32 %v2193_v43, 16  ;;  %v548_v62 = vld [vmem:[#allocation2 + $0x44] sm:$0x1] }
  0x6c   : > { %v851_v58 = vrot.slane %v2194_v48, 1  ;;  %v797_v59 = vrot.slane %v795_v50, 1  ;;  %v2201_v63 = vcombine.low %v848_v46, %v849_v52  ;;  %v814_v1 = vshrl.u32 %v2194_v48, 16  ;;  %v2994_v3 = vld [vmem:[#allocation2 + $0x28] sm:$0xf]  ;;  %v2695_v42 = vld [vmem:[#allocation3 + $0x8] sm:$0xff]  }
  0x6d   : > { %v804_v0 = vrot.slane %v802_v55, 1  ;;  %v816_v2 = vshll.u32 %v2194_v48, 16  ;;  %v811_v7 = vrot.slane %v809_v61, 1  ;;  %v745_v8 = vld [vmem:[#allocation2 + $0x2c] sm:$0x1]  ;;  %v549_v22 = vsel %vm2944_vm5, %v479_v44, %v548_v62  ;;  %v2696_v43 = vld [vmem:[#allocation3 + $0x50] sm:$0xff]  }
  0x6e   : > { %v2204_v4 = vcombine.low %v850_v53, %v851_v58  ;;  %v798_v5 = vor.u32 %v797_v59, %v793_v49  ;;  %v2996_v9 = vld [vmem:[#allocation2 + $0x30] sm:$0xf]  ;;  %2541 = vmatprep.mubr.bf16.mxu1 %v2201_v63  ;;  %v747_v15 = vld [vmem:[#allocation2 + $0x34] sm:$0x1]  ;;  %v2195_v16 = vcombine.low %v2994_v3, %v745_v8  ;;  %v3011_v24 = vld [vmem:[#allocation2 + $0x8] sm:$0xf]  ;;  %v2202_v52 = vcombine.low %v2981_v35, %v2986_v41 }
  0x6f   : > { %v805_v11 = vor.u32 %v804_v0, %v800_v54  ;;  %v818_v14 = vrot.slane %v816_v2, 1  ;;  %v812_v19 = vor.u32 %v811_v7, %v807_v60  ;;  %v2196_v20 = vcombine.low %v2996_v9, %v747_v15  ;;  %v3009_v23 = vld [vmem:[#allocation2 + $0x38] sm:$0xf]  ;;  %v555_v25 = vld [vmem:[#allocation2 + $0xc] sm:$0x1]  ;;  %v2699_v55 = vld [vmem:[#allocation3 + $0x10] sm:$0xff]  }
  0x70   : > { %2542 = vmatmul.mubr.bf16.vlgmr.msra.gmra.mrb[0].mxu1 %v2204_v4  ;;  %v821_v28 = vshrl.u32 %v2195_v16, 16  ;;  %v823_v29 = vshll.u32 %v2195_v16, 16  ;;  %547 = vst [vmem:[#allocation2 + $0x40] sm:$0xf] %v546_v21  ;;  %550 = vst [vmem:[#allocation2 + $0x44] sm:$0x1] %v549_v22  ;;  %v3016_v38 = vcombine.low %v3011_v24, %v555_v25  ;;  %v2205_v15 = vcombine.low %v2994_v3, %v2996_v9 }
  0x71   : > { %2550 = vmatpush3.bf16.msra.mxu1 %v2907_v30  ;;  %v2200_v26 = vcombine.low %v798_v5, %v805_v11  ;;  %v819_v27 = vor.u32 %v818_v14, %v814_v1  ;;  %v749_v31 = vld [vmem:[#allocation2 + $0x3c] sm:$0x1]  ;;  %v828_v40 = vshrl.u32 %v2196_v20, 16  ;;  %v830_v32 = vshll.u32 %v2196_v20, 16  ;;  %v2697_v44 = vld [vmem:[#allocation3 + $0x98] sm:$0xff]   ;;  %v2701_v59 = vld [vmem:[#allocation3 + $0xa0] sm:$0xff]  }
  0x72   : > { %2551 = vmatprep.subr.bf16.mxu1 %v2690_v6  ;;  %v852_v33 = vrot.slane %v2195_v16, 1  ;;  %v853_v47 = vrot.slane %v2196_v20, 1  ;;  %v825_v36 = vrot.slane %v823_v29, 1  ;;  %v2197_v37 = vcombine.low %v3009_v23, %v749_v31  ;;  %v2700_v58 = vld [vmem:[#allocation3 + $0x58] sm:$0xff]   ;;  %v2705_v2 = vld [vmem:[#allocation3 + $0x60] sm:$0xff]   ;;  %v2709_v16 = vld [vmem:[#allocation3 + $0x68] sm:$0xff]  }
  0x73   : > { %1121 = vmatprep.mubr.bf16.mxu0 %v2200_v26  ;;  %v2203_v34 = vcombine.low %v812_v19, %v819_v27  ;;  %v832_v30 = vrot.slane %v830_v32, 1  ;;  %v664_v49 = vrot.slane %v2999_v10, 1  ;;  %v665_v50 = vrot.slane %v3016_v38, 1  ;;  %v2702_v41 = vld [vmem:[#allocation3 + $0x18] sm:$0xff]   ;;  %v2708_v7 = vld [vmem:[#allocation3 + $0x20] sm:$0xff]   ;;  %v2710_v20 = vld [vmem:[#allocation3 + $0xb0] sm:$0xff]  }
  0x74   : > { %1122 = vmatmul.mubr.bf16.vlgmr.msra.gmra.mrb[0].mxu0 %v2199_v12  ;;  %v2207_v39 = vcombine.low %v852_v33, %v853_v47  ;;  %v837_v45 = vshll.u32 %v2197_v37, 16  ;;  %v826_v46 = vor.u32 %v825_v36, %v821_v28  ;;  %v854_v57 = vrot.slane %v2197_v37, 1  ;;  %v3025_v12 = vld [vmem:[#allocation2 + $0x10] sm:$0xf]  ;;  %v559_v19 = vld [vmem:[#allocation2 + $0x1c] sm:$0x1] }
  0x75   : > { %2422 = vmatpush3.bf16.msra.mxu0 %v2692_v13  ;;  %2552 = vmatpush3.bf16.msra.mxu1 %v2690_v6  ;;  %v833_v48 = vor.u32 %v832_v30, %v828_v40  ;;  %v835_v60 = vshrl.u32 %v2197_v37, 16  ;;  %v2237_v35 = vcombine.low %v664_v49, %v665_v50  ;;  %v2706_v6 = vld [vmem:[#allocation3 + $0xa8] sm:$0xff]   ;;  %v611_v13 = vshll.u32 %v2999_v10, 16  ;;  %v2714_v3 = vld [vmem:[#allocation3 + $0x70] sm:$0xff]   ;;  %v2715_v9 = vld [vmem:[#allocation3 + $0xb8] sm:$0xff]  }
  0x76   : > { %2423 = vmatprep.subr.bf16.mxu0 %v2693_v17  ;;  %2553 = vmatprep.subr.bf16.mxu1 %v2694_v18  ;;  %v839_v61 = vrot.slane %v837_v45, 1  ;;  %v618_v14 = vshll.u32 %v3016_v38, 16  ;;  %v557_v17 = vld [vmem:[#allocation2 + $0x14] sm:$0x1]  ;;  %v609_v21 = vshrl.u32 %v2999_v10, 16  ;;  %v2713_v22 = vld [vmem:[#allocation3 + $0x28] sm:$0xff]  }
  0x77   : > { %1129 = vmatprep.mubr.bf16.mxu0 %v2203_v34  ;;  %2545 = vmatprep.mubr.bf16.mxu1 %v2207_v39  ;;  %v3022_v53 = vld [vmem:[#allocation2 + $0x40] sm:$0xf]  ;;  %v751_v54 = vld [vmem:[#allocation2 + $0x44] sm:$0x1]  ;;  %v2206_v62 = vcombine.low %v826_v46, %v833_v48  ;;  %v613_v26 = vrot.slane %v611_v13, 1  ;;  %v616_v27 = vshrl.u32 %v3016_v38, 16  ;;  %v2185_v29 = vcombine.low %v3025_v12, %v557_v17 }
  0x78   : > { %v2198_v56 = vcombine.low %v3022_v53, %v751_v54  ;;  %v840_v8 = vor.u32 %v839_v61, %v835_v60  ;;  %v620_v28 = vrot.slane %v618_v14, 1  ;;  %v3037_v40 = vld [vmem:[#allocation2 + $0x20] sm:$0xf]  ;;  %v561_v32 = vld [vmem:[#allocation2 + $0x24] sm:$0x1]  ;;  %v2208_v30 = vcombine.low %v3009_v23, %v3022_v53  ;;  %v2718_v39 = vld [vmem:[#allocation3 + $0x78] sm:$0xff]  }
  0x79   : > { %2424 = vmatpush3.bf16.msra.mxu0 %v2695_v42  ;;  %2554 = vmatpush3.bf16.msra.mxu1 %v2694_v18  ;;  %v3031_v18 = vld [vmem:[#allocation2 + $0x18] sm:$0xf]  ;;  %v625_v10 = vshll.u32 %v2185_v29, 16  ;;  %v3039_v47 = vld [vmem:[#allocation2 + $0x28] sm:$0xf]  ;;  %v2717_v36 = vld [vmem:[#allocation3 + $0x30] sm:$0xff]   ;;  %v614_v37 = vor.u32 %v613_v26, %v609_v21  ;;  %v3046_v48 = vcombine.low %v3037_v40, %v561_v32  ;;  %v2235_v14 = vcombine.low %v2992_v51, %v3011_v24 }
  0x7a   : > { %2425 = vmatprep.subr.bf16.mxu0 %v2696_v43  ;;  %2555 = vmatprep.subr.bf16.mxu1 %v2697_v44  ;;  %v855_v63 = vrot.slane %v2198_v56, 1  ;;  %v842_v0 = vshrl.u32 %v2198_v56, 16  ;;  %v844_v1 = vshll.u32 %v2198_v56, 16  ;;  %v2186_v31 = vcombine.low %v3031_v18, %v559_v19  ;;  %v563_v34 = vld [vmem:[#allocation2 + $0x2c] sm:$0x1]  ;;  %v2721_v42 = vld [vmem:[#allocation3 + $0x200] sm:$0xff]  }
  0x7b   : > { %v621_v38 = vor.u32 %v620_v28, %v616_v27  ;;  %v666_v43 = vrot.slane %v2185_v29, 1  ;;  %v3043_v45 = vld [vmem:[#allocation2 + $0x30] sm:$0xf]  ;;  %v565_v46 = vld [vmem:[#allocation2 + $0x34] sm:$0x1]  ;;  %v3049_v49 = vcombine.low %v3039_v47, %v563_v34  ;;  %v623_v23 = vshrl.u32 %v2185_v29, 16 }
  0x7c   : > { %1130 = vmatmul.mubr.bf16.gmra.mrb[4].mxu0 %v2202_v52  ;;  %v2210_v4 = vcombine.low %v854_v57, %v855_v63  ;;  %v846_v5 = vrot.slane %v844_v1, 1  ;;  %v632_v33 = vshll.u32 %v2186_v31, 16  ;;  %v3051_v50 = vld [vmem:[#allocation2 + $0x38] sm:$0xf]  ;;  %v567_v52 = vld [vmem:[#allocation2 + $0x3c] sm:$0x1]  ;;  %v3058_v61 = vcombine.low %v3043_v45, %v565_v46 }
  0x7d   : > { %2426 = vmatpush3.bf16.msra.mxu0 %v2699_v55  ;;  %2556 = vmatpush3.bf16.msra.mxu1 %v2697_v44  ;;  %v667_v44 = vrot.slane %v2186_v31, 1  ;;  %v627_v53 = vrot.slane %v625_v10, 1  ;;  %v630_v54 = vshrl.u32 %v2186_v31, 16  ;;  %v2236_v56 = vcombine.low %v614_v37, %v621_v38  ;;  %v1519_v63 = vld [vmem:[#allocation2 + $0x14] sm:$0x1]  ;;  %v2729_v19 = vld [vmem:[#allocation3 + $0x1c8] sm:$0xff]  }
  0x7e   : > { %2427 = vmatprep.subr.bf16.mxu0 %v2700_v58  ;;  %2557 = vmatprep.subr.bf16.mxu1 %v2701_v59  ;;  %v847_v11 = vor.u32 %v846_v5, %v842_v0  ;;  %v634_v55 = vrot.slane %v632_v33, 1  ;;  %v668_v57 = vrot.slane %v3046_v48, 1  ;;  %v669_v58 = vrot.slane %v3049_v49, 1  ;;  %v3063_v0 = vld [vmem:[#allocation2 + $0x18] sm:$0xf]  ;;  %v2728_v17 = vld [vmem:[#allocation3 + $0x180] sm:$0xff]  }
  0x7f   : > { %1137 = vmatprep.mubr.bf16.mxu0 %v2206_v62  ;;  %2546 = vmatmul.mubr.bf16.gmra.mrb[4].mxu1 %v2210_v4  ;;  %v2240_v60 = vcombine.low %v666_v43, %v667_v44  ;;  %v3061_v62 = vcombine.low %v3051_v50, %v567_v52  ;;  %v1521_v1 = vld [vmem:[#allocation2 + $0x1c] sm:$0x1]  ;;  %v628_v4 = vor.u32 %v627_v53, %v623_v23  ;;  %v637_v21 = vshrl.u32 %v3046_v48, 16  ;;  %v2733_v29 = vld [vmem:[#allocation3 + $0x218] sm:$0xff]   ;;  %v2735_v37 = vld [vmem:[#allocation3 + $0x190] sm:$0xff]  }
  0x80   : > { %2565 = vmatprep.mubr.bf16.mxu1 %v2237_v35  ;;  %v2209_v25 = vcombine.low %v840_v8, %v847_v11  ;;  %v2722_v35 = vld [vmem:[#allocation3 + $0x38] sm:$0xff]   ;;  %v635_v5 = vor.u32 %v634_v55, %v630_v54  ;;  %v2243_v8 = vcombine.low %v668_v57, %v669_v58  ;;  %v3071_v13 = vcombine.low %v3063_v0, %v1521_v1  ;;  %v2744_v23 = vld [vmem:[#allocation3 + $0x1a0] sm:$0xff]   ;;  %v3089_v55 = vld [vmem:[#allocation2 + $0x20] sm:$0xf] }
  0x81   : > { %2428 = vmatpush3.bf16.msra.mxu0 %v2702_v41  ;;  %2558 = vmatpush3.bf16.msra.mxu1 %v2701_v59  ;;  %v3055_v59 = vld [vmem:[#allocation2 + $0x10] sm:$0xf]  ;;  %v653_v10 = vshll.u32 %v3058_v61, 16  ;;  %v660_v33 = vshll.u32 %v3061_v62, 16  ;;  %v2736_v38 = vld [vmem:[#allocation3 + $0x1d8] sm:$0xff]   ;;  %v658_v44 = vshrl.u32 %v3061_v62, 16  ;;  %v2241_v57 = vcombine.low %v3037_v40, %v3039_v47 }
  0x82   : > { %2429 = vmatprep.subr.bf16.mxu0 %v2705_v2  ;;  %2559 = vmatprep.subr.bf16.mxu1 %v2706_v6  ;;  %v2725_v41 = vld [vmem:[#allocation3 + $0x1c0] sm:$0xff]   ;;  %v2726_v2 = vld [vmem:[#allocation3 + $0x208] sm:$0xff]   ;;  %v3068_v11 = vcombine.low %v3055_v59, %v1519_v63  ;;  %v2239_v26 = vcombine.low %v628_v4, %v635_v5  ;;  %v1631_v24 = vrot.slane %v3071_v13, 1  ;;  %v1584_v52 = vshll.u32 %v3071_v13, 16  ;;  %v3093_v58 = vld [vmem:[#allocation2 + $0x28] sm:$0xf] }
  0x83   : > { %v655_v43 = vrot.slane %v653_v10, 1  ;;  %v662_v46 = vrot.slane %v660_v33, 1  ;;  %v3097_v63 = vld [vmem:[#allocation2 + $0x38] sm:$0xf]  ;;  %v1529_v1 = vld [vmem:[#allocation2 + $0x3c] sm:$0x1] }
  0x84   : > { %1138 = vmatmul.mubr.bf16.gmra.mrb[8].mxu0 %v2205_v15  ;;  %v670_v15 = vrot.slane %v3058_v61, 1  ;;  %v1630_v51 = vrot.slane %v3068_v11, 1  ;;  %v1582_v40 = vshrl.u32 %v3071_v13, 16  ;;  %v1586_v47 = vrot.slane %v1584_v52, 1  ;;  %v2750_v13 = vld [vmem:[#allocation3 + $0x1f0] sm:$0xff]   ;;  %v2756_v33 = vld [vmem:[#allocation3 + $0x1f8] sm:$0xff]  }
  0x85   : > { %2430 = vmatpush3.bf16.msra.mxu0 %v2708_v7  ;;  %2560 = vmatpush3.bf16.msra.mxu1 %v2706_v6  ;;  %v639_v6 = vshll.u32 %v3046_v48, 16  ;;  %v646_v7 = vshll.u32 %v3049_v49, 16  ;;  %v2742_v48 = vld [vmem:[#allocation3 + $0x228] sm:$0xff]   ;;  %v663_v54 = vor.u32 %v662_v46, %v658_v44  ;;  %v2279_v44 = vcombine.low %v3055_v59, %v3063_v0 }
  0x86   : > { %2431 = vmatprep.subr.bf16.mxu0 %v2709_v16  ;;  %2561 = vmatprep.subr.bf16.mxu1 %v2710_v20  ;;  %v671_v16 = vrot.slane %v3061_v62, 1  ;;  %v2281_v34 = vcombine.low %v1630_v51, %v1631_v24  ;;  %v1527_v62 = vld [vmem:[#allocation2 + $0x34] sm:$0x1]  ;;  %v2282_v59 = vcombine.low %v3089_v55, %v3093_v58 }
  0x87   : > { %1145 = vmatprep.mubr.bf16.mxu0 %v2209_v25  ;;  %v644_v25 = vshrl.u32 %v3049_v49, 16  ;;  %v648_v27 = vrot.slane %v646_v7, 1  ;;  %v1577_v49 = vshll.u32 %v3068_v11, 16 }
  0x88   : > { %v2246_v28 = vcombine.low %v670_v15, %v671_v16  ;;  %v2749_v15 = vld [vmem:[#allocation3 + $0x1a8] sm:$0xff]  }
  0x89   : > { %2432 = vmatpush3.bf16.msra.mxu0 %v2713_v22  ;;  %2562 = vmatpush3.bf16.msra.mxu1 %v2710_v20  ;;  %v2730_v20 = vld [vmem:[#allocation3 + $0x210] sm:$0xff]   ;;  %v641_v22 = vrot.slane %v639_v6, 1  ;;  %v649_v32 = vor.u32 %v648_v27, %v644_v25  ;;  %v1579_v4 = vrot.slane %v1577_v49, 1  ;;  %v2244_v27 = vcombine.low %v3043_v45, %v3051_v50 }
  0x8a   : > { %2433 = vmatprep.subr.bf16.mxu0 %v2714_v3  ;;  %2563 = vmatprep.subr.bf16.mxu1 %v2715_v9  ;;  %v2731_v3 = vld [vmem:[#allocation3 + $0x188] sm:$0xff]  }
  0x8b   : > { %v642_v31 = vor.u32 %v641_v22, %v637_v21  ;;  %v2753_v21 = vld [vmem:[#allocation3 + $0x1b0] sm:$0xff]  }
  0x8c   : > { %1146 = vmatmul.mubr.bf16.gmra.mrb[12].mxu0 %v2208_v30  ;;  %v2737_v30 = vld [vmem:[#allocation3 + $0x220] sm:$0xff]  }
  0x8d   : > { %2434 = vmatpush3.bf16.msra.mxu0 %v2717_v36  ;;  %2564 = vmatpush3.bf16.msra.mxu1 %v2715_v9  ;;  %v2732_v9 = vld [vmem:[#allocation3 + $0x1d0] sm:$0xff]   ;;  %v2238_v36 = vcombine.low %v3025_v12, %v3031_v18  ;;  %v2738_v12 = vld [vmem:[#allocation3 + $0x198] sm:$0xff]   ;;  %v2741_v18 = vld [vmem:[#allocation3 + $0x1e0] sm:$0xff]  }
  0x8e   : > { %2435 = vmatprep.subr.bf16.mxu0 %v2718_v39  ;;  %2573 = vmatprep.subr.bf16.mxu1 %v2721_v42  ;;  %v651_v39 = vshrl.u32 %v3058_v61, 16  ;;  %v3095_v61 = vld [vmem:[#allocation2 + $0x30] sm:$0xf] }
  0x8f   : > { %1419 = vmatprep.mubr.bf16.mxu0 %v2236_v56  ;;  %v1523_v56 = vld [vmem:[#allocation2 + $0x24] sm:$0x1] }
  0x90   : > { %2566 = vmatmul.mubr.bf16.vlgmr.msra.gmra.mrb[0].mxu1 %v2240_v60  ;;  %v656_v53 = vor.u32 %v655_v43, %v651_v39  ;;  %v1525_v60 = vld [vmem:[#allocation2 + $0x2c] sm:$0x1]  ;;  %v2273_v6 = vcombine.low %v3089_v55, %v1523_v56  ;;  %v2814_v55 = vmov 0.0  }
  0x91   : > { %2436 = vmatpush3.bf16.msra.mxu0 %v2722_v35  ;;  %2574 = vmatpush3.bf16.msra.mxu1 %v2721_v42  ;;  %v2242_v42 = vcombine.low %v642_v31, %v649_v32  ;;  %v2747_v35 = vld [vmem:[#allocation3 + $0x1e8] sm:$0xff]   ;;  %v2274_v7 = vcombine.low %v3093_v58, %v1525_v60  ;;  %551 = vst [vmem:[%s3131_s13] sm:$0xff] %v2814_v55 }
  0x92   : > { %2473 = vmatprep.subr.bf16.mxu0 %v2725_v41  ;;  %2575 = vmatprep.subr.bf16.mxu1 %v2726_v2  ;;  %v2748_v41 = vld [vmem:[#allocation3 + $0x230] sm:$0xff]   ;;  %v2245_v5 = vcombine.low %v656_v53, %v663_v54  ;;  %v1632_v22 = vrot.slane %v2273_v6, 1 }
  0x93   : > { %2569 = vmatprep.mubr.bf16.mxu1 %v2243_v8  ;;  %v3104_v8 = vcombine.low %v3095_v61, %v1527_v62  ;;  %v1598_v16 = vshll.u32 %v2274_v7, 16  ;;  %v1633_v25 = vrot.slane %v2274_v7, 1  ;;  %v1596_v32 = vshrl.u32 %v2274_v7, 16 }
  0x94   : > { %1420 = vmatmul.mubr.bf16.vlgmr.msra.gmra.mrb[16].mxu0 %v2235_v14  ;;  %v3107_v14 = vcombine.low %v3097_v63, %v1529_v1 }
  0x95   : > { %2474 = vmatpush3.bf16.msra.mxu0 %v2728_v17  ;;  %2576 = vmatpush3.bf16.msra.mxu1 %v2726_v2  ;;  %v1575_v2 = vshrl.u32 %v3068_v11, 16  ;;  %v1591_v11 = vshll.u32 %v2273_v6, 16  ;;  %v2751_v17 = vld [vmem:[#allocation3 + $0x238] sm:$0xff]   ;;  %v1634_v51 = vrot.slane %v3104_v8, 1  ;;  %v1600_v10 = vrot.slane %v1598_v16, 1 }
  0x96   : > { %2475 = vmatprep.subr.bf16.mxu0 %v2729_v19  ;;  %2577 = vmatprep.subr.bf16.mxu1 %v2730_v20  ;;  %v1635_v24 = vrot.slane %v3107_v14, 1  ;;  %v1612_v43 = vshll.u32 %v3107_v14, 16  ;;  %v1610_v52 = vshrl.u32 %v3107_v14, 16 }
  0x97   : > { %1427 = vmatprep.mubr.bf16.mxu0 %v2239_v26  ;;  %v1580_v19 = vor.u32 %v1579_v4, %v1575_v2  ;;  %v3109_v26 = vld [vmem:[#allocation2 + $0x40] sm:$0xf]  ;;  %v1593_v31 = vrot.slane %v1591_v11, 1  ;;  %v1601_v39 = vor.u32 %v1600_v10, %v1596_v32 }
  0x98   : > { %2570 = vmatmul.mubr.bf16.gmra.mrb[4].mxu1 %v2246_v28  ;;  %v1531_v28 = vld [vmem:[#allocation2 + $0x44] sm:$0x1]  ;;  %v2287_v45 = vcombine.low %v1634_v51, %v1635_v24 }
  0x99   : > { %2476 = vmatpush3.bf16.msra.mxu0 %v2731_v3  ;;  %2578 = vmatpush3.bf16.msra.mxu1 %v2730_v20  ;;  %v1587_v20 = vor.u32 %v1586_v47, %v1582_v40  ;;  %v1532_v3 = vld [vmem:[#allocation2 + $0x48] sm:$0xf]  ;;  %v2277_v50 = vcombine.low %v3109_v26, %v1531_v28  ;;  %v2285_v40 = vcombine.low %v3095_v61, %v3097_v63 }
  0x9a   : > { %2477 = vmatprep.subr.bf16.mxu0 %v2732_v9  ;;  %2579 = vmatprep.subr.bf16.mxu1 %v2733_v29  ;;  %v1533_v9 = vld [vmem:[#allocation2 + $0x4c] sm:$0x1] }
  0x9b   : > { %2589 = vmatprep.mubr.bf16.mxu1 %v2281_v34  ;;  %v2280_v34 = vcombine.low %v1580_v19, %v1587_v20  ;;  %v1636_v46 = vrot.slane %v2277_v50, 1  ;;  %v1617_v0 = vshrl.u32 %v2277_v50, 16 }
  0x9c   : > { %1428 = vmatmul.mubr.bf16.gmra.mrb[20].mxu0 %v2238_v36  ;;  %v2284_v36 = vcombine.low %v1632_v22, %v1633_v25 }
  0x9d   : > { %2478 = vmatpush3.bf16.msra.mxu0 %v2735_v37  ;;  %2580 = vmatpush3.bf16.msra.mxu1 %v2733_v29  ;;  %v1589_v29 = vshrl.u32 %v2273_v6, 16  ;;  %v2278_v37 = vcombine.low %v1532_v3, %v1533_v9 }
  0x9e   : > { %2479 = vmatprep.subr.bf16.mxu0 %v2736_v38  ;;  %2581 = vmatprep.subr.bf16.mxu1 %v2737_v30  ;;  %v2759_v38 = vld [vmem:[#allocation3 + $0x1b8] sm:$0xff]  }
  0x9f   : > { %1435 = vmatprep.mubr.bf16.mxu0 %v2242_v42  ;;  %v1605_v42 = vshll.u32 %v3104_v8, 16  ;;  %v1626_v60 = vshll.u32 %v2278_v37, 16 }
  0xa1   : > { %2480 = vmatpush3.bf16.msra.mxu0 %v2738_v12  ;;  %2582 = vmatpush3.bf16.msra.mxu1 %v2737_v30  ;;  %v1594_v30 = vor.u32 %v1593_v31, %v1589_v29  ;;  %v1637_v12 = vrot.slane %v2278_v37, 1  ;;  %v1607_v49 = vrot.slane %v1605_v42, 1 }
  0xa2   : > { %2481 = vmatprep.subr.bf16.mxu0 %v2741_v18  ;;  %2583 = vmatprep.subr.bf16.mxu1 %v2742_v48  ;;  %v1603_v18 = vshrl.u32 %v3104_v8, 16 }
  0xa3   : > { %v2290_v53 = vcombine.low %v1636_v46, %v1637_v12 }
  0xa4   : > { %1436 = vmatmul.mubr.bf16.gmra.mrb[24].mxu0 %v2241_v57  ;;  %v1608_v54 = vor.u32 %v1607_v49, %v1603_v18  ;;  %v1619_v57 = vshll.u32 %v2277_v50, 16 }
  0xa5   : > { %2482 = vmatpush3.bf16.msra.mxu0 %v2744_v23  ;;  %2584 = vmatpush3.bf16.msra.mxu1 %v2742_v48  ;;  %v2283_v48 = vcombine.low %v1594_v30, %v1601_v39  ;;  %v1614_v23 = vrot.slane %v1612_v43, 1 }
  0xa6   : > { %2483 = vmatprep.subr.bf16.mxu0 %v2747_v35  ;;  %2585 = vmatprep.subr.bf16.mxu1 %v2748_v41  ;;  %v1621_v1 = vrot.slane %v1619_v57, 1  ;;  %v1624_v35 = vshrl.u32 %v2278_v37, 16 }
  0xa7   : > { %1443 = vmatprep.mubr.bf16.mxu0 %v2245_v5  ;;  %v1615_v56 = vor.u32 %v1614_v23, %v1610_v52  ;;  %v2288_v5 = vcombine.low %v3109_v26, %v1532_v3 }
  0xa8   : > { %v1622_v2 = vor.u32 %v1621_v1, %v1617_v0 }
  0xa9   : > { %2484 = vmatpush3.bf16.msra.mxu0 %v2749_v15  ;;  %2586 = vmatpush3.bf16.msra.mxu1 %v2748_v41  ;;  %v2286_v62 = vcombine.low %v1608_v54, %v1615_v56  ;;  %v1628_v41 = vrot.slane %v1626_v60, 1 }
  0xaa   : > { %2485 = vmatprep.subr.bf16.mxu0 %v2750_v13  ;;  %2587 = vmatprep.subr.bf16.mxu1 %v2751_v17 }
  0xab   : > { %v1629_v4 = vor.u32 %v1628_v41, %v1624_v35 }
  0xac   : > { %1444 = vmatmul.mubr.bf16.gmra.mrb[28].mxu0 %v2244_v27 }
  0xad   : > { %2486 = vmatpush3.bf16.msra.mxu0 %v2753_v21  ;;  %2588 = vmatpush3.bf16.msra.mxu1 %v2751_v17  ;;  %v2289_v47 = vcombine.low %v1622_v2, %v1629_v4 }
  0xae   : > { %2487 = vmatprep.subr.bf16.mxu0 %v2756_v33  ;;  %1903 = vmatprep.mubr.bf16.mxu0 %v2280_v34 }
  0xb0   : > { %2590 = vmatmul.mubr.bf16.vlgmr.msra.gmra.mrb[0].mxu1 %v2284_v36 }
  0xb1   : > { %2488 = vmatpush3.bf16.msra.mxu0 %v2759_v38  ;;  %2593 = vmatprep.mubr.bf16.mxu1 %v2287_v45 }
  0xb4   : > { %1904 = vmatmul.mubr.bf16.vlgmr.msra.gmra.mrb[32].mxu0 %v2279_v44 }
  0xb5   : > { %1911 = vmatprep.mubr.bf16.mxu0 %v2283_v48 }
  0xb8   : > { %2594 = vmatmul.mubr.bf16.gmra.mrb[4].mxu1 %v2290_v53 }
  0xbc   : > { %1912 = vmatmul.mubr.bf16.gmra.mrb[36].mxu0 %v2282_v59 }
  0xbd   : > { %1919 = vmatprep.mubr.bf16.mxu0 %v2286_v62 }
  0xc4   : > { %1920 = vmatmul.mubr.bf16.gmra.mrb[40].mxu0 %v2285_v40 }
  0xc5   : > { %1927 = vmatprep.mubr.bf16.mxu0 %v2289_v47 }
  0xcc   : > { %1928 = vmatmul.mubr.bf16.gmra.mrb[44].mxu0 %v2288_v5 }
 0x147   : > { %v2385_v58 = vpop.f32.mrb[0].mxu0 }
 0x148   : > { %v2386_v6 = vpop.f32.mrb[1].mxu0 }
 0x149   : > { %v2387_v7 = vadd.f32 %v2386_v6, %v2385_v58  ;;  %v2388_v8 = vpop.f32.mrb[2].mxu0 }
 0x14a   : > { %v2389_v61 = vpop.f32.mrb[3].mxu0 }
 0x14b   : > { %v2390_v63 = vadd.f32 %v2389_v61, %v2388_v8 }
 0x14f   : > { %v2391_v14 = vpop.f32.mrb[4].mxu0 }
 0x150   : > { %v2392_v15 = vpop.f32.mrb[5].mxu0 }
 0x151   : > { %v2393_v11 = vadd.f32 %v2392_v15, %v2391_v14  ;;  %v2394_v16 = vpop.f32.mrb[6].mxu0 }
 0x152   : > { %v2395_v13 = vpop.f32.mrb[7].mxu0 }
 0x153   : > { %v2396_v17 = vadd.f32 %v2395_v13, %v2394_v16 }
 0x157   : > { %v2397_v19 = vpop.f32.mrb[8].mxu0 }
 0x158   : > { %v2398_v20 = vpop.f32.mrb[9].mxu0 }
 0x159   : > { %v2399_v21 = vadd.f32 %v2398_v20, %v2397_v19  ;;  %v2400_v22 = vpop.f32.mrb[10].mxu0 }
 0x15a   : > { %v2401_v25 = vpop.f32.mrb[11].mxu0 }
 0x15b   : > { %v2402_v26 = vadd.f32 %v2401_v25, %v2400_v22 }
 0x15f   : > { %v2403_v27 = vpop.f32.mrb[12].mxu0 }
 0x160   : > { %v2404_v51 = vpop.f32.mrb[13].mxu0 }
 0x161   : > { %v2405_v24 = vadd.f32 %v2404_v51, %v2403_v27  ;;  %v2406_v28 = vpop.f32.mrb[14].mxu0 }
 0x162   : > { %v2407_v3 = vpop.f32.mrb[15].mxu0 }
 0x163   : > { %v2408_v9 = vadd.f32 %v2407_v3, %v2406_v28 }
 0x167   : > { %v2437_v29 = vpop.f32.mrb[16].mxu0 }
 0x168   : > { %v2438_v31 = vpop.f32.mrb[17].mxu0 }
 0x169   : > { %v2439_v32 = vadd.f32 %v2438_v31, %v2437_v29  ;;  %v2440_v10 = vpop.f32.mrb[18].mxu0 }
 0x16a   : > { %v2441_v33 = vpop.f32.mrb[19].mxu0 }
 0x16b   : > { %v2600_v34 = vadd.f32 %v2439_v32, %v2387_v7  ;;  %v2442_v36 = vadd.f32 %v2441_v33, %v2440_v10 }
 0x16d   : > { %v2606_v45 = vadd.f32 %v2442_v36, %v2390_v63 }
 0x16f   : > { %v2443_v50 = vpop.f32.mrb[20].mxu0 }
 0x170   : > { %v2444_v37 = vpop.f32.mrb[21].mxu0 }
 0x171   : > { %v2445_v38 = vadd.f32 %v2444_v37, %v2443_v50  ;;  %v2446_v30 = vpop.f32.mrb[22].mxu0 }
 0x172   : > { %v2447_v39 = vpop.f32.mrb[23].mxu0 }
 0x173   : > { %v2597_v42 = vadd.f32 %v2445_v38, %v2393_v11  ;;  %v2448_v43 = vadd.f32 %v2447_v39, %v2446_v30 }
 0x175   : > { %v2603_v44 = vadd.f32 %v2448_v43, %v2396_v17 }
 0x177   : > { %v2449_v46 = vpop.f32.mrb[24].mxu0 }
 0x178   : > { %v2450_v12 = vpop.f32.mrb[25].mxu0 }
 0x179   : > { %v2451_v18 = vadd.f32 %v2450_v12, %v2449_v46  ;;  %v2452_v48 = vpop.f32.mrb[26].mxu0 }
 0x17a   : > { %v2453_v49 = vpop.f32.mrb[27].mxu0 }
 0x17b   : > { %v2612_v52 = vadd.f32 %v2451_v18, %v2399_v21  ;;  %v2454_v23 = vadd.f32 %v2453_v49, %v2452_v48 }
 0x17d   : > { %v2618_v53 = vadd.f32 %v2454_v23, %v2402_v26 }
 0x17f   : > { %v2455_v54 = vpop.f32.mrb[28].mxu0 }
 0x180   : > { %v2456_v56 = vpop.f32.mrb[29].mxu0 }
 0x181   : > { %v2457_v57 = vadd.f32 %v2456_v56, %v2455_v54  ;;  %v2458_v60 = vpop.f32.mrb[30].mxu0 }
 0x182   : > { %v2459_v59 = vpop.f32.mrb[31].mxu0 }
 0x183   : > { %v3134_v0 = vadd.f32 %v2457_v57, %v2405_v24  ;;  %v2460_v62 = vadd.f32 %v2459_v59, %v2458_v60  ;;  %v2591_v1 = vpop.f32.mrb[0].mxu1 }
 0x184   : > { %v1970_v35 = vpop.f32.mrb[1].mxu1 }
 0x185   : > { %v3136_v41 = vadd.f32 %v2460_v62, %v2408_v9  ;;  %v2592_v2 = vpop.f32.mrb[2].mxu1 }
 0x186   : > { %v1973_v4 = vpop.f32.mrb[3].mxu1 }
 0x187   : > { %v2489_v40 = vpop.f32.mrb[32].mxu0 }
 0x188   : > { %v2490_v47 = vpop.f32.mrb[33].mxu0 }
 0x189   : > { %v2491_v5 = vadd.f32 %v2490_v47, %v2489_v40  ;;  %v2492_v55 = vpop.f32.mrb[34].mxu0 }
 0x18a   : > { %v2493_v58 = vpop.f32.mrb[35].mxu0 }
 0x18b   : > { %v2601_v6 = vadd.f32 %v2600_v34, %v2491_v5  ;;  %v2494_v7 = vadd.f32 %v2493_v58, %v2492_v55  ;;  %v2595_v8 = vpop.f32.mrb[4].mxu1 }
 0x18c   : > { %v1986_v61 = vpop.f32.mrb[5].mxu1 }
 0x18d   : > { %v2602_v63 = vadd.f32 %v2601_v6, %v1970_v35  ;;  %v2607_v14 = vadd.f32 %v2606_v45, %v2494_v7  ;;  %v2596_v15 = vpop.f32.mrb[6].mxu1 }
 0x18e   : > { %v1989_v11 = vpop.f32.mrb[7].mxu1 }
 0x18f   : > { %v2608_v16 = vadd.f32 %v2607_v14, %v1973_v4  ;;  %v2495_v13 = vpop.f32.mrb[36].mxu0  ;;  %v2025_v17 = vmul.f32 %v2602_v63, %v2602_v63 }
 0x190   : > { %v2496_v19 = vpop.f32.mrb[37].mxu0 }
 0x191   : > { %v2346_v20 = vpack.c.bf16 %v2608_v16, %v2602_v63  ;;  %v2026_v21 = vmul.f32 %v2608_v16, %v2608_v16  ;;  %v2034_v22 = vadd.f32 %v2608_v16, %v2602_v63  ;;  %v2497_v25 = vadd.f32 %v2496_v19, %v2495_v13  ;;  %v2498_v26 = vpop.f32.mrb[38].mxu0 }
 0x192   : > { %v2499_v27 = vpop.f32.mrb[39].mxu0 }
 0x193   : > { %2347 = vst [vmem:[%s3143_s16] sm:$0xff] %v2346_v20   ;;  %v2050_v51 = vadd.f32 %v2026_v21, %v2025_v17  ;;  %v2598_v24 = vadd.f32 %v2597_v42, %v2497_v25  ;;  %v2500_v28 = vadd.f32 %v2499_v27, %v2498_v26  ;;  %v2049_v21 = vld [vmem:[%s3131_s13 + $0x1] sm:$0x1] }
 0x195   : > { %v2599_v3 = vadd.f32 %v2598_v24, %v2591_v1  ;;  %v2604_v9 = vadd.f32 %v2603_v44, %v2500_v28 }
 0x197   : > { %v2027_v29 = vmul.f32 %v2599_v3, %v2599_v3  ;;  %v2035_v31 = vadd.f32 %v2599_v3, %v2034_v22  ;;  %v2605_v32 = vadd.f32 %v2604_v9, %v2592_v2  ;;  %v2501_v10 = vpop.f32.mrb[40].mxu0 }
 0x198   : > { %v2502_v33 = vpop.f32.mrb[41].mxu0 }
 0x199   : > { %v2051_v34 = vadd.f32 %v2050_v51, %v2027_v29  ;;  %v2351_v36 = vpack.c.bf16 %v2605_v32, %v2599_v3  ;;  %v2028_v45 = vmul.f32 %v2605_v32, %v2605_v32  ;;  %v2036_v50 = vadd.f32 %v2605_v32, %v2035_v31  ;;  %v2504_v37 = vpop.f32.mrb[42].mxu0 }
 0x19a   : > { %v2503_v38 = vadd.f32 %v2502_v33, %v2501_v10  ;;  %v2505_v30 = vpop.f32.mrb[43].mxu0 }
 0x19b   : > { %2366 = vst [vmem:[%s3143_s16 + $0x8] sm:$0xff] %v2351_v36   ;;  %v2052_v39 = vadd.f32 %v2051_v34, %v2028_v45  ;;  %v2506_v43 = vadd.f32 %v2505_v30, %v2504_v37 }
 0x19c   : > { %v2613_v42 = vadd.f32 %v2612_v52, %v2503_v38 }
 0x19d   : > { %v2619_v46 = vadd.f32 %v2618_v53, %v2506_v43 }
 0x19e   : > { %v2614_v12 = vadd.f32 %v2613_v42, %v1986_v61 }
 0x19f   : > { %v2620_v44 = vadd.f32 %v2619_v46, %v1989_v11  ;;  %v2507_v18 = vpop.f32.mrb[44].mxu0 }
 0x1a0   : > { %v2029_v48 = vmul.f32 %v2614_v12, %v2614_v12  ;;  %v2037_v49 = vadd.f32 %v2614_v12, %v2036_v50  ;;  %v2508_v23 = vpop.f32.mrb[45].mxu0 }
 0x1a1   : > { %v2356_v54 = vpack.c.bf16 %v2620_v44, %v2614_v12  ;;  %v2030_v56 = vmul.f32 %v2620_v44, %v2620_v44  ;;  %v2509_v57 = vadd.f32 %v2508_v23, %v2507_v18  ;;  %v2510_v60 = vpop.f32.mrb[46].mxu0 }
 0x1a2   : > { %v2053_v59 = vadd.f32 %v2052_v39, %v2029_v48  ;;  %v2038_v62 = vadd.f32 %v2620_v44, %v2037_v49  ;;  %v2511_v1 = vpop.f32.mrb[47].mxu0 }
 0x1a3   : > { %2367 = vst [vmem:[%s3143_s16 + $0x10] sm:$0xff] %v2356_v54   ;;  %v2610_v35 = vadd.f32 %v3134_v0, %v2509_v57  ;;  %v2512_v2 = vadd.f32 %v2511_v1, %v2510_v60 }
 0x1a4   : > { %v2054_v52 = vadd.f32 %v2053_v59, %v2030_v56 }
 0x1a5   : > { %v2611_v53 = vadd.f32 %v2610_v35, %v2595_v8  ;;  %v2616_v4 = vadd.f32 %v3136_v41, %v2512_v2 }
 0x1a7   : > { %v2031_v40 = vmul.f32 %v2611_v53, %v2611_v53  ;;  %v2039_v47 = vadd.f32 %v2611_v53, %v2038_v62  ;;  %v2617_v5 = vadd.f32 %v2616_v4, %v2596_v15  ;;  %v2033_v15 = vld [vmem:[%s3131_s13] sm:$0x1] }
 0x1a9   : > { %v2055_v55 = vadd.f32 %v2054_v52, %v2031_v40  ;;  %v2361_v58 = vpack.c.bf16 %v2617_v5, %v2611_v53  ;;  %v2032_v6 = vmul.f32 %v2617_v5, %v2617_v5  ;;  %v2040_v7 = vadd.f32 %v2617_v5, %v2039_v47 }
 0x1ab   : > { %2368 = vst [vmem:[%s3143_s16 + $0x18] sm:$0xff] %v2361_v58   ;;  %v2041_v61 = vrot.slane %v2040_v7, 4  ;;  %v2056_v63 = vadd.f32 %v2055_v55, %v2032_v6 }
 0x1ad   : > { %v2042_v14 = vadd.f32 %v2041_v61, %v2040_v7  ;;  %v2057_v0 = vrot.slane %v2056_v63, 4 }
 0x1af   : > { %v2043_v11 = vrot.slane %v2042_v14, 2  ;;  %v2058_v8 = vadd.f32 %v2057_v0, %v2056_v63 }
 0x1b1   : > { %v2044_v16 = vadd.f32 %v2043_v11, %v2042_v14  ;;  %v2059_v41 = vrot.slane %v2058_v8, 2 }
 0x1b3   : > { %v2045_v13 = vrot.slane %v2044_v16, 1  ;;  %v2060_v17 = vadd.f32 %v2059_v41, %v2058_v8 }
 0x1b5   : > { %v2046_v19 = vadd.f32 %v2045_v13, %v2044_v16  ;;  %v2061_v20 = vrot.slane %v2060_v17, 1 }
 0x1b7   : > { %v2047_v22 = vadd.f32 %v2046_v19, %v2033_v15  ;;  %v2062_v25 = vadd.f32 %v2061_v20, %v2060_v17 }
 0x1b9   : > { %2048 = vst [vmem:[%s3131_s13] sm:$0x1] %v2047_v22  ;;  %v2063_v26 = vadd.f32 %v2062_v25, %v2049_v21 }
 0x1bb   : > { %2064 = vst [vmem:[%s3131_s13 + $0x1] sm:$0x1] %v2063_v26 }
 0x1bc PF: > { %s19_s24 = sadd.s32 1, %s2808_s24  }
 0x1bd   : > { %p16_p3 = scmp.ge.s32.totalorder %s19_s24, 4  }
 0x1bf   :  { %18 = sbr.rel (!%p16_p3) target bundleno = 1 (0x1), region = 95 }
 0x1c6   :  { %2100 = vsyncpa [#allocation4], 1 }
 0x1c7   :  { %2102 = vsyncpa [#allocation4 + $0x1], 1 }

</bundles_post_ra>
